<compile_context>
chip_gen: v7x
topology: tpu7x:2x2x1
jax: 0.10.0
libtpu: 0.0.40
codegen_flags: <defaults>
</compile_context>

<pallas_src>
import functools

import jax
import jax.numpy as jnp
from jax import lax
from jax.experimental import pallas as pl
from jax.experimental.pallas import tpu as pltpu

EPS = 1e-5  # GroupNorm eps (PyTorch default)


# --------------------------------------------------------------------------
# In-kernel helpers
# --------------------------------------------------------------------------
def _group_norm(y, gmask, gamma, beta, inv_n):
    """GroupNorm over a (C, S) tile.

    Per-channel sum / sum-of-squares are lane reductions; a single
    (C, C) @ (C, 2) matmul with the precomputed block-diagonal group mask
    aggregates them per group and broadcasts back per channel."""
    stats = jnp.concatenate(
        [jnp.sum(y, axis=1, keepdims=True),
         jnp.sum(y * y, axis=1, keepdims=True)], axis=1)          # (C, 2)
    agg = jnp.dot(gmask, stats, preferred_element_type=jnp.float32) * inv_n
    mean = agg[:, 0:1]
    # NOTE: E[x^2]-E[x]^2 in f32 (guarded by max(.,0)); inputs here are
    # conv activations with ~zero mean so cancellation drift is negligible.
    var = jnp.maximum(agg[:, 1:2] - mean * mean, 0.0)
    return (y - mean) * lax.rsqrt(var + EPS) * gamma + beta


def _fsm_offset_core(H, W, dg, groups, tap_chunk,
                     x_bf, up_bf,
                     w_att, b_att, g1, be1, gmask_in,
                     w_conv, b_conv, g2, be2, gmask_out,
                     w_offa, w_offb, b_off, g_off, be_off,
                     w_com, b_com, border):
    """FeatureSelectionModule + offset 1x1 conv + GN + 3x3 conv_offset_mask.

    Returns feat_arm (C,S) f32 and o1 / o2 / sigmoid(mask), each (9*dg, S) f32
    with rows ordered tap-major (k*dg + g)."""
    S = H * W
    C = w_conv.shape[0]
    Cin = x_bf.shape[0]
    dgk = dg * 9

    x = x_bf.astype(jnp.float32)                                   # (Cin, S)

    # ---- FeatureSelectionModule ----
    gap = jnp.mean(x, axis=1, keepdims=True)                       # (Cin, 1)
    att = jnp.dot(w_att, gap, preferred_element_type=jnp.float32) + b_att
    att = jax.nn.sigmoid(
        _group_norm(att, gmask_in, g1, be1, 1.0 / float(Cin // groups)))
    xs = (x * (1.0 + att)).astype(jnp.bfloat16)                    # x + x*atten
    y = jnp.dot(w_conv, xs, preferred_element_type=jnp.float32) + b_conv
    inv_n_out = 1.0 / float((C // groups) * S)
    feat_arm = _group_norm(y, gmask_out, g2, be2, inv_n_out)       # (C, S) f32

    # ---- offset = GN(W_a @ feat_arm + (2*W_b) @ feat_up + b)  (no concat) ----
    off = (jnp.dot(w_offa, feat_arm.astype(jnp.bfloat16),
                   preferred_element_type=jnp.float32)
           + jnp.dot(w_offb, up_bf, preferred_element_type=jnp.float32)
           + b_off)
    off = _group_norm(off, gmask_out, g_off, be_off, inv_n_out)    # (C, S) f32

    # ---- dcn_v2 conv_offset_mask: 3x3 / pad 1 via in-VMEM lane rolls,
    #      taps stacked into a (9C, S) bf16 buffer -> one K=9C MXU matmul ----
    def tap(k):
        ki, kj = k // 3 - 1, k % 3 - 1
        d = ki * W + kj
        rolled = off if d == 0 else pltpu.roll(off, shift=(-d) % S, axis=1)
        return (rolled * border[k]).astype(jnp.bfloat16)           # (C, S)

    acc = None
    for k0 in range(0, 9, tap_chunk):
        k1 = min(k0 + tap_chunk, 9)
        cols = jnp.concatenate([tap(k) for k in range(k0, k1)], axis=0)
        part = jnp.dot(w_com[:, k0 * C:k1 * C], cols,
                       preferred_element_type=jnp.float32)
        acc = part if acc is None else acc + part
    om = acc + b_com                                               # (3*dgk, S)
    o1 = om[:dgk]                       # dy, rows ordered k*dg + g
    o2 = om[dgk:2 * dgk]                # dx
    m = jax.nn.sigmoid(om[2 * dgk:])    # modulation mask
    return feat_arm, o1, o2, m


def _dcn_core(H, W, dg, tap_chunk, feat, o1, o2, m, base, expand, w_dcn, b_dcn):
    """Modulated deformable 3x3 conv on a VMEM-resident (C, S) feature tile.

    Coordinate / bilinear math at deformable-group width (dg rows per tap);
    only the int gather indices and combined corner weights are expanded to
    channel width with a 0/1 matmul. Bilinear corners are fetched with an
    in-VMEM lane gather. Returns conv output + bias, (C, S) f32."""
    S = H * W
    C = feat.shape[0]
    base_y = base[0:1]                                             # (1, S)
    base_x = base[1:2]

    def tap_cols(k):
        ki, kj = k // 3 - 1, k % 3 - 1
        sl = slice(k * dg, (k + 1) * dg)
        py = o1[sl] + (base_y + float(ki))                         # (dg, S)
        px = o2[sl] + (base_x + float(kj))
        mk = m[sl]
        y0 = jnp.floor(py)
        x0 = jnp.floor(px)
        ly = py - y0
        lx = px - x0

        idx_planes, wgt_planes = [], []
        for cy, cx in ((0., 0.), (0., 1.), (1., 0.), (1., 1.)):
            yc = y0 + cy
            xc = x0 + cx
            valid = ((yc >= 0.) & (yc <= H - 1.) & (xc >= 0.) & (xc <= W - 1.))
            idx = jnp.clip(yc, 0., H - 1.) * float(W) + jnp.clip(xc, 0., W - 1.)
            wy = (1.0 - ly) if cy == 0. else ly
            wx = (1.0 - lx) if cx == 0. else lx
            idx_planes.append(idx)
            wgt_planes.append(jnp.where(valid, wy * wx, 0.0) * mk)

        # Expand (dg, S) planes to channel width with one 0/1 matmul.
        # HIGHEST precision keeps the integer gather indices exact.
        grp = jnp.concatenate(idx_planes + wgt_planes, axis=1)     # (dg, 8S)
        ch = jnp.dot(expand, grp, precision=jax.lax.Precision.HIGHEST,
                     preferred_element_type=jnp.float32)           # (C, 8S)

        val = jnp.zeros((C, S), jnp.float32)
        for i in range(4):
            idx_c = ch[:, i * S:(i + 1) * S].astype(jnp.int32)
            w_c = ch[:, (4 + i) * S:(5 + i) * S]
            # indices are clipped above -> promise_in_bounds is safe.
            g = jnp.take_along_axis(feat, idx_c, axis=1,
                                    mode="promise_in_bounds")
            val = val + w_c * g
        return val.astype(jnp.bfloat16)                            # (C, S)

    acc = None
    for k0 in range(0, 9, tap_chunk):
        k1 = min(k0 + tap_chunk, 9)
        cols = jnp.concatenate([tap_cols(k) for k in range(k0, k1)], axis=0)
        part = jnp.dot(w_dcn[:, k0 * C:k1 * C], cols,
                       preferred_element_type=jnp.float32)
        acc = part if acc is None else acc + part
    return acc + b_dcn


# --------------------------------------------------------------------------
# Kernels
# --------------------------------------------------------------------------
def _feature_align_kernel(H, W, dg, groups, tap_chunk,
                          feat_l_ref, feat_up_ref,
                          w_att_ref, b_att_ref, g1_ref, be1_ref, gmask_in_ref,
                          w_conv_ref, b_conv_ref, g2_ref, be2_ref, gmask_out_ref,
                          w_offa_ref, w_offb_ref, b_off_ref, g_off_ref, be_off_ref,
                          w_com_ref, b_com_ref, border_ref,
                          base_ref, expand_ref, w_dcn_ref, b_dcn_ref,
                          out_ref):
    core_vals = (feat_l_ref[0], feat_up_ref[0],
                 w_att_ref[...], b_att_ref[...], g1_ref[...], be1_ref[...],
                 gmask_in_ref[...],
                 w_conv_ref[...], b_conv_ref[...], g2_ref[...], be2_ref[...],
                 gmask_out_ref[...],
                 w_offa_ref[...], w_offb_ref[...], b_off_ref[...],
                 g_off_ref[...], be_off_ref[...],
                 w_com_ref[...], b_com_ref[...], border_ref[...])
    feat_arm, o1, o2, m = _fsm_offset_core(H, W, dg, groups, tap_chunk,
                                           *core_vals)
    feat = feat_up_ref[0].astype(jnp.float32)                      # gather source
    conv = _dcn_core(H, W, dg, tap_chunk, feat, o1, o2, m,
                     base_ref[...], expand_ref[...],
                     w_dcn_ref[...], b_dcn_ref[...])
    out_ref[0] = (jnp.maximum(conv, 0.0) + feat_arm).astype(out_ref.dtype)


def _fsm_offset_kernel(H, W, dg, groups, tap_chunk,
                       feat_l_ref, feat_up_ref,
                       w_att_ref, b_att_ref, g1_ref, be1_ref, gmask_in_ref,
                       w_conv_ref, b_conv_ref, g2_ref, be2_ref, gmask_out_ref,
                       w_offa_ref, w_offb_ref, b_off_ref, g_off_ref, be_off_ref,
                       w_com_ref, b_com_ref, border_ref,
                       feat_arm_ref, offmask_ref):
    core_vals = (feat_l_ref[0], feat_up_ref[0],
                 w_att_ref[...], b_att_ref[...], g1_ref[...], be1_ref[...],
                 gmask_in_ref[...],
                 w_conv_ref[...], b_conv_ref[...], g2_ref[...], be2_ref[...],
                 gmask_out_ref[...],
                 w_offa_ref[...], w_offb_ref[...], b_off_ref[...],
                 g_off_ref[...], be_off_ref[...],
                 w_com_ref[...], b_com_ref[...], border_ref[...])
    feat_arm, o1, o2, m = _fsm_offset_core(H, W, dg, groups, tap_chunk,
                                           *core_vals)
    feat_arm_ref[0] = feat_arm.astype(feat_arm_ref.dtype)
    offmask_ref[0] = jnp.concatenate([o1, o2, m], axis=0)


def _dcn_cols_kernel(cols_ref, res_ref, w_ref, b_ref, out_ref):
    y = jnp.dot(w_ref[...], cols_ref[0],
                preferred_element_type=jnp.float32) + b_ref[...]
    out_ref[0] = jnp.maximum(y, 0.0) + res_ref[0].astype(jnp.float32)


# --------------------------------------------------------------------------
# pallas_call wrappers
# --------------------------------------------------------------------------
def _full(shape):
    zeros = (0,) * len(shape)
    return pl.BlockSpec(shape, lambda n, _z=zeros: _z)


def _per_sample(c, s):
    return pl.BlockSpec((1, c, s), lambda n: (n, 0, 0))


def _vmem_limit(block_bytes, weight_bytes, scratch_bytes):
    need = 2 * block_bytes + weight_bytes + scratch_bytes
    return int(min(max(2 * need, 32 << 20), 64 << 20))


def _core_consts(p, border):
    return (p["w_att"], p["b_att"], p["g1"], p["be1"], p["gmask_in"],
            p["w_conv"], p["b_conv"], p["g2"], p["be2"], p["gmask_out"],
            p["w_offa"], p["w_offb"], p["b_off"], p["g_off"], p["be_off"],
            p["w_com"], p["b_com"], border)


def fused_call(feat_l_bf, feat_up_bf, consts, *, H, W, dg, groups, tap_chunk):
    n, cin, s = feat_l_bf.shape
    c = feat_up_bf.shape[1]
    dgk = dg * 9
    weight_bytes = sum(int(a.size) * a.dtype.itemsize for a in consts)
    block_bytes = cin * s * 2 + c * s * 2 + c * s * 4
    scratch_bytes = 9 * c * s * 2 + 3 * dgk * s * 4 + 12 * c * s * 4
    flops = 2 * n * s * (c * cin + 2 * c * c + 3 * dgk * 9 * c + 9 * c * c
                         + 9 * 8 * c * dg)
    return pl.pallas_call(
        functools.partial(_feature_align_kernel, H, W, dg, groups, tap_chunk),
        out_shape=jax.ShapeDtypeStruct((n, c, s), jnp.float32),
        grid=(n,),
        in_specs=[_per_sample(cin, s), _per_sample(c, s)]
                 + [_full(a.shape) for a in consts],
        out_specs=_per_sample(c, s),
        compiler_params=pltpu.CompilerParams(
            dimension_semantics=("parallel",),
            vmem_limit_bytes=_vmem_limit(block_bytes, weight_bytes, scratch_bytes)),
        cost_estimate=pl.CostEstimate(
            flops=int(flops),
            transcendentals=int(n * (cin + dgk * s)),
            bytes_accessed=int(n * block_bytes + weight_bytes)),
    )(feat_l_bf, feat_up_bf, *consts)


def fsm_offset_call(feat_l_bf, feat_up_bf, consts, *, H, W, dg, groups, tap_chunk):
    n, cin, s = feat_l_bf.shape
    c = feat_up_bf.shape[1]
    dgk = dg * 9
    weight_bytes = sum(int(a.size) * a.dtype.itemsize for a in consts)
    block_bytes = cin * s * 2 + c * s * 2 + c * s * 2 + 3 * dgk * s * 4
    scratch_bytes = 9 * c * s * 2 + 8 * c * s * 4
    return pl.pallas_call(
        functools.partial(_fsm_offset_kernel, H, W, dg, groups, tap_chunk),
        out_shape=(jax.ShapeDtypeStruct((n, c, s), jnp.bfloat16),
                   jax.ShapeDtypeStruct((n, 3 * dgk, s), jnp.float32)),
        grid=(n,),
        in_specs=[_per_sample(cin, s), _per_sample(c, s)]
                 + [_full(a.shape) for a in consts],
        out_specs=(_per_sample(c, s), _per_sample(3 * dgk, s)),
        compiler_params=pltpu.CompilerParams(
            dimension_semantics=("parallel",),
            vmem_limit_bytes=_vmem_limit(block_bytes, weight_bytes, scratch_bytes)),
    )(feat_l_bf, feat_up_bf, *consts)


def dcn_cols_call(cols_bf, res_bf, w_dcn, b_dcn):
    n, k9c, s = cols_bf.shape
    c = w_dcn.shape[0]
    block_bytes = k9c * s * 2 + 2 * c * s * 4
    return pl.pallas_call(
        _dcn_cols_kernel,
        out_shape=jax.ShapeDtypeStruct((n, c, s), jnp.float32),
        grid=(n,),
        in_specs=[_per_sample(k9c, s), _per_sample(c, s),
                  _full(w_dcn.shape), _full(b_dcn.shape)],
        out_specs=_per_sample(c, s),
        compiler_params=pltpu.CompilerParams(
            dimension_semantics=("parallel",),
            vmem_limit_bytes=_vmem_limit(block_bytes, int(w_dcn.size) * 2, 0)),
    )(cols_bf, res_bf, w_dcn, b_dcn)


# --------------------------------------------------------------------------
# Lane-gather capability probe (shape-keyed, eager on dummy data -> jit-safe)
# --------------------------------------------------------------------------
_LANE_GATHER_OK = {}


def _lane_gather_supported(c, s):
    key = (int(c), int(s))
    if key not in _LANE_GATHER_OK:
        def probe(x_ref, i_ref, o_ref):
            o_ref[...] = jnp.take_along_axis(x_ref[...], i_ref[...], axis=1,
                                             mode="promise_in_bounds")
        try:
            out = pl.pallas_call(
                probe, out_shape=jax.ShapeDtypeStruct((c, s), jnp.float32),
            )(jnp.zeros((c, s), jnp.float32), jnp.zeros((c, s), jnp.int32))
            jax.block_until_ready(out)
            _LANE_GATHER_OK[key] = True
        except Exception:
            _LANE_GATHER_OK[key] = False
    return _LANE_GATHER_OK[key]


# --------------------------------------------------------------------------
# XLA fallback for the data-dependent bilinear sampling (only if the Mosaic
# lane gather cannot lower on this TPU generation / shape).
# --------------------------------------------------------------------------
def _deform_sample_xla(feat, o1, o2, m, dg, h, w):
    """feat (N,C,S) f32; o1/o2/m (N, 9*dg, S) rows tap-major (k*dg+g), m sigmoided.
    Returns modulated im2col columns (N, 9*C, S) bf16, rows ordered k*C + c."""
    # TODO(synk): for very large maps, chunk taps (3 at a time) to bound HBM traffic.
    n, c, s = feat.shape
    kk = 9
    cpg = c // dg

    def expand(t):                                   # (N,9*dg,S) -> (N,9,C,S)
        return jnp.repeat(t.reshape(n, kk, dg, s), cpg, axis=2)

    dy, dx, mm = expand(o1), expand(o2), expand(m)
    ys = (jnp.arange(s) // w).astype(jnp.float32)
    xs = (jnp.arange(s) % w).astype(jnp.float32)
    ki = (jnp.arange(kk) // 3 - 1).astype(jnp.float32).reshape(1, kk, 1, 1)
    kj = (jnp.arange(kk) % 3 - 1).astype(jnp.float32).reshape(1, kk, 1, 1)
    py = ys + ki + dy
    px = xs + kj + dx
    y0 = jnp.floor(py)
    x0 = jnp.floor(px)
    ly = py - y0
    lx = px - x0
    featb = jnp.broadcast_to(feat[:, None], (n, kk, c, s))

    def corner(yc, xc, wgt):
        valid = (yc >= 0) & (yc <= h - 1) & (xc >= 0) & (xc <= w - 1)
        idx = (jnp.clip(yc, 0, h - 1) * w + jnp.clip(xc, 0, w - 1)).astype(jnp.int32)
        v = jnp.take_along_axis(featb, idx, axis=3)
        return jnp.where(valid, v, 0.0) * wgt

    val = (corner(y0, x0, (1 - ly) * (1 - lx))
           + corner(y0, x0 + 1, (1 - ly) * lx)
           + corner(y0 + 1, x0, ly * (1 - lx))
           + corner(y0 + 1, x0 + 1, ly * lx)) * mm
    return val.reshape(n, kk * c, s).astype(jnp.bfloat16)


# --------------------------------------------------------------------------
# Host-side constants
# --------------------------------------------------------------------------
def _group_mask(channels, groups):
    cg = channels // groups
    gid = jnp.arange(channels) // cg
    return (gid[:, None] == gid[None, :]).astype(jnp.float32)


def _border_mask(h, w):
    yy = jnp.arange(h * w) // w
    xx = jnp.arange(h * w) % w
    rows = []
    for k in range(9):
        ki, kj = k // 3 - 1, k % 3 - 1
        valid = ((yy + ki >= 0) & (yy + ki < h) & (xx + kj >= 0) & (xx + kj < w))
        rows.append(valid.astype(jnp.float32))
    return jnp.stack(rows, axis=0).reshape(9, 1, h * w)


def _base_coords(h, w):
    s = jnp.arange(h * w)
    return jnp.stack([(s // w).astype(jnp.float32),
                      (s % w).astype(jnp.float32)], axis=0)         # (2, S)


# --------------------------------------------------------------------------
# Full FeatureAlign_V2 forward
# --------------------------------------------------------------------------
def feature_align_v2(feat_l, feat_s, params, deformable_groups=8, groups=32,
                     use_fused=None):
    n, cin, h, w = feat_l.shape
    c = params["w_conv"].shape[0]
    s = h * w
    dg = deformable_groups
    dgk = dg * 9
    assert cin % groups == 0 and c % groups == 0, "GroupNorm(32, C) needs C % 32 == 0"
    assert c % dg == 0
    assert s % 128 == 0  # lane alignment; TODO(synk): pad the spatial dim otherwise

    # F.interpolate(feat_s, HW, mode='bilinear', align_corners=False)  (glue)
    if feat_s.shape[2:] != (h, w):
        feat_up = jax.image.resize(feat_s, (n, c, h, w), method="linear")
    else:
        feat_up = feat_s
    feat_up_bf = feat_up.reshape(n, c, s).astype(jnp.bfloat16)
    feat_l_bf = feat_l.reshape(n, cin, s).astype(jnp.bfloat16)

    border = _border_mask(h, w)
    base = _base_coords(h, w)
    # Chunk the 9-tap column stack when it would not comfortably fit VMEM
    # (v7x has 64 MiB physical / 32 MiB default scoped).
    tap_chunk = 9 if (9 * c * s * 2) <= (8 << 20) else 3
    core = _core_consts(params, border)

    if use_fused is None:
        use_fused = _lane_gather_supported(c, s)

    if use_fused:
        out = fused_call(
            feat_l_bf, feat_up_bf,
            core + (base, params["expand"], params["w_dcn"], params["b_dcn"]),
            H=h, W=w, dg=dg, groups=groups, tap_chunk=tap_chunk)
    else:
        feat_arm_bf, offmask = fsm_offset_call(
            feat_l_bf, feat_up_bf, core,
            H=h, W=w, dg=dg, groups=groups, tap_chunk=tap_chunk)
        o1 = offmask[:, :dgk]
        o2 = offmask[:, dgk:2 * dgk]
        mk = offmask[:, 2 * dgk:]
        cols = _deform_sample_xla(feat_up_bf.astype(jnp.float32), o1, o2, mk,
                                  dg, h, w)
        out = dcn_cols_call(cols, feat_arm_bf, params["w_dcn"], params["b_dcn"])
    return out.reshape(n, c, h, w)


# --------------------------------------------------------------------------
# Deterministic synthetic parameters (mirror the module's __init__ shapes),
# converted once to kernel-friendly layouts / dtypes.
# --------------------------------------------------------------------------
def xavier_uniform(key, shape):
    rec = shape[2] * shape[3] if len(shape) == 4 else 1
    fan_out = shape[0] * rec
    fan_in = shape[1] * rec
    bound = (6.0 / (fan_in + fan_out)) ** 0.5
    return jax.random.uniform(key, shape, jnp.float32, -bound, bound)


def init_params(key, in_nc, out_nc, dg):
    ks = jax.random.split(key, 5)
    kk = 9
    p = {}
    # FeatureSelectionModule
    p["w_att"] = xavier_uniform(ks[0], (in_nc, in_nc))
    p["b_att"] = jnp.zeros((in_nc,), jnp.float32)
    p["g1"] = jnp.ones((in_nc,), jnp.float32)
    p["be1"] = jnp.zeros((in_nc,), jnp.float32)
    p["w_conv"] = xavier_uniform(ks[1], (out_nc, in_nc))
    p["b_conv"] = jnp.zeros((out_nc,), jnp.float32)
    p["g2"] = jnp.ones((out_nc,), jnp.float32)
    p["be2"] = jnp.zeros((out_nc,), jnp.float32)
    # offset 1x1 conv (on cat([feat_arm, 2*feat_up])) + GroupNorm
    p["w_off"] = xavier_uniform(ks[2], (out_nc, 2 * out_nc))
    p["b_off"] = jnp.zeros((out_nc,), jnp.float32)
    p["g_off"] = jnp.ones((out_nc,), jnp.float32)
    p["be_off"] = jnp.zeros((out_nc,), jnp.float32)
    # dcn_v2 internals: conv_offset_mask (3x3) rows [o1|o2|mask], row g*9+k
    p["w_com"] = 0.01 * jax.random.normal(ks[3], (3 * dg * kk, out_nc, 3, 3),
                                          jnp.float32)
    p["b_com"] = jnp.zeros((3 * dg * kk,), jnp.float32)
    # deformable conv weight / bias
    p["w_dcn"] = xavier_uniform(ks[4], (out_nc, out_nc, 3, 3))
    p["b_dcn"] = jnp.zeros((out_nc,), jnp.float32)
    return p


def prepare_params(p, dg, groups=32):
    """One-time conversion to kernel layouts/dtypes."""
    kk = 9
    out_nc, in_nc = p["w_conv"].shape
    dgk = dg * kk
    cpg = out_nc // dg
    col = lambda v: v.reshape(-1, 1)
    q = {}
    q["w_att"] = p["w_att"]
    q["b_att"] = col(p["b_att"])
    q["g1"], q["be1"] = col(p["g1"]), col(p["be1"])
    q["gmask_in"] = _group_mask(in_nc, groups)
    q["w_conv"] = p["w_conv"].astype(jnp.bfloat16)
    q["b_conv"] = col(p["b_conv"])
    q["g2"], q["be2"] = col(p["g2"]), col(p["be2"])
    q["gmask_out"] = _group_mask(out_nc, groups)
    # W @ [feat_arm; 2*feat_up] == W_a @ feat_arm + (2*W_b) @ feat_up
    q["w_offa"] = p["w_off"][:, :out_nc].astype(jnp.bfloat16)
    q["w_offb"] = (2.0 * p["w_off"][:, out_nc:]).astype(jnp.bfloat16)
    q["b_off"] = col(p["b_off"])
    q["g_off"], q["be_off"] = col(p["g_off"]), col(p["be_off"])

    # conv_offset_mask: reorder each third from g-major (g*9+k) to tap-major
    # (k*dg+g) and flatten the 3x3 taps into the contraction dim (cols k*C+c).
    def tap_major(t):
        return t.reshape(dg, kk, *t.shape[1:]).swapaxes(0, 1).reshape(dgk, *t.shape[1:])

    w_perm = jnp.concatenate(
        [tap_major(p["w_com"][i * dgk:(i + 1) * dgk]) for i in range(3)], axis=0)
    b_perm = jnp.concatenate(
        [tap_major(p["b_com"][i * dgk:(i + 1) * dgk]) for i in range(3)], axis=0)
    q["w_com"] = jnp.transpose(w_perm.reshape(3 * dgk, out_nc, kk),
                               (0, 2, 1)).reshape(3 * dgk, kk * out_nc).astype(jnp.bfloat16)
    q["b_com"] = col(b_perm)

    # deformable conv weight, columns ordered tap-major (k*C + c)
    q["w_dcn"] = jnp.transpose(p["w_dcn"].reshape(out_nc, out_nc, kk),
                               (0, 2, 1)).reshape(out_nc, kk * out_nc).astype(jnp.bfloat16)
    q["b_dcn"] = col(p["b_dcn"])

    # constant 0/1 group->channel row-repeat matrix (channel c <- group c//cpg)
    q["expand"] = (jnp.arange(out_nc)[:, None] // cpg
                   == jnp.arange(dg)[None, :]).astype(jnp.float32)
    return q


if __name__ == "__main__":
    key = jax.random.PRNGKey(0)
    N, IN_NC, OUT_NC, H, W = 2, 64, 32, 16, 16   # GroupNorm(32, C) => C % 32 == 0
    DG = 8
    k0, k1, k2 = jax.random.split(key, 3)
    feat_l = jax.random.normal(k0, (N, IN_NC, H, W), jnp.float32)
    feat_s = jax.random.normal(k1, (N, OUT_NC, H // 2, W // 2), jnp.float32)
    params = prepare_params(init_params(k2, IN_NC, OUT_NC, DG), DG, groups=32)

    out = feature_align_v2(feat_l, feat_s, params, deformable_groups=DG, groups=32)
    out = jax.block_until_ready(out)
    assert out.shape == (N, OUT_NC, H, W)
    assert bool(jnp.all(jnp.isfinite(out)))
    print("KERNEL_OK")
</pallas_src>

<mosaic_0001>
module attributes {stable_mosaic.version = 11 : i64} {
  func.func @probe(%arg0: memref<32x256xf32, #tpu.memory_space<vmem>>, %arg1: memref<32x256xi32, #tpu.memory_space<vmem>>, %arg2: memref<32x256xf32, #tpu.memory_space<vmem>>) attributes {dimension_semantics = [], scalar_prefetch = 0 : i64, scratch_operands = 0 : i64, tpu.core_type = #tpu.core_type<tc>} {
    %c0 = arith.constant 0 : index
    %c0_0 = arith.constant 0 : index
    %0 = vector.load %arg0[%c0, %c0_0] : memref<32x256xf32, #tpu.memory_space<vmem>>, vector<32x256xf32>
    %c0_1 = arith.constant 0 : index
    %c0_2 = arith.constant 0 : index
    %1 = vector.load %arg1[%c0_1, %c0_2] : memref<32x256xi32, #tpu.memory_space<vmem>>, vector<32x256xi32>
    %2 = vector.shape_cast %1 : vector<32x256xi32> to vector<32x256x1xi32>
    %3 = vector.shape_cast %2 : vector<32x256x1xi32> to vector<32x256xi32>
    %4 = tpu.dynamic_gather %0[%3] in [1] : vector<32x256xf32>, vector<32x256xi32> -> vector<32x256xf32>
    %c0_3 = arith.constant 0 : index
    %c0_4 = arith.constant 0 : index
    %5 = vector.load %arg2[%c0_3, %c0_4] : memref<32x256xf32, #tpu.memory_space<vmem>>, vector<32x256xf32>
    tpu.vector_store %arg2[%c0_3, %c0_4], %4 {strides = array<i32>} : memref<32x256xf32, #tpu.memory_space<vmem>>, vector<32x256xf32>,
    return
  }
}

module attributes {stable_mosaic.version = 11 : i64} {
  func.func @_fsm_offset_kernel(%arg0: i32, %arg1: memref<1x64x256xbf16, #tpu.memory_space<vmem>>, %arg2: memref<1x32x256xbf16, #tpu.memory_space<vmem>>, %arg3: memref<64x64xf32, #tpu.memory_space<vmem>>, %arg4: memref<64x1xf32, #tpu.memory_space<vmem>>, %arg5: memref<64x1xf32, #tpu.memory_space<vmem>>, %arg6: memref<64x1xf32, #tpu.memory_space<vmem>>, %arg7: memref<64x64xf32, #tpu.memory_space<vmem>>, %arg8: memref<32x64xbf16, #tpu.memory_space<vmem>>, %arg9: memref<32x1xf32, #tpu.memory_space<vmem>>, %arg10: memref<32x1xf32, #tpu.memory_space<vmem>>, %arg11: memref<32x1xf32, #tpu.memory_space<vmem>>, %arg12: memref<32x32xf32, #tpu.memory_space<vmem>>, %arg13: memref<32x32xbf16, #tpu.memory_space<vmem>>, %arg14: memref<32x32xbf16, #tpu.memory_space<vmem>>, %arg15: memref<32x1xf32, #tpu.memory_space<vmem>>, %arg16: memref<32x1xf32, #tpu.memory_space<vmem>>, %arg17: memref<32x1xf32, #tpu.memory_space<vmem>>, %arg18: memref<216x288xbf16, #tpu.memory_space<vmem>>, %arg19: memref<216x1xf32, #tpu.memory_space<vmem>>, %arg20: memref<9x1x256xf32, #tpu.memory_space<vmem>>, %arg21: memref<1x32x256xbf16, #tpu.memory_space<vmem>>, %arg22: memref<1x216x256xf32, #tpu.memory_space<vmem>>) attributes {dimension_semantics = [#tpu.dimension_semantics<parallel>], iteration_bounds = array<i64: 2>, scalar_prefetch = 0 : i64, scratch_operands = 0 : i64, tpu.core_type = #tpu.core_type<tc>, window_params = [{transform_indices = @transform_0, window_bounds = array<i64: 1, 64, 256>}, {transform_indices = @transform_1, window_bounds = array<i64: 1, 32, 256>}, {pipeline_mode = #tpu.pipeline_mode<synchronous>, transform_indices = @transform_2, window_bounds = array<i64: 64, 64>}, {pipeline_mode = #tpu.pipeline_mode<synchronous>, transform_indices = @transform_3, window_bounds = array<i64: 64, 1>}, {pipeline_mode = #tpu.pipeline_mode<synchronous>, transform_indices = @transform_4, window_bounds = array<i64: 64, 1>}, {pipeline_mode = #tpu.pipeline_mode<synchronous>, transform_indices = @transform_5, window_bounds = array<i64: 64, 1>}, {pipeline_mode = #tpu.pipeline_mode<synchronous>, transform_indices = @transform_6, window_bounds = array<i64: 64, 64>}, {pipeline_mode = #tpu.pipeline_mode<synchronous>, transform_indices = @transform_7, window_bounds = array<i64: 32, 64>}, {pipeline_mode = #tpu.pipeline_mode<synchronous>, transform_indices = @transform_8, window_bounds = array<i64: 32, 1>}, {pipeline_mode = #tpu.pipeline_mode<synchronous>, transform_indices = @transform_9, window_bounds = array<i64: 32, 1>}, {pipeline_mode = #tpu.pipeline_mode<synchronous>, transform_indices = @transform_10, window_bounds = array<i64: 32, 1>}, {pipeline_mode = #tpu.pipeline_mode<synchronous>, transform_indices = @transform_11, window_bounds = array<i64: 32, 32>}, {pipeline_mode = #tpu.pipeline_mode<synchronous>, transform_indices = @transform_12, window_bounds = array<i64: 32, 32>}, {pipeline_mode = #tpu.pipeline_mode<synchronous>, transform_indices = @transform_13, window_bounds = array<i64: 32, 32>}, {pipeline_mode = #tpu.pipeline_mode<synchronous>, transform_indices = @transform_14, window_bounds = array<i64: 32, 1>}, {pipeline_mode = #tpu.pipeline_mode<synchronous>, transform_indices = @transform_15, window_bounds = array<i64: 32, 1>}, {pipeline_mode = #tpu.pipeline_mode<synchronous>, transform_indices = @transform_16, window_bounds = array<i64: 32, 1>}, {pipeline_mode = #tpu.pipeline_mode<synchronous>, transform_indices = @transform_17, window_bounds = array<i64: 216, 288>}, {pipeline_mode = #tpu.pipeline_mode<synchronous>, transform_indices = @transform_18, window_bounds = array<i64: 216, 1>}, {pipeline_mode = #tpu.pipeline_mode<synchronous>, transform_indices = @transform_19, window_bounds = array<i64: 9, 1, 256>}, {transform_indices = @transform_20, window_bounds = array<i64: 1, 32, 256>}, {transform_indices = @transform_21, window_bounds = array<i64: 1, 216, 256>}]} {
    %c0 = arith.constant 0 : index
    %c0_0 = arith.constant 0 : index
    %c0_1 = arith.constant 0 : index
    %0 = vector.load %arg1[%c0, %c0_0, %c0_1] : memref<1x64x256xbf16, #tpu.memory_space<vmem>>, vector<1x64x256xbf16>
    %1 = vector.shape_cast %0 : vector<1x64x256xbf16> to vector<64x256xbf16>
    %c0_2 = arith.constant 0 : index
    %c0_3 = arith.constant 0 : index
    %c0_4 = arith.constant 0 : index
    %2 = vector.load %arg2[%c0_2, %c0_3, %c0_4] : memref<1x32x256xbf16, #tpu.memory_space<vmem>>, vector<1x32x256xbf16>
    %3 = vector.shape_cast %2 : vector<1x32x256xbf16> to vector<32x256xbf16>
    %c0_5 = arith.constant 0 : index
    %c0_6 = arith.constant 0 : index
    %4 = vector.load %arg3[%c0_5, %c0_6] : memref<64x64xf32, #tpu.memory_space<vmem>>, vector<64x64xf32>
    %c0_7 = arith.constant 0 : index
    %c0_8 = arith.constant 0 : index
    %5 = vector.load %arg4[%c0_7, %c0_8] : memref<64x1xf32, #tpu.memory_space<vmem>>, vector<64x1xf32>
    %c0_9 = arith.constant 0 : index
    %c0_10 = arith.constant 0 : index
    %6 = vector.load %arg5[%c0_9, %c0_10] : memref<64x1xf32, #tpu.memory_space<vmem>>, vector<64x1xf32>
    %c0_11 = arith.constant 0 : index
    %c0_12 = arith.constant 0 : index
    %7 = vector.load %arg6[%c0_11, %c0_12] : memref<64x1xf32, #tpu.memory_space<vmem>>, vector<64x1xf32>
    %c0_13 = arith.constant 0 : index
    %c0_14 = arith.constant 0 : index
    %8 = vector.load %arg7[%c0_13, %c0_14] : memref<64x64xf32, #tpu.memory_space<vmem>>, vector<64x64xf32>
    %c0_15 = arith.constant 0 : index
    %c0_16 = arith.constant 0 : index
    %9 = vector.load %arg8[%c0_15, %c0_16] : memref<32x64xbf16, #tpu.memory_space<vmem>>, vector<32x64xbf16>
    %c0_17 = arith.constant 0 : index
    %c0_18 = arith.constant 0 : index
    %10 = vector.load %arg9[%c0_17, %c0_18] : memref<32x1xf32, #tpu.memory_space<vmem>>, vector<32x1xf32>
    %c0_19 = arith.constant 0 : index
    %c0_20 = arith.constant 0 : index
    %11 = vector.load %arg10[%c0_19, %c0_20] : memref<32x1xf32, #tpu.memory_space<vmem>>, vector<32x1xf32>
    %c0_21 = arith.constant 0 : index
    %c0_22 = arith.constant 0 : index
    %12 = vector.load %arg11[%c0_21, %c0_22] : memref<32x1xf32, #tpu.memory_space<vmem>>, vector<32x1xf32>
    %c0_23 = arith.constant 0 : index
    %c0_24 = arith.constant 0 : index
    %13 = vector.load %arg12[%c0_23, %c0_24] : memref<32x32xf32, #tpu.memory_space<vmem>>, vector<32x32xf32>
    %c0_25 = arith.constant 0 : index
    %c0_26 = arith.constant 0 : index
    %14 = vector.load %arg13[%c0_25, %c0_26] : memref<32x32xbf16, #tpu.memory_space<vmem>>, vector<32x32xbf16>
    %c0_27 = arith.constant 0 : index
    %c0_28 = arith.constant 0 : index
    %15 = vector.load %arg14[%c0_27, %c0_28] : memref<32x32xbf16, #tpu.memory_space<vmem>>, vector<32x32xbf16>
    %c0_29 = arith.constant 0 : index
    %c0_30 = arith.constant 0 : index
    %16 = vector.load %arg15[%c0_29, %c0_30] : memref<32x1xf32, #tpu.memory_space<vmem>>, vector<32x1xf32>
    %c0_31 = arith.constant 0 : index
    %c0_32 = arith.constant 0 : index
    %17 = vector.load %arg16[%c0_31, %c0_32] : memref<32x1xf32, #tpu.memory_space<vmem>>, vector<32x1xf32>
    %c0_33 = arith.constant 0 : index
    %c0_34 = arith.constant 0 : index
    %18 = vector.load %arg17[%c0_33, %c0_34] : memref<32x1xf32, #tpu.memory_space<vmem>>, vector<32x1xf32>
    %c0_35 = arith.constant 0 : index
    %c0_36 = arith.constant 0 : index
    %19 = vector.load %arg18[%c0_35, %c0_36] : memref<216x288xbf16, #tpu.memory_space<vmem>>, vector<216x288xbf16>
    %c0_37 = arith.constant 0 : index
    %c0_38 = arith.constant 0 : index
    %20 = vector.load %arg19[%c0_37, %c0_38] : memref<216x1xf32, #tpu.memory_space<vmem>>, vector<216x1xf32>
    %c0_39 = arith.constant 0 : index
    %c0_40 = arith.constant 0 : index
    %c0_41 = arith.constant 0 : index
    %21 = vector.load %arg20[%c0_39, %c0_40, %c0_41] : memref<9x1x256xf32, #tpu.memory_space<vmem>>, vector<9x1x256xf32>
    %22 = arith.extf %1 : vector<64x256xbf16> to vector<64x256xf32>
    %cst = arith.constant dense<0.000000e+00> : vector<64xf32>
    %23 = vector.multi_reduction <add>, %22, %cst [1] : vector<64x256xf32> to vector<64xf32>
    %24 = vector.shape_cast %23 : vector<64xf32> to vector<64x1xf32>
    %cst_42 = arith.constant 2.560000e+02 : f32
    %25 = vector.broadcast %cst_42 : f32 to vector<64x1xf32>
    %26 = arith.divf %24, %25 : vector<64x1xf32>
    %cst_43 = arith.constant dense<0.000000e+00> : vector<64x1xf32>
    %27 = tpu.matmul %4, %26, %cst_43 {dimension_numbers = #tpu.dot_dimension_numbers<[1], [0], [0], [1], [0, 0, 1, 1], [], []>} : vector<64x64xf32>, vector<64x1xf32>, vector<64x1xf32> -> vector<64x1xf32>
    %28 = arith.addf %27, %5 : vector<64x1xf32>
    %cst_44 = arith.constant dense<0.000000e+00> : vector<64xf32>
    %29 = vector.multi_reduction <add>, %28, %cst_44 [1] : vector<64x1xf32> to vector<64xf32>
    %30 = vector.shape_cast %29 : vector<64xf32> to vector<64x1xf32>
    %31 = arith.mulf %28, %28 : vector<64x1xf32>
    %cst_45 = arith.constant dense<0.000000e+00> : vector<64xf32>
    %32 = vector.multi_reduction <add>, %31, %cst_45 [1] : vector<64x1xf32> to vector<64xf32>
    %33 = vector.shape_cast %32 : vector<64xf32> to vector<64x1xf32>
    %34 = tpu.concatenate %30, %33 in 1 : vector<64x1xf32>, vector<64x1xf32> -> vector<64x2xf32>
    %cst_46 = arith.constant dense<0.000000e+00> : vector<64x2xf32>
    %35 = tpu.matmul %8, %34, %cst_46 {dimension_numbers = #tpu.dot_dimension_numbers<[1], [0], [0], [1], [0, 0, 1, 1], [], []>} : vector<64x64xf32>, vector<64x2xf32>, vector<64x2xf32> -> vector<64x2xf32>
    %cst_47 = arith.constant 5.000000e-01 : f32
    %36 = vector.broadcast %cst_47 : f32 to vector<64x2xf32>
    %37 = arith.mulf %35, %36 : vector<64x2xf32>
    %38 = vector.extract_strided_slice %37 {offsets = [0, 0], sizes = [64, 1], strides = [1, 1]} : vector<64x2xf32> to vector<64x1xf32>
    %39 = vector.extract_strided_slice %37 {offsets = [0, 1], sizes = [64, 1], strides = [1, 1]} : vector<64x2xf32> to vector<64x1xf32>
    %40 = arith.mulf %38, %38 : vector<64x1xf32>
    %41 = arith.subf %39, %40 : vector<64x1xf32>
    %cst_48 = arith.constant 0.000000e+00 : f32
    %42 = vector.broadcast %cst_48 : f32 to vector<64x1xf32>
    %43 = arith.maximumf %41, %42 : vector<64x1xf32>
    %44 = arith.subf %28, %38 : vector<64x1xf32>
    %cst_49 = arith.constant 9.99999974E-6 : f32
    %45 = vector.broadcast %cst_49 : f32 to vector<64x1xf32>
    %46 = arith.addf %43, %45 : vector<64x1xf32>
    %47 = math.rsqrt %46 : vector<64x1xf32>
    %48 = arith.mulf %44, %47 : vector<64x1xf32>
    %49 = arith.mulf %48, %6 : vector<64x1xf32>
    %50 = arith.addf %49, %7 : vector<64x1xf32>
    %51 = arith.negf %50 : vector<64x1xf32>
    %52 = math.exp %51 : vector<64x1xf32>
    %cst_50 = arith.constant 1.000000e+00 : f32
    %53 = vector.broadcast %cst_50 : f32 to vector<64x1xf32>
    %54 = arith.addf %53, %52 : vector<64x1xf32>
    %55 = arith.divf %53, %54 : vector<64x1xf32>
    %cst_51 = arith.constant 1.000000e+00 : f32
    %56 = vector.broadcast %cst_51 : f32 to vector<64x1xf32>
    %57 = arith.addf %56, %55 : vector<64x1xf32>
    %58 = vector.broadcast %57 : vector<64x1xf32> to vector<64x256xf32>
    %59 = arith.mulf %22, %58 : vector<64x256xf32>
    %60 = arith.truncf %59 : vector<64x256xf32> to vector<64x256xbf16>
    %cst_52 = arith.constant dense<0.000000e+00> : vector<32x256xf32>
    %61 = tpu.matmul %9, %60, %cst_52 {dimension_numbers = #tpu.dot_dimension_numbers<[1], [0], [0], [1], [0, 0, 1, 1], [], []>} : vector<32x64xbf16>, vector<64x256xbf16>, vector<32x256xf32> -> vector<32x256xf32>
    %62 = vector.broadcast %10 : vector<32x1xf32> to vector<32x256xf32>
    %63 = arith.addf %61, %62 : vector<32x256xf32>
    %cst_53 = arith.constant dense<0.000000e+00> : vector<32xf32>
    %64 = vector.multi_reduction <add>, %63, %cst_53 [1] : vector<32x256xf32> to vector<32xf32>
    %65 = vector.shape_cast %64 : vector<32xf32> to vector<32x1xf32>
    %66 = arith.mulf %63, %63 : vector<32x256xf32>
    %cst_54 = arith.constant dense<0.000000e+00> : vector<32xf32>
    %67 = vector.multi_reduction <add>, %66, %cst_54 [1] : vector<32x256xf32> to vector<32xf32>
    %68 = vector.shape_cast %67 : vector<32xf32> to vector<32x1xf32>
    %69 = tpu.concatenate %65, %68 in 1 : vector<32x1xf32>, vector<32x1xf32> -> vector<32x2xf32>
    %cst_55 = arith.constant dense<0.000000e+00> : vector<32x2xf32>
    %70 = tpu.matmul %13, %69, %cst_55 {dimension_numbers = #tpu.dot_dimension_numbers<[1], [0], [0], [1], [0, 0, 1, 1], [], []>} : vector<32x32xf32>, vector<32x2xf32>, vector<32x2xf32> -> vector<32x2xf32>
    %cst_56 = arith.constant 3.906250e-03 : f32
    %71 = vector.broadcast %cst_56 : f32 to vector<32x2xf32>
    %72 = arith.mulf %70, %71 : vector<32x2xf32>
    %73 = vector.extract_strided_slice %72 {offsets = [0, 0], sizes = [32, 1], strides = [1, 1]} : vector<32x2xf32> to vector<32x1xf32>
    %74 = vector.extract_strided_slice %72 {offsets = [0, 1], sizes = [32, 1], strides = [1, 1]} : vector<32x2xf32> to vector<32x1xf32>
    %75 = arith.mulf %73, %73 : vector<32x1xf32>
    %76 = arith.subf %74, %75 : vector<32x1xf32>
    %cst_57 = arith.constant 0.000000e+00 : f32
    %77 = vector.broadcast %cst_57 : f32 to vector<32x1xf32>
    %78 = arith.maximumf %76, %77 : vector<32x1xf32>
    %79 = vector.broadcast %73 : vector<32x1xf32> to vector<32x256xf32>
    %80 = arith.subf %63, %79 : vector<32x256xf32>
    %cst_58 = arith.constant 9.99999974E-6 : f32
    %81 = vector.broadcast %cst_58 : f32 to vector<32x1xf32>
    %82 = arith.addf %78, %81 : vector<32x1xf32>
    %83 = math.rsqrt %82 : vector<32x1xf32>
    %84 = vector.broadcast %83 : vector<32x1xf32> to vector<32x256xf32>
    %85 = arith.mulf %80, %84 : vector<32x256xf32>
    %86 = vector.broadcast %11 : vector<32x1xf32> to vector<32x256xf32>
    %87 = arith.mulf %85, %86 : vector<32x256xf32>
    %88 = vector.broadcast %12 : vector<32x1xf32> to vector<32x256xf32>
    %89 = arith.addf %87, %88 : vector<32x256xf32>
    %90 = arith.truncf %89 : vector<32x256xf32> to vector<32x256xbf16>
    %cst_59 = arith.constant dense<0.000000e+00> : vector<32x256xf32>
    %91 = tpu.matmul %14, %90, %cst_59 {dimension_numbers = #tpu.dot_dimension_numbers<[1], [0], [0], [1], [0, 0, 1, 1], [], []>} : vector<32x32xbf16>, vector<32x256xbf16>, vector<32x256xf32> -> vector<32x256xf32>
    %cst_60 = arith.constant dense<0.000000e+00> : vector<32x256xf32>
    %92 = tpu.matmul %15, %3, %cst_60 {dimension_numbers = #tpu.dot_dimension_numbers<[1], [0], [0], [1], [0, 0, 1, 1], [], []>} : vector<32x32xbf16>, vector<32x256xbf16>, vector<32x256xf32> -> vector<32x256xf32>
    %93 = arith.addf %91, %92 : vector<32x256xf32>
    %94 = vector.broadcast %16 : vector<32x1xf32> to vector<32x256xf32>
    %95 = arith.addf %93, %94 : vector<32x256xf32>
    %cst_61 = arith.constant dense<0.000000e+00> : vector<32xf32>
    %96 = vector.multi_reduction <add>, %95, %cst_61 [1] : vector<32x256xf32> to vector<32xf32>
    %97 = vector.shape_cast %96 : vector<32xf32> to vector<32x1xf32>
    %98 = arith.mulf %95, %95 : vector<32x256xf32>
    %cst_62 = arith.constant dense<0.000000e+00> : vector<32xf32>
    %99 = vector.multi_reduction <add>, %98, %cst_62 [1] : vector<32x256xf32> to vector<32xf32>
    %100 = vector.shape_cast %99 : vector<32xf32> to vector<32x1xf32>
    %101 = tpu.concatenate %97, %100 in 1 : vector<32x1xf32>, vector<32x1xf32> -> vector<32x2xf32>
    %cst_63 = arith.constant dense<0.000000e+00> : vector<32x2xf32>
    %102 = tpu.matmul %13, %101, %cst_63 {dimension_numbers = #tpu.dot_dimension_numbers<[1], [0], [0], [1], [0, 0, 1, 1], [], []>} : vector<32x32xf32>, vector<32x2xf32>, vector<32x2xf32> -> vector<32x2xf32>
    %cst_64 = arith.constant 3.906250e-03 : f32
    %103 = vector.broadcast %cst_64 : f32 to vector<32x2xf32>
    %104 = arith.mulf %102, %103 : vector<32x2xf32>
    %105 = vector.extract_strided_slice %104 {offsets = [0, 0], sizes = [32, 1], strides = [1, 1]} : vector<32x2xf32> to vector<32x1xf32>
    %106 = vector.extract_strided_slice %104 {offsets = [0, 1], sizes = [32, 1], strides = [1, 1]} : vector<32x2xf32> to vector<32x1xf32>
    %107 = arith.mulf %105, %105 : vector<32x1xf32>
    %108 = arith.subf %106, %107 : vector<32x1xf32>
    %cst_65 = arith.constant 0.000000e+00 : f32
    %109 = vector.broadcast %cst_65 : f32 to vector<32x1xf32>
    %110 = arith.maximumf %108, %109 : vector<32x1xf32>
    %111 = vector.broadcast %105 : vector<32x1xf32> to vector<32x256xf32>
    %112 = arith.subf %95, %111 : vector<32x256xf32>
    %cst_66 = arith.constant 9.99999974E-6 : f32
    %113 = vector.broadcast %cst_66 : f32 to vector<32x1xf32>
    %114 = arith.addf %110, %113 : vector<32x1xf32>
    %115 = math.rsqrt %114 : vector<32x1xf32>
    %116 = vector.broadcast %115 : vector<32x1xf32> to vector<32x256xf32>
    %117 = arith.mulf %112, %116 : vector<32x256xf32>
    %118 = vector.broadcast %17 : vector<32x1xf32> to vector<32x256xf32>
    %119 = arith.mulf %117, %118 : vector<32x256xf32>
    %120 = vector.broadcast %18 : vector<32x1xf32> to vector<32x256xf32>
    %121 = arith.addf %119, %120 : vector<32x256xf32>
    %c17_i32 = arith.constant 17 : i32
    %122 = tpu.dynamic_rotate %121 by %c17_i32 dim 1 : vector<32x256xf32>, i32 -> vector<32x256xf32>
    %123 = vector.extract_strided_slice %21 {offsets = [0, 0, 0], sizes = [1, 1, 256], strides = [1, 1, 1]} : vector<9x1x256xf32> to vector<1x1x256xf32>
    %124 = vector.shape_cast %123 : vector<1x1x256xf32> to vector<1x256xf32>
    %125 = vector.broadcast %124 : vector<1x256xf32> to vector<32x256xf32>
    %126 = arith.mulf %122, %125 : vector<32x256xf32>
    %127 = arith.truncf %126 : vector<32x256xf32> to vector<32x256xbf16>
    %c16_i32 = arith.constant 16 : i32
    %128 = tpu.dynamic_rotate %121 by %c16_i32 dim 1 : vector<32x256xf32>, i32 -> vector<32x256xf32>
    %129 = vector.extract_strided_slice %21 {offsets = [1, 0, 0], sizes = [1, 1, 256], strides = [1, 1, 1]} : vector<9x1x256xf32> to vector<1x1x256xf32>
    %130 = vector.shape_cast %129 : vector<1x1x256xf32> to vector<1x256xf32>
    %131 = vector.broadcast %130 : vector<1x256xf32> to vector<32x256xf32>
    %132 = arith.mulf %128, %131 : vector<32x256xf32>
    %133 = arith.truncf %132 : vector<32x256xf32> to vector<32x256xbf16>
    %c15_i32 = arith.constant 15 : i32
    %134 = tpu.dynamic_rotate %121 by %c15_i32 dim 1 : vector<32x256xf32>, i32 -> vector<32x256xf32>
    %135 = vector.extract_strided_slice %21 {offsets = [2, 0, 0], sizes = [1, 1, 256], strides = [1, 1, 1]} : vector<9x1x256xf32> to vector<1x1x256xf32>
    %136 = vector.shape_cast %135 : vector<1x1x256xf32> to vector<1x256xf32>
    %137 = vector.broadcast %136 : vector<1x256xf32> to vector<32x256xf32>
    %138 = arith.mulf %134, %137 : vector<32x256xf32>
    %139 = arith.truncf %138 : vector<32x256xf32> to vector<32x256xbf16>
    %c1_i32 = arith.constant 1 : i32
    %140 = tpu.dynamic_rotate %121 by %c1_i32 dim 1 : vector<32x256xf32>, i32 -> vector<32x256xf32>
    %141 = vector.extract_strided_slice %21 {offsets = [3, 0, 0], sizes = [1, 1, 256], strides = [1, 1, 1]} : vector<9x1x256xf32> to vector<1x1x256xf32>
    %142 = vector.shape_cast %141 : vector<1x1x256xf32> to vector<1x256xf32>
    %143 = vector.broadcast %142 : vector<1x256xf32> to vector<32x256xf32>
    %144 = arith.mulf %140, %143 : vector<32x256xf32>
    %145 = arith.truncf %144 : vector<32x256xf32> to vector<32x256xbf16>
    %146 = vector.extract_strided_slice %21 {offsets = [4, 0, 0], sizes = [1, 1, 256], strides = [1, 1, 1]} : vector<9x1x256xf32> to vector<1x1x256xf32>
    %147 = vector.shape_cast %146 : vector<1x1x256xf32> to vector<1x256xf32>
    %148 = vector.broadcast %147 : vector<1x256xf32> to vector<32x256xf32>
    %149 = arith.mulf %121, %148 : vector<32x256xf32>
    %150 = arith.truncf %149 : vector<32x256xf32> to vector<32x256xbf16>
    %c255_i32 = arith.constant 255 : i32
    %151 = tpu.dynamic_rotate %121 by %c255_i32 dim 1 : vector<32x256xf32>, i32 -> vector<32x256xf32>
    %152 = vector.extract_strided_slice %21 {offsets = [5, 0, 0], sizes = [1, 1, 256], strides = [1, 1, 1]} : vector<9x1x256xf32> to vector<1x1x256xf32>
    %153 = vector.shape_cast %152 : vector<1x1x256xf32> to vector<1x256xf32>
    %154 = vector.broadcast %153 : vector<1x256xf32> to vector<32x256xf32>
    %155 = arith.mulf %151, %154 : vector<32x256xf32>
    %156 = arith.truncf %155 : vector<32x256xf32> to vector<32x256xbf16>
    %c241_i32 = arith.constant 241 : i32
    %157 = tpu.dynamic_rotate %121 by %c241_i32 dim 1 : vector<32x256xf32>, i32 -> vector<32x256xf32>
    %158 = vector.extract_strided_slice %21 {offsets = [6, 0, 0], sizes = [1, 1, 256], strides = [1, 1, 1]} : vector<9x1x256xf32> to vector<1x1x256xf32>
    %159 = vector.shape_cast %158 : vector<1x1x256xf32> to vector<1x256xf32>
    %160 = vector.broadcast %159 : vector<1x256xf32> to vector<32x256xf32>
    %161 = arith.mulf %157, %160 : vector<32x256xf32>
    %162 = arith.truncf %161 : vector<32x256xf32> to vector<32x256xbf16>
    %c240_i32 = arith.constant 240 : i32
    %163 = tpu.dynamic_rotate %121 by %c240_i32 dim 1 : vector<32x256xf32>, i32 -> vector<32x256xf32>
    %164 = vector.extract_strided_slice %21 {offsets = [7, 0, 0], sizes = [1, 1, 256], strides = [1, 1, 1]} : vector<9x1x256xf32> to vector<1x1x256xf32>
    %165 = vector.shape_cast %164 : vector<1x1x256xf32> to vector<1x256xf32>
    %166 = vector.broadcast %165 : vector<1x256xf32> to vector<32x256xf32>
    %167 = arith.mulf %163, %166 : vector<32x256xf32>
    %168 = arith.truncf %167 : vector<32x256xf32> to vector<32x256xbf16>
    %c239_i32 = arith.constant 239 : i32
    %169 = tpu.dynamic_rotate %121 by %c239_i32 dim 1 : vector<32x256xf32>, i32 -> vector<32x256xf32>
    %170 = vector.extract_strided_slice %21 {offsets = [8, 0, 0], sizes = [1, 1, 256], strides = [1, 1, 1]} : vector<9x1x256xf32> to vector<1x1x256xf32>
    %171 = vector.shape_cast %170 : vector<1x1x256xf32> to vector<1x256xf32>
    %172 = vector.broadcast %171 : vector<1x256xf32> to vector<32x256xf32>
    %173 = arith.mulf %169, %172 : vector<32x256xf32>
    %174 = arith.truncf %173 : vector<32x256xf32> to vector<32x256xbf16>
    %175 = tpu.concatenate %127, %133, %139, %145, %150, %156, %162, %168, %174 in 0 : vector<32x256xbf16>, vector<32x256xbf16>, vector<32x256xbf16>, vector<32x256xbf16>, vector<32x256xbf16>, vector<32x256xbf16>, vector<32x256xbf16>, vector<32x256xbf16>, vector<32x256xbf16> -> vector<288x256xbf16>
    %cst_67 = arith.constant dense<0.000000e+00> : vector<216x256xf32>
    %176 = tpu.matmul %19, %175, %cst_67 {dimension_numbers = #tpu.dot_dimension_numbers<[1], [0], [0], [1], [0, 0, 1, 1], [], []>} : vector<216x288xbf16>, vector<288x256xbf16>, vector<216x256xf32> -> vector<216x256xf32>
    %177 = vector.broadcast %20 : vector<216x1xf32> to vector<216x256xf32>
    %178 = arith.addf %176, %177 : vector<216x256xf32>
    %179 = vector.extract_strided_slice %178 {offsets = [0, 0], sizes = [72, 256], strides = [1, 1]} : vector<216x256xf32> to vector<72x256xf32>
    %180 = vector.extract_strided_slice %178 {offsets = [72, 0], sizes = [72, 256], strides = [1, 1]} : vector<216x256xf32> to vector<72x256xf32>
    %181 = vector.extract_strided_slice %178 {offsets = [144, 0], sizes = [72, 256], strides = [1, 1]} : vector<216x256xf32> to vector<72x256xf32>
    %182 = arith.negf %181 : vector<72x256xf32>
    %183 = math.exp %182 : vector<72x256xf32>
    %cst_68 = arith.constant 1.000000e+00 : f32
    %184 = vector.broadcast %cst_68 : f32 to vector<72x256xf32>
    %185 = arith.addf %184, %183 : vector<72x256xf32>
    %186 = arith.divf %184, %185 : vector<72x256xf32>
    %187 = arith.truncf %89 : vector<32x256xf32> to vector<32x256xbf16>
    %c0_69 = arith.constant 0 : index
    %c0_70 = arith.constant 0 : index
    %c0_71 = arith.constant 0 : index
    %188 = vector.load %arg21[%c0_69, %c0_70, %c0_71] : memref<1x32x256xbf16, #tpu.memory_space<vmem>>, vector<1x32x256xbf16>
    %189 = vector.shape_cast %188 : vector<1x32x256xbf16> to vector<32x256xbf16>
    %190 = vector.shape_cast %187 : vector<32x256xbf16> to vector<1x32x256xbf16>
    tpu.vector_store %arg21[%c0_69, %c0_70, %c0_71], %190 {strides = array<i32>} : memref<1x32x256xbf16, #tpu.memory_space<vmem>>, vector<1x32x256xbf16>,
    %191 = tpu.concatenate %179, %180, %186 in 0 : vector<72x256xf32>, vector<72x256xf32>, vector<72x256xf32> -> vector<216x256xf32>
    %c0_72 = arith.constant 0 : index
    %c0_73 = arith.constant 0 : index
    %c0_74 = arith.constant 0 : index
    %192 = vector.load %arg22[%c0_72, %c0_73, %c0_74] : memref<1x216x256xf32, #tpu.memory_space<vmem>>, vector<1x216x256xf32>
    %193 = vector.shape_cast %192 : vector<1x216x256xf32> to vector<216x256xf32>
    %194 = vector.shape_cast %191 : vector<216x256xf32> to vector<1x216x256xf32>
    tpu.vector_store %arg22[%c0_72, %c0_73, %c0_74], %194 {strides = array<i32>} : memref<1x216x256xf32, #tpu.memory_space<vmem>>, vector<1x216x256xf32>,
    return
  }
  func.func @transform_0(%arg0: i32) -> (i32, i32, i32) {
    %c0_i32 = arith.constant 0 : i32
    %c0_i32_0 = arith.constant 0 : i32
    %c0_i32_1 = arith.constant 0 : i32
    return %arg0, %c0_i32, %c0_i32_0 : i32, i32, i32
  }
  func.func @transform_1(%arg0: i32) -> (i32, i32, i32) {
    %c0_i32 = arith.constant 0 : i32
    %c0_i32_0 = arith.constant 0 : i32
    %c0_i32_1 = arith.constant 0 : i32
    return %arg0, %c0_i32, %c0_i32_0 : i32, i32, i32
  }
  func.func @transform_2(%arg0: i32) -> (i32, i32) {
    %c0_i32 = arith.constant 0 : i32
    %c0_i32_0 = arith.constant 0 : i32
    %c0_i32_1 = arith.constant 0 : i32
    return %c0_i32, %c0_i32_0 : i32, i32
  }
  func.func @transform_3(%arg0: i32) -> (i32, i32) {
    %c0_i32 = arith.constant 0 : i32
    %c0_i32_0 = arith.constant 0 : i32
    %c0_i32_1 = arith.constant 0 : i32
    return %c0_i32, %c0_i32_0 : i32, i32
  }
  func.func @transform_4(%arg0: i32) -> (i32, i32) {
    %c0_i32 = arith.constant 0 : i32
    %c0_i32_0 = arith.constant 0 : i32
    %c0_i32_1 = arith.constant 0 : i32
    return %c0_i32, %c0_i32_0 : i32, i32
  }
  func.func @transform_5(%arg0: i32) -> (i32, i32) {
    %c0_i32 = arith.constant 0 : i32
    %c0_i32_0 = arith.constant 0 : i32
    %c0_i32_1 = arith.constant 0 : i32
    return %c0_i32, %c0_i32_0 : i32, i32
  }
  func.func @transform_6(%arg0: i32) -> (i32, i32) {
    %c0_i32 = arith.constant 0 : i32
    %c0_i32_0 = arith.constant 0 : i32
    %c0_i32_1 = arith.constant 0 : i32
    return %c0_i32, %c0_i32_0 : i32, i32
  }
  func.func @transform_7(%arg0: i32) -> (i32, i32) {
    %c0_i32 = arith.constant 0 : i32
    %c0_i32_0 = arith.constant 0 : i32
    %c0_i32_1 = arith.constant 0 : i32
    return %c0_i32, %c0_i32_0 : i32, i32
  }
  func.func @transform_8(%arg0: i32) -> (i32, i32) {
    %c0_i32 = arith.constant 0 : i32
    %c0_i32_0 = arith.constant 0 : i32
    %c0_i32_1 = arith.constant 0 : i32
    return %c0_i32, %c0_i32_0 : i32, i32
  }
  func.func @transform_9(%arg0: i32) -> (i32, i32) {
    %c0_i32 = arith.constant 0 : i32
    %c0_i32_0 = arith.constant 0 : i32
    %c0_i32_1 = arith.constant 0 : i32
    return %c0_i32, %c0_i32_0 : i32, i32
  }
  func.func @transform_10(%arg0: i32) -> (i32, i32) {
    %c0_i32 = arith.constant 0 : i32
    %c0_i32_0 = arith.constant 0 : i32
    %c0_i32_1 = arith.constant 0 : i32
    return %c0_i32, %c0_i32_0 : i32, i32
  }
  func.func @transform_11(%arg0: i32) -> (i32, i32) {
    %c0_i32 = arith.constant 0 : i32
    %c0_i32_0 = arith.constant 0 : i32
    %c0_i32_1 = arith.constant 0 : i32
    return %c0_i32, %c0_i32_0 : i32, i32
  }
  func.func @transform_12(%arg0: i32) -> (i32, i32) {
    %c0_i32 = arith.constant 0 : i32
    %c0_i32_0 = arith.constant 0 : i32
    %c0_i32_1 = arith.constant 0 : i32
    return %c0_i32, %c0_i32_0 : i32, i32
  }
  func.func @transform_13(%arg0: i32) -> (i32, i32) {
    %c0_i32 = arith.constant 0 : i32
    %c0_i32_0 = arith.constant 0 : i32
    %c0_i32_1 = arith.constant 0 : i32
    return %c0_i32, %c0_i32_0 : i32, i32
  }
  func.func @transform_14(%arg0: i32) -> (i32, i32) {
    %c0_i32 = arith.constant 0 : i32
    %c0_i32_0 = arith.constant 0 : i32
    %c0_i32_1 = arith.constant 0 : i32
    return %c0_i32, %c0_i32_0 : i32, i32
  }
  func.func @transform_15(%arg0: i32) -> (i32, i32) {
    %c0_i32 = arith.constant 0 : i32
    %c0_i32_0 = arith.constant 0 : i32
    %c0_i32_1 = arith.constant 0 : i32
    return %c0_i32, %c0_i32_0 : i32, i32
  }
  func.func @transform_16(%arg0: i32) -> (i32, i32) {
    %c0_i32 = arith.constant 0 : i32
    %c0_i32_0 = arith.constant 0 : i32
    %c0_i32_1 = arith.constant 0 : i32
    return %c0_i32, %c0_i32_0 : i32, i32
  }
  func.func @transform_17(%arg0: i32) -> (i32, i32) {
    %c0_i32 = arith.constant 0 : i32
    %c0_i32_0 = arith.constant 0 : i32
    %c0_i32_1 = arith.constant 0 : i32
    return %c0_i32, %c0_i32_0 : i32, i32
  }
  func.func @transform_18(%arg0: i32) -> (i32, i32) {
    %c0_i32 = arith.constant 0 : i32
    %c0_i32_0 = arith.constant 0 : i32
    %c0_i32_1 = arith.constant 0 : i32
    return %c0_i32, %c0_i32_0 : i32, i32
  }
  func.func @transform_19(%arg0: i32) -> (i32, i32, i32) {
    %c0_i32 = arith.constant 0 : i32
    %c0_i32_0 = arith.constant 0 : i32
    %c0_i32_1 = arith.constant 0 : i32
    %c0_i32_2 = arith.constant 0 : i32
    return %c0_i32, %c0_i32_0, %c0_i32_1 : i32, i32, i32
  }
  func.func @transform_20(%arg0: i32) -> (i32, i32, i32) {
    %c0_i32 = arith.constant 0 : i32
    %c0_i32_0 = arith.constant 0 : i32
    %c0_i32_1 = arith.constant 0 : i32
    return %arg0, %c0_i32, %c0_i32_0 : i32, i32, i32
  }
  func.func @transform_21(%arg0: i32) -> (i32, i32, i32) {
    %c0_i32 = arith.constant 0 : i32
    %c0_i32_0 = arith.constant 0 : i32
    %c0_i32_1 = arith.constant 0 : i32
    return %arg0, %c0_i32, %c0_i32_0 : i32, i32, i32
  }
}

</mosaic_0001>

<bundles_post_ra>
// kernel: tpu_custom_call.1
= control target key start
LH: loop header
LB: loop body
LE: loop exit
PB: predicated region body
PF: predicated region fallthrough
CT: control target
= control target key end

     0   :  { %s6386_s0 = inlined_call_operand.vmem [shape: bf16[2,64,256], index: 0, kind: input, shape index: {}]   ;;  %s6387_s1 = inlined_call_operand.vmem [shape: bf16[2,32,256], index: 1, kind: input, shape index: {}]   ;;  %s6388_s2 = inlined_call_operand.vmem [shape: f32[64,64], index: 2, kind: input, shape index: {}]   ;;  %s6389_s3 = inlined_call_operand.vmem [shape: f32[64,1], index: 3, kind: input, shape index: {}]   ;;  %s6390_s4 = inlined_call_operand.vmem [shape: f32[64,1], index: 4, kind: input, shape index: {}]   ;;  %s6391_s5 = inlined_call_operand.vmem [shape: f32[64,1], index: 5, kind: input, shape index: {}]   ;;  %s6392_s6 = inlined_call_operand.vmem [shape: f32[64,64], index: 6, kind: input, shape index: {}]   ;;  %s6393_s7 = inlined_call_operand.vmem [shape: bf16[32,64], index: 7, kind: input, shape index: {}]   ;;  %s6394_s8 = inlined_call_operand.vmem [shape: f32[32,1], index: 8, kind: input, shape index: {}]   ;;  %s6395_s9 = inlined_call_operand.vmem [shape: f32[32,1], index: 9, kind: input, shape index: {}]   ;;  %s6396_s10 = inlined_call_operand.vmem [shape: f32[32,1], index: 10, kind: input, shape index: {}]   ;;  %s6397_s11 = inlined_call_operand.vmem [shape: f32[32,32], index: 11, kind: input, shape index: {}]   ;;  %s6398_s12 = inlined_call_operand.vmem [shape: bf16[32,32], index: 12, kind: input, shape index: {}]   ;;  %s6399_s13 = inlined_call_operand.vmem [shape: bf16[32,32], index: 13, kind: input, shape index: {}]   ;;  %s6400_s14 = inlined_call_operand.vmem [shape: f32[32,1], index: 14, kind: input, shape index: {}]   ;;  %s6401_s15 = inlined_call_operand.vmem [shape: f32[32,1], index: 15, kind: input, shape index: {}]   ;;  %s6402_s16 = inlined_call_operand.vmem [shape: f32[32,1], index: 16, kind: input, shape index: {}]   ;;  %s6403_s17 = inlined_call_operand.vmem [shape: bf16[216,288], index: 17, kind: input, shape index: {}]   ;;  %s6404_s18 = inlined_call_operand.vmem [shape: f32[216,1], index: 18, kind: input, shape index: {}]   ;;  %s6405_s19 = inlined_call_operand.vmem [shape: f32[9,1,256], index: 19, kind: input, shape index: {}]   ;;  %s6406_s20 = inlined_call_operand.hbm [shape: bf16[2,32,256], index: 20, kind: output, shape index: {0}]   ;;  %s6407_s21 = inlined_call_operand.hbm [shape: f32[2,216,256], index: 21, kind: output, shape index: {1}]  }
   0x1   :  { %6431 = sst [smem:[#allocation16_spill]] %s6386_s0 }
   0x2   :  { %6432 = sst [smem:[#allocation17_spill]] %s6387_s1 }
   0x3   :  { %6433 = sst [smem:[#allocation18_spill]] %s6388_s2 }
   0x4   :  { %6434 = sst [smem:[#allocation19_spill]] %s6389_s3 }
   0x5   :  { %6435 = sst [smem:[#allocation20_spill]] %s6390_s4 }
   0x6   :  { %6436 = sst [smem:[#allocation21_spill]] %s6391_s5 }
   0x7   :  { %6437 = sst [smem:[#allocation22_spill]] %s6392_s6 }
   0x8   :  { %6438 = sst [smem:[#allocation23_spill]] %s6393_s7 }
   0x9   :  { %6439 = sst [smem:[#allocation24_spill]] %s6407_s21 }
   0xa   :  { %27 = vsyncpa [#allocation3], 0 }
   0xb   :  { %29 = vsyncpa [#allocation3 + $0x1], 0 }
   0xc   :  { %30 = vsyncpa [#allocation5], 0 }
   0xd   :  { %32 = vsyncpa [#allocation5 + $0x1], 0  ;;  %s4761_s2 = smov 0   ;;  %s4763_s25 = smov 0  }
   0xe   :  { %s4765_s26 = smov 0   ;;  %s4767_s27 = smov 0  }
   0xf LB: > { %6440 = sst [smem:[#allocation8_spill]] %s4622_s2  ;;  %s4782_s3 = sadd.s32 4294967295, %s4634_s27   ;;  %s4634_s27 = sphi %s4767_s27, %s6477_s27   ;;  %s4630_s26 = sphi %s4765_s26, %s6479_s26   ;;  %s4626_s25 = sphi %s4763_s25, %s6481_s25   ;;  %s4622_s2 = sphi %s4761_s2, %s6480_s2  }
  0x10   : > { %6441 = sst [smem:[#allocation9_spill]] %s4630_s26  ;;  %s3804_s28 = sadd.s32 4294967294, %s4634_s27  }
  0x11   : > { %s4786_s29 = sadd.s32 1, %s4634_s27   ;;  %s475_s0 = sadd.s32 1, %s4630_s26 }
  0x12   : > { %6442 = sst [smem:[#allocation10_spill]] %s4786_s29  ;;  %s472_s4 = ssub.s32 %s4634_s27, %s4786_s29 }
  0x13   : > { %p485_p0 = scmp.ne.s32.totalorder %s4630_s26, %s4626_s25  ;;  %p473_p1 = scmp.eq.s32.totalorder %s472_s4, 0 }
  0x14   : > { %p486_p2 = scmp.eq.s32.totalorder %s4782_s3, 1  ;;  %p491_p3 = scmp.ne.s32.totalorder %s4626_s25, %s4622_s2 }
  0x15   : > { %p492_p4 = scmp.eq.s32.totalorder %s3804_s28, 1  ;;  %p3807_p7 = scmp.ge.s32.totalorder %s4634_s27, 1 }
  0x16   : > { %s4797_s30 = scalar_select %p473_p1, %s4630_s26, %s475_s0  }
  0x17   : > { %p4799_p5 = por %p486_p2, %p485_p0  ;;  %p4803_p6 = por %p492_p4, %p491_p3 }
  0x18   : > { %6443 = sst [smem:[#allocation11_spill]] %s4797_s30  ;;  %p606_p8 = scmp.lt.s32.totalorder %s4634_s27, 3 }
  0x19   : > { %s6445_s22 = scalar_select %p4803_p6, 1, 0 }
  0x1a   : > { %p607_p9 = pnand %p3807_p7, %p606_p8 }
  0x1b   : > { %6446 = sst [smem:[#allocation12_spill]] %s6445_s22 }
  0x1c   : > { %610 = sbr.rel (%p607_p9) target bundleno = 3574 (0xdf6), region = 100 }
  0x23   : > { %p676_p10 = scmp.lt.s32.totalorder %s4782_s3, 1  ;;  %s6447_s0 = sld [smem:[#allocation16_spill]]  ;;  %vm918_vm0 = vcmask 523264   ;;  %vm1104_vm1 = vcmask 7168   ;;  %vm1631_vm2 = vcmask 261120  }
  0x24   : > { %s6448_s28 = sld [smem:[#allocation18_spill]]  ;;  %s6449_s2 = sld [smem:[#allocation19_spill]] }
  0x25   : > { %s4811_s23 = scalar_select %p676_p10, %s4782_s3, 1 }
  0x26   : > { %s6451_s6 = sld [smem:[#allocation22_spill]]  ;;  %s6455_s7 = sld [smem:[#allocation23_spill]] }
  0x27   : > { %s3945_s1 = sshll.u32 %s4811_s23, 6  ;;  %s6456_s30 = smov 1  }
  0x28   : > { %s4645_s24 = smov 111  }
  0x29   : > { %s680_s4 = scalar_lea.vmem %s6447_s0, %s3945_s1  ;;  %s6452_s0 = sld [smem:[#allocation20_spill]] }
  0x2a   : > { %v4817_v0 = vld [vmem:[%s680_s4 + $0x10] sm:$0xff]  ;;  %v4819_v1 = vld [vmem:[%s680_s4] sm:$0xff]  ;;  %v4821_v2 = vld [vmem:[%s680_s4 + $0x18] sm:$0xff]  ;;  %s6450_s21 = smov %s6449_s2  ;;  %s4640_s1 = smov 17  }
  0x2b   : > { %v873_v3 = vunpack.c.l.bf16 %v4817_v0  ;;  %v874_v4 = vunpack.c.h.bf16 %v4817_v0  ;;  %v869_v5 = vunpack.c.l.bf16 %v4819_v1  ;;  %v870_v6 = vunpack.c.h.bf16 %v4819_v1  ;;  %v4827_v7 = vld [vmem:[%s680_s4 + $0x8] sm:$0xff]  ;;  %v4835_v13 = vld [vmem:[%s680_s4 + $0x20] sm:$0xff]  ;;  %v4845_v16 = vld [vmem:[%s680_s4 + $0x38] sm:$0xff] }
  0x2c   : > { %v4829_v8 = vld [vmem:[%s680_s4 + $0x28] sm:$0xff]  ;;  %v875_v9 = vunpack.c.l.bf16 %v4821_v2  ;;  %v876_v10 = vunpack.c.h.bf16 %v4821_v2  ;;  %v871_v11 = vunpack.c.l.bf16 %v4827_v7  ;;  %v872_v12 = vunpack.c.h.bf16 %v4827_v7  ;;  %v4849_v19 = vld [vmem:[%s680_s4 + $0x30] sm:$0xff]  ;;  %v699_v32 = vld [vmem:[%s6448_s28] sm:$0xff]  ;;  %s6420_s4 = smov 1  }
  0x2d   : > { %v891_v14 = vadd.f32 %v874_v4, %v873_v3  ;;  %v885_v15 = vadd.f32 %v870_v6, %v869_v5  ;;  %v879_v17 = vunpack.c.l.bf16 %v4829_v8  ;;  %v880_v18 = vunpack.c.h.bf16 %v4829_v8  ;;  %4016 = vmatprep.mubr.msk.f32.mxu1 %vm918_vm0, %v699_v32  ;;  %v700_v53 = vld [vmem:[%s6448_s28 + $0x8] sm:$0xff]  ;;  %v701_v54 = vld [vmem:[%s6448_s28 + $0x10] sm:$0xff]  ;;  %v702_v55 = vld [vmem:[%s6448_s28 + $0x18] sm:$0xff] }
  0x2e   : > { %v894_v20 = vadd.f32 %v876_v10, %v875_v9  ;;  %v888_v21 = vadd.f32 %v872_v12, %v871_v11  ;;  %v877_v22 = vunpack.c.l.bf16 %v4835_v13  ;;  %v878_v23 = vunpack.c.h.bf16 %v4835_v13  ;;  %v703_v56 = vld [vmem:[%s6448_s28 + $0x20] sm:$0xff]  ;;  %v704_v57 = vld [vmem:[%s6448_s28 + $0x28] sm:$0xff]  ;;  %v705_v58 = vld [vmem:[%s6448_s28 + $0x30] sm:$0xff] }
  0x2f   : > { %892 = vadd.xlane.f32.xlu1 %v891_v14  ;;  %886 = vadd.xlane.f32.xlu0 %v885_v15  ;;  %v900_v24 = vadd.f32 %v880_v18, %v879_v17  ;;  %v883_v25 = vunpack.c.l.bf16 %v4845_v16  ;;  %v884_v27 = vunpack.c.h.bf16 %v4845_v16  ;;  %v881_v28 = vunpack.c.l.bf16 %v4849_v19  ;;  %v706_v59 = vld [vmem:[%s6448_s28 + $0x38] sm:$0xff]  ;;  %v708_v60 = vld [vmem:[%s6449_s2 + $0x8] sm:$0xff]  ;;  %v707_v61 = vld [vmem:[%s6450_s21] sm:$0xff]  ;;  %s6418_s2 = smov 127  }
  0x30   : > { %v897_v26 = vadd.f32 %v878_v23, %v877_v22  ;;  %v882_v29 = vunpack.c.h.bf16 %v4849_v19  ;;  %v4338_v19 = vld [vmem:[%s6455_s7 + $0x8] sm:$0xff]  }
  0x31   : > { %v906_v30 = vadd.f32 %v884_v27, %v883_v25 }
  0x32   : > { %v903_v31 = vadd.f32 %v882_v29, %v881_v28 }
  0x33   : > { %895 = vadd.xlane.f32.xlu1 %v894_v20  ;;  %889 = vadd.xlane.f32.xlu0 %v888_v21  ;;  %v710_v20 = vld [vmem:[%s6450_s21 + $0x18] sm:$0xff] }
  0x37   : > { %901 = vadd.xlane.f32.xlu1 %v900_v24  ;;  %898 = vadd.xlane.f32.xlu0 %v897_v26  ;;  %v709_v24 = vld [vmem:[%s6450_s21 + $0x10] sm:$0xff] }
  0x3b   : > { %907 = vadd.xlane.f32.xlu1 %v906_v30  ;;  %904 = vadd.xlane.f32.xlu0 %v903_v31 }
  0xbc   : > { %v893_v33 = vpop.xlane.xlu1 %892  ;;  %v887_v34 = vpop.xlane.xlu0 %886 }
  0xbd   : > { %v912_v37 = vmul.f32 0.00390625, %v893_v33  ;;  %v910_v38 = vmul.f32 0.00390625, %v887_v34  ;;  %v712_v34 = vld [vmem:[%s6450_s21 + $0x28] sm:$0xff] }
  0xc0   : > { %v896_v35 = vpop.xlane.xlu1 %895  ;;  %v890_v36 = vpop.xlane.xlu0 %889 }
  0xc1   : > { %v913_v39 = vmul.f32 0.00390625, %v896_v35  ;;  %v911_v40 = vmul.f32 0.00390625, %v890_v36 }
  0xc3   : > { %v4084_v41 = vpack.c.bf16 %v911_v40, %v910_v38  ;;  %v4088_v44 = vpack.c.bf16 %v913_v39, %v912_v37  ;;  %v711_v37 = vld [vmem:[%s6450_s21 + $0x20] sm:$0xff] }
  0xc4   : > { %v902_v42 = vpop.xlane.xlu1 %901  ;;  %v899_v43 = vpop.xlane.xlu0 %898 }
  0xc5   : > { %4085 = vmatprep.subr.bf16.mxu1 %v4084_v41  ;;  %v915_v45 = vmul.f32 0.00390625, %v902_v42  ;;  %v914_v46 = vmul.f32 0.00390625, %v899_v43  ;;  %v714_v43 = vld [vmem:[%s6450_s21 + $0x38] sm:$0xff] }
  0xc6   : > { %4087 = vmatpush3.bf16.msra.mxu1 %v4084_v41 }
  0xc7   : > { %4089 = vmatprep.subr.bf16.mxu1 %v4088_v44  ;;  %v4092_v47 = vpack.c.bf16 %v915_v45, %v914_v46  ;;  %v713_v46 = vld [vmem:[%s6450_s21 + $0x30] sm:$0xff]  ;;  %s6457_s21 = sld [smem:[#allocation17_spill]] }
  0xc8   : > { %v908_v48 = vpop.xlane.xlu1 %907  ;;  %v905_v49 = vpop.xlane.xlu0 %904 }
  0xc9   : > { %v917_v50 = vmul.f32 0.00390625, %v908_v48  ;;  %v916_v51 = vmul.f32 0.00390625, %v905_v49 }
  0xca   : > { %4091 = vmatpush3.bf16.msra.mxu1 %v4088_v44 }
  0xcb   : > { %v4096_v52 = vpack.c.bf16 %v917_v50, %v916_v51  ;;  %4093 = vmatprep.subr.bf16.mxu1 %v4092_v47  ;;  %v731_v51 = vld [vmem:[%s6451_s6] sm:$0xff] }
  0xce   : > { %4095 = vmatpush3.bf16.msra.mxu1 %v4092_v47 }
  0xcf   : > { %4097 = vmatprep.subr.bf16.mxu1 %v4096_v52 }
  0xd2   : > { %4099 = vmatpush3.bf16.msra.mxu1 %v4096_v52 }
  0xd5   : > { %4017 = vmatmul.mubr.msk.f32.vlgmr.msra.gmra.mrb[0].mxu1 %vm918_vm0, %v700_v53 }
  0xd6   : > { %4019 = vmatprep.mubr.msk.f32.mxu1 %vm918_vm0, %v701_v54 }
  0xd9   : > { %4020 = vmatmul.mubr.msk.f32.gmra.mrb[2].mxu1 %vm918_vm0, %v702_v55 }
  0xda   : > { %4022 = vmatprep.mubr.msk.f32.mxu1 %vm918_vm0, %v703_v56 }
  0xdd   : > { %4023 = vmatmul.mubr.msk.f32.gmra.mrb[4].mxu1 %vm918_vm0, %v704_v57 }
  0xde   : > { %4025 = vmatprep.mubr.msk.f32.mxu1 %vm918_vm0, %v705_v58 }
  0xe1   : > { %4026 = vmatmul.mubr.msk.f32.gmra.mrb[6].mxu1 %vm918_vm0, %v706_v59 }
  0xe2   : > { %4044 = vmatprep.mubr.msk.f32.mxu1 %vm918_vm0, %v731_v51  ;;  %v735_v51 = vld [vmem:[%s6451_s6 + $0x20] sm:$0xff] }
 0x1a8   : > { %v4018_v62 = vpop.f32.mrb[0].mxu1 }
 0x1a9   : > { %v4919_v63 = vadd.f32 %v4018_v62, %v708_v60  ;;  %v1009_v14 = vpop.f32.mrb[1].mxu1 }
 0x1aa   : > { %v4921_v15 = vadd.f32 %v1009_v14, %v707_v61 }
 0x1ab   : > { %v1057_v21 = vmul.f32 %v4919_v63, %v4919_v63 }
 0x1ac   : > { %v1056_v26 = vmul.f32 %v4921_v15, %v4921_v15  ;;  %v4021_v30 = vpop.f32.mrb[2].mxu1 }
 0x1ad   : > { %v4933_v31 = vadd.f32 %v4021_v30, %v710_v20  ;;  %v1019_v32 = vpop.f32.mrb[3].mxu1 }
 0x1ae   : > { %v4935_v33 = vadd.f32 %v1019_v32, %v709_v24  ;;  %v4307_v35 = vpack.i.bf16 %v1057_v21, %v1056_v26 }
 0x1af   : > { %v1059_v36 = vmul.f32 %v4933_v31, %v4933_v31 }
 0x1b0   : > { %v1058_v38 = vmul.f32 %v4935_v33, %v4935_v33  ;;  %v4024_v39 = vpop.f32.mrb[4].mxu1  ;;  %4308 = vrot.lane.b32.xlu0 %v4307_v35, %s6420_s4 }
 0x1b1   : > { %v4948_v40 = vadd.f32 %v4024_v39, %v712_v34  ;;  %v1029_v41 = vpop.f32.mrb[5].mxu1 }
 0x1b2   : > { %v4950_v42 = vadd.f32 %v1029_v41, %v711_v37  ;;  %v4312_v44 = vpack.i.bf16 %v1059_v36, %v1058_v38 }
 0x1b3   : > { %v1061_v45 = vmul.f32 %v4948_v40, %v4948_v40 }
 0x1b4   : > { %v1060_v47 = vmul.f32 %v4950_v42, %v4950_v42  ;;  %v4027_v48 = vpop.f32.mrb[6].mxu1  ;;  %4313 = vrot.lane.b32.xlu1 %v4312_v44, %s6420_s4 }
 0x1b5   : > { %v4963_v49 = vadd.f32 %v4027_v48, %v714_v43  ;;  %v1039_v50 = vpop.f32.mrb[7].mxu1  ;;  %v733_v48 = vld [vmem:[%s6451_s6 + $0x10] sm:$0xff] }
 0x1b6   : > { %v4968_v52 = vadd.f32 %v1039_v50, %v713_v46  ;;  %v4317_v53 = vpack.i.bf16 %v1061_v45, %v1060_v47  ;;  %v732_v47 = vld [vmem:[%s6451_s6 + $0x8] sm:$0xff]  ;;  %v734_v50 = vld [vmem:[%s6451_s6 + $0x18] sm:$0xff] }
 0x1b7   : > { %v1063_v54 = vmul.f32 %v4963_v49, %v4963_v49 }
 0x1b8   : > { %v1062_v55 = vmul.f32 %v4968_v52, %v4968_v52  ;;  %4318 = vrot.lane.b32.xlu1 %v4317_v53, %s6420_s4  ;;  %v736_v53 = vld [vmem:[%s6451_s6 + $0x28] sm:$0xff] }
 0x1ba   : > { %v4322_v56 = vpack.i.bf16 %v1063_v54, %v1062_v55  ;;  %v737_v54 = vld [vmem:[%s6451_s6 + $0x30] sm:$0xff]  ;;  %v738_v55 = vld [vmem:[%s6451_s6 + $0x38] sm:$0xff]  ;;  %s6430_s6 = smov 16  }
 0x1bc   : > { %4323 = vrot.lane.b32.xlu1 %v4322_v56, %s6420_s4 }
 0x222   : > { %v4309_v57 = vpop.permute.xlu0 %4308 }
 0x223   : > { %v4311_v58 = vunpack.i.h.bf16 %v4309_v57  ;;  %v4310_v59 = vunpack.i.l.bf16 %v4309_v57 }
 0x225   : > { %v1105_v60 = vsel %vm1104_vm1, %v4921_v15, %v4310_v59  ;;  %v1106_v61 = vsel %vm1104_vm1, %v4919_v63, %v4311_v58 }
 0x226   : > { %v4314_v62 = vpop.permute.xlu1 %4313  ;;  %v4100_v14 = vpack.c.bf16 %v1106_v61, %v1105_v60 }
 0x227   : > { %v4316_v20 = vunpack.i.h.bf16 %v4314_v62  ;;  %v4315_v21 = vunpack.i.l.bf16 %v4314_v62 }
 0x228   : > { %4101 = vmatprep.subr.bf16.mxu1 %v4100_v14 }
 0x229   : > { %4103 = vmatpush3.bf16.msra.mxu1 %v4100_v14  ;;  %v1107_v24 = vsel %vm1104_vm1, %v4935_v33, %v4315_v21  ;;  %v1108_v26 = vsel %vm1104_vm1, %v4933_v31, %v4316_v20 }
 0x22a   : > { %v4319_v30 = vpop.permute.xlu1 %4318  ;;  %v4104_v32 = vpack.c.bf16 %v1108_v26, %v1107_v24 }
 0x22b   : > { %v4321_v34 = vunpack.i.h.bf16 %v4319_v30  ;;  %v4320_v35 = vunpack.i.l.bf16 %v4319_v30 }
 0x22c   : > { %4105 = vmatprep.subr.bf16.mxu1 %v4104_v32 }
 0x22d   : > { %4107 = vmatpush3.bf16.msra.mxu1 %v4104_v32  ;;  %v1109_v36 = vsel %vm1104_vm1, %v4950_v42, %v4320_v35  ;;  %v1110_v37 = vsel %vm1104_vm1, %v4948_v40, %v4321_v34 }
 0x22e   : > { %v4324_v38 = vpop.permute.xlu1 %4323  ;;  %v4108_v39 = vpack.c.bf16 %v1110_v37, %v1109_v36 }
 0x22f   : > { %v4326_v41 = vunpack.i.h.bf16 %v4324_v38  ;;  %v4325_v43 = vunpack.i.l.bf16 %v4324_v38 }
 0x230   : > { %4109 = vmatprep.subr.bf16.mxu1 %v4108_v39 }
 0x231   : > { %4111 = vmatpush3.bf16.msra.mxu1 %v4108_v39  ;;  %v1111_v44 = vsel %vm1104_vm1, %v4968_v52, %v4325_v43  ;;  %v1112_v45 = vsel %vm1104_vm1, %v4963_v49, %v4326_v41 }
 0x232   : > { %v4112_v46 = vpack.c.bf16 %v1112_v45, %v1111_v44 }
 0x234   : > { %4113 = vmatprep.subr.bf16.mxu1 %v4112_v46 }
 0x235   : > { %4115 = vmatpush3.bf16.msra.mxu1 %v4112_v46 }
 0x238   : > { %4045 = vmatmul.mubr.msk.f32.vlgmr.msra.gmra.mrb[8].mxu1 %vm918_vm0, %v732_v47 }
 0x239   : > { %4047 = vmatprep.mubr.msk.f32.mxu1 %vm918_vm0, %v733_v48 }
 0x23c   : > { %4048 = vmatmul.mubr.msk.f32.gmra.mrb[10].mxu1 %vm918_vm0, %v734_v50 }
 0x23d   : > { %4050 = vmatprep.mubr.msk.f32.mxu1 %vm918_vm0, %v735_v51 }
 0x240   : > { %4051 = vmatmul.mubr.msk.f32.gmra.mrb[12].mxu1 %vm918_vm0, %v736_v53 }
 0x241   : > { %4053 = vmatprep.mubr.msk.f32.mxu1 %vm918_vm0, %v737_v54 }
 0x244   : > { %4054 = vmatmul.mubr.msk.f32.gmra.mrb[14].mxu1 %vm918_vm0, %v738_v55 }
 0x30b   : > { %v4046_v56 = vpop.f32.mrb[8].mxu1 }
 0x30c   : > { %v5021_v57 = vmul.f32 0.5, %v4046_v56  ;;  %v1203_v58 = vpop.f32.mrb[9].mxu1 }
 0x30d   : > { %v5023_v59 = vmul.f32 0.5, %v1203_v58 }
 0x30e   : > { %v1251_v60 = vmul.f32 %v5021_v57, %v5021_v57 }
 0x30f   : > { %v4049_v61 = vpop.f32.mrb[10].mxu1  ;;  %v1250_v62 = vmul.f32 %v5023_v59, %v5023_v59 }
 0x310   : > { %v5029_v14 = vmul.f32 0.5, %v4049_v61  ;;  %1268 = vrot.lane.b32.xlu1 %v1251_v60, %s6420_s4  ;;  %v1213_v20 = vpop.f32.mrb[11].mxu1 }
 0x311   : > { %v5032_v21 = vmul.f32 0.5, %v1213_v20  ;;  %1266 = vrot.lane.b32.xlu0 %v1250_v62, %s6420_s4 }
 0x312   : > { %v1253_v24 = vmul.f32 %v5029_v14, %v5029_v14 }
 0x313   : > { %v4052_v26 = vpop.f32.mrb[12].mxu1  ;;  %v1252_v30 = vmul.f32 %v5032_v21, %v5032_v21 }
 0x314   : > { %v5039_v32 = vmul.f32 0.5, %v4052_v26  ;;  %1272 = vrot.lane.b32.xlu1 %v1253_v24, %s6420_s4  ;;  %v1223_v34 = vpop.f32.mrb[13].mxu1 }
 0x315   : > { %v5042_v35 = vmul.f32 0.5, %v1223_v34  ;;  %1270 = vrot.lane.b32.xlu0 %v1252_v30, %s6420_s4 }
 0x316   : > { %v1255_v36 = vmul.f32 %v5039_v32, %v5039_v32 }
 0x317   : > { %v4055_v37 = vpop.f32.mrb[14].mxu1  ;;  %v1254_v38 = vmul.f32 %v5042_v35, %v5042_v35 }
 0x318   : > { %v5049_v39 = vmul.f32 0.5, %v4055_v37  ;;  %1276 = vrot.lane.b32.xlu1 %v1255_v36, %s6420_s4  ;;  %v1233_v41 = vpop.f32.mrb[15].mxu1 }
 0x319   : > { %v5052_v43 = vmul.f32 0.5, %v1233_v41  ;;  %1274 = vrot.lane.b32.xlu0 %v1254_v38, %s6420_s4 }
 0x31a   : > { %v1257_v44 = vmul.f32 %v5049_v39, %v5049_v39 }
 0x31b   : > { %v1256_v45 = vmul.f32 %v5052_v43, %v5052_v43 }
 0x31c   : > { %1280 = vrot.lane.b32.xlu1 %v1257_v44, %s6420_s4 }
 0x31d   : > { %1278 = vrot.lane.b32.xlu0 %v1256_v45, %s6420_s4 }
 0x382   : > { %v1269_v46 = vpop.permute.xlu1 %1268 }
 0x383   : > { %v1291_v47 = vsub.f32 %v5021_v57, %v1269_v46  ;;  %v1267_v48 = vpop.permute.xlu0 %1266 }
 0x384   : > { %v1290_v50 = vsub.f32 %v5023_v59, %v1267_v48 }
 0x385   : > { %v1299_v51 = vmax.f32 %v1291_v47, 0.0 }
 0x386   : > { %v1298_v53 = vmax.f32 %v1290_v50, 0.0  ;;  %v1273_v54 = vpop.permute.xlu1 %1272 }
 0x387   : > { %v1315_v55 = vadd.f32 1e-05, %v1299_v51  ;;  %v1293_v56 = vsub.f32 %v5029_v14, %v1273_v54  ;;  %v1271_v58 = vpop.permute.xlu0 %1270 }
 0x388   : > { %v1314_v60 = vadd.f32 1e-05, %v1298_v53  ;;  %v1292_v61 = vsub.f32 %v5032_v21, %v1271_v58 }
 0x389   : > { %4404 = vrsqrt.f32 %v1315_v55  ;;  %v1301_v62 = vmax.f32 %v1293_v56, 0.0 }
 0x38a   : > { %4406 = vrsqrt.f32 %v1314_v60  ;;  %v1300_v20 = vmax.f32 %v1292_v61, 0.0  ;;  %v1277_v24 = vpop.permute.xlu1 %1276 }
 0x38b   : > { %v1317_v26 = vadd.f32 1e-05, %v1301_v62  ;;  %v1295_v30 = vsub.f32 %v5039_v32, %v1277_v24  ;;  %v1275_v34 = vpop.permute.xlu0 %1274  ;;  %v6425_v24 = vmov 0  }
 0x38c   : > { %v1316_v36 = vadd.f32 1e-05, %v1300_v20  ;;  %v1294_v37 = vsub.f32 %v5042_v35, %v1275_v34  ;;  %4327 = vset.pattern.permute.xlu1 %v6425_v24  ;;  %4328 = vset.pattern.permute.xlu0 %v6425_v24  ;;  %v1307_v34 = vsub.f32 %v4919_v63, %v5021_v57 }
 0x38d   : > { %4408 = vrsqrt.f32 %v1317_v26  ;;  %v1303_v38 = vmax.f32 %v1295_v30, 0.0  ;;  %1574 = vmatprep.mubr.bf16.mxu0 %v6425_v24 }
 0x38e   : > { %4410 = vrsqrt.f32 %v1316_v36  ;;  %v1302_v41 = vmax.f32 %v1294_v37, 0.0  ;;  %v1281_v44 = vpop.permute.xlu1 %1280  ;;  %v716_v36 = vld [vmem:[%s6452_s0 + $0x8] sm:$0xff] }
 0x38f   : > { %v1319_v45 = vadd.f32 1e-05, %v1303_v38  ;;  %v1297_v46 = vsub.f32 %v5049_v39, %v1281_v44  ;;  %v1279_v47 = vpop.permute.xlu0 %1278  ;;  %v1306_v38 = vsub.f32 %v4921_v15, %v5023_v59  ;;  %v715_v44 = vld [vmem:[%s6452_s0] sm:$0xff]  ;;  %v718_v59 = vld [vmem:[%s6452_s0 + $0x18] sm:$0xff] }
 0x390   : > { %v1318_v48 = vadd.f32 1e-05, %v1302_v41  ;;  %v1296_v50 = vsub.f32 %v5052_v43, %v1279_v47 }
 0x391   : > { %4412 = vrsqrt.f32 %v1319_v45  ;;  %v1305_v51 = vmax.f32 %v1297_v46, 0.0 }
 0x392   : > { %4414 = vrsqrt.f32 %v1318_v48  ;;  %v1304_v53 = vmax.f32 %v1296_v50, 0.0  ;;  %v1309_v48 = vsub.f32 %v4933_v31, %v5029_v14 }
 0x393   : > { %v4405_v54 = vpop.eup %4404  ;;  %v1321_v55 = vadd.f32 1e-05, %v1305_v51  ;;  %v1308_v51 = vsub.f32 %v4935_v33, %v5032_v21  ;;  %v1311_v33 = vsub.f32 %v4948_v40, %v5039_v32 }
 0x394   : > { %v4407_v56 = vpop.eup %4406  ;;  %v1320_v58 = vadd.f32 1e-05, %v1304_v53  ;;  %1340 = vrot.lane.b32.xlu1 %v4405_v54, %s6418_s2 }
 0x395   : > { %4416 = vrsqrt.f32 %v1321_v55  ;;  %1338 = vrot.lane.b32.xlu0 %v4407_v56, %s6418_s2  ;;  %v717_v55 = vld [vmem:[%s6452_s0 + $0x10] sm:$0xff] }
 0x396   : > { %4418 = vrsqrt.f32 %v1320_v58 }
 0x397   : > { %v4409_v60 = vpop.eup %4408 }
 0x398   : > { %v4411_v61 = vpop.eup %4410  ;;  %1344 = vrot.lane.b32.xlu1 %v4409_v60, %s6418_s2 }
 0x399   : > { %1342 = vrot.lane.b32.xlu0 %v4411_v61, %s6418_s2 }
 0x39b   : > { %v4413_v62 = vpop.eup %4412 }
 0x39c   : > { %v4415_v20 = vpop.eup %4414  ;;  %1348 = vrot.lane.b32.xlu1 %v4413_v62, %s6418_s2 }
 0x39d   : > { %1346 = vrot.lane.b32.xlu0 %v4415_v20, %s6418_s2 }
 0x39f   : > { %v4417_v26 = vpop.eup %4416 }
 0x3a0   : > { %v4419_v30 = vpop.eup %4418  ;;  %1352 = vrot.lane.b32.xlu1 %v4417_v26, %s6418_s2  ;;  %v720_v26 = vld [vmem:[%s6452_s0 + $0x28] sm:$0xff] }
 0x3a1   : > { %1350 = vrot.lane.b32.xlu0 %v4419_v30, %s6418_s2  ;;  %s6453_s2 = sld [smem:[#allocation21_spill]] }
 0x3a7   : > { %s6454_s4 = smov %s6453_s2  ;;  %v724_v46 = vld [vmem:[%s6453_s2 + $0x8] sm:$0xff] }
 0x3a8   : > { %v723_v57 = vld [vmem:[%s6454_s4] sm:$0xff]  ;;  %v726_v31 = vld [vmem:[%s6454_s4 + $0x18] sm:$0xff]  ;;  %v725_v62 = vld [vmem:[%s6454_s4 + $0x10] sm:$0xff] }
 0x3a9   : > { %v728_v32 = vld [vmem:[%s6454_s4 + $0x28] sm:$0xff] }
 0x406   : > { %v1341_v37 = vpop.permute.xlu1 %1340 }
 0x407   : > { %v1363_v41 = vmul.f32 %v1341_v37, %v1307_v34  ;;  %v1339_v45 = vpop.permute.xlu0 %1338  ;;  %v1310_v34 = vsub.f32 %v4950_v42, %v5042_v35  ;;  %v727_v42 = vld [vmem:[%s6454_s4 + $0x20] sm:$0xff]  ;;  %v1313_v35 = vsub.f32 %v4963_v49, %v5049_v39  ;;  %v730_v39 = vld [vmem:[%s6454_s4 + $0x38] sm:$0xff] }
 0x408   : > { %v1362_v47 = vmul.f32 %v1339_v45, %v1306_v38  ;;  %v719_v38 = vld [vmem:[%s6452_s0 + $0x20] sm:$0xff] }
 0x409   : > { %v1371_v63 = vmul.f32 %v1363_v41, %v716_v36 }
 0x40a   : > { %v1370_v15 = vmul.f32 %v1362_v47, %v715_v44  ;;  %v1345_v50 = vpop.permute.xlu1 %1344 }
 0x40b   : > { %v1379_v53 = vadd.f32 %v1371_v63, %v724_v46  ;;  %v1365_v54 = vmul.f32 %v1345_v50, %v1309_v48  ;;  %v1343_v56 = vpop.permute.xlu0 %1342 }
 0x40c   : > { %v1378_v58 = vadd.f32 %v1370_v15, %v723_v57  ;;  %v1364_v14 = vmul.f32 %v1343_v56, %v1308_v51  ;;  %v722_v57 = vld [vmem:[%s6452_s0 + $0x38] sm:$0xff]  ;;  %v1312_v15 = vsub.f32 %v4968_v52, %v5052_v43  ;;  %v721_v51 = vld [vmem:[%s6452_s0 + $0x30] sm:$0xff]  ;;  %s3946_s0 = sshll.u32 %s4811_s23, 5  ;;  %s6458_s23 = smov 127  }
 0x40d   : > { %v3830_v60 = vmul.f32 -1.442695, %v1379_v53  ;;  %v1373_v61 = vmul.f32 %v1365_v54, %v718_v59  ;;  %v729_v52 = vld [vmem:[%s6454_s4 + $0x30] sm:$0xff]  ;;  %s4643_s4 = smov 113  }
 0x40e   : > { %v3829_v21 = vmul.f32 -1.442695, %v1378_v58  ;;  %v1372_v20 = vmul.f32 %v1364_v14, %v717_v55  ;;  %v1349_v30 = vpop.permute.xlu1 %1348 }
 0x40f   : > { %4420 = vpow2.f32 %v3830_v60  ;;  %v1381_v36 = vadd.f32 %v1373_v61, %v726_v31  ;;  %v1367_v37 = vmul.f32 %v1349_v30, %v1311_v33  ;;  %v1347_v41 = vpop.permute.xlu0 %1346 }
 0x410   : > { %4422 = vpow2.f32 %v3829_v21  ;;  %v1380_v40 = vadd.f32 %v1372_v20, %v725_v62  ;;  %v1366_v44 = vmul.f32 %v1347_v41, %v1310_v34 }
 0x411   : > { %v3832_v45 = vmul.f32 -1.442695, %v1381_v36  ;;  %v1375_v46 = vmul.f32 %v1367_v37, %v720_v26 }
 0x412   : > { %v3831_v47 = vmul.f32 -1.442695, %v1380_v40  ;;  %v1374_v63 = vmul.f32 %v1366_v44, %v719_v38  ;;  %v1353_v48 = vpop.permute.xlu1 %1352 }
 0x413   : > { %4424 = vpow2.f32 %v3832_v45  ;;  %v1383_v59 = vadd.f32 %v1375_v46, %v728_v32  ;;  %v1369_v50 = vmul.f32 %v1353_v48, %v1313_v35  ;;  %v1351_v53 = vpop.permute.xlu0 %1350 }
 0x414   : > { %4426 = vpow2.f32 %v3831_v47  ;;  %v1382_v49 = vadd.f32 %v1374_v63, %v727_v42  ;;  %v1368_v54 = vmul.f32 %v1351_v53, %v1312_v15 }
 0x415   : > { %v3834_v55 = vmul.f32 -1.442695, %v1383_v59  ;;  %v1377_v56 = vmul.f32 %v1369_v50, %v722_v57 }
 0x416   : > { %v3833_v43 = vmul.f32 -1.442695, %v1382_v49  ;;  %v1376_v58 = vmul.f32 %v1368_v54, %v721_v51 }
 0x417   : > { %4428 = vpow2.f32 %v3834_v55  ;;  %v1385_v31 = vadd.f32 %v1377_v56, %v730_v39 }
 0x418   : > { %4430 = vpow2.f32 %v3833_v43  ;;  %v1384_v14 = vadd.f32 %v1376_v58, %v729_v52  ;;  %v743_v52 = vld [vmem:[%s6394_s8] sm:$0xff]  ;;  %v744_v43 = vld [vmem:[%s6394_s8 + $0x8] sm:$0xff]  ;;  %v745_v58 = vld [vmem:[%s6394_s8 + $0x10] sm:$0xff] }
 0x419   : > { %v4421_v60 = vpop.eup %4420  ;;  %v3836_v61 = vmul.f32 -1.442695, %v1385_v31  ;;  %v746_v31 = vld [vmem:[%s6394_s8 + $0x18] sm:$0xff] }
 0x41a   : > { %v4423_v62 = vpop.eup %4422  ;;  %v3835_v33 = vmul.f32 -1.442695, %v1384_v14  ;;  %v1411_v21 = vadd.f32 1.0, %v4421_v60 }
 0x41b   : > { %4432 = vpow2.f32 %v3836_v61  ;;  %v1410_v20 = vadd.f32 1.0, %v4423_v62 }
 0x41c   : > { %4434 = vpow2.f32 %v3835_v33 }
 0x41d   : > { %v4425_v26 = vpop.eup %4424  ;;  %4436 = vrcp.f32 %v1411_v21 }
 0x41e   : > { %v4427_v30 = vpop.eup %4426  ;;  %4438 = vrcp.f32 %v1410_v20  ;;  %v1413_v34 = vadd.f32 1.0, %v4425_v26 }
 0x41f   : > { %v1412_v36 = vadd.f32 1.0, %v4427_v30 }
 0x420   : > { %4440 = vrcp.f32 %v1413_v34 }
 0x421   : > { %v4429_v37 = vpop.eup %4428  ;;  %4442 = vrcp.f32 %v1412_v36 }
 0x422   : > { %v4431_v38 = vpop.eup %4430  ;;  %v1415_v41 = vadd.f32 1.0, %v4429_v37 }
 0x423   : > { %v1414_v40 = vadd.f32 1.0, %v4431_v38 }
 0x424   : > { %4444 = vrcp.f32 %v1415_v41 }
 0x425   : > { %v4433_v32 = vpop.eup %4432  ;;  %4446 = vrcp.f32 %v1414_v40  ;;  %v4337_v40 = vld [vmem:[%s6455_s7] sm:$0xff]   ;;  %s5295_s7 = scalar_lea.vmem %s6457_s21, %s3946_s0  ;;  %s4642_s21 = smov 15  }
 0x426   : > { %v4435_v44 = vpop.eup %4434  ;;  %v1417_v45 = vadd.f32 1.0, %v4433_v32  ;;  %s4644_s0 = smov 112  }
 0x427   : > { %v4437_v46 = vpop.eup %4436  ;;  %v1416_v42 = vadd.f32 1.0, %v4435_v44 }
 0x428   : > { %v4439_v35 = vpop.eup %4438  ;;  %v1435_v47 = vadd.f32 1.0, %v4437_v46  ;;  %4448 = vrcp.f32 %v1417_v45 }
 0x429   : > { %v1434_v63 = vadd.f32 1.0, %v4439_v35  ;;  %4450 = vrcp.f32 %v1416_v42 }
 0x42a   : > { %v4441_v57 = vpop.eup %4440  ;;  %1449 = vperm.xlu1 %4327, %v1435_v47  }
 0x42b   : > { %v4443_v48 = vpop.eup %4442  ;;  %1444 = vperm.xlu0 %4328, %v1434_v63   ;;  %v1437_v15 = vadd.f32 1.0, %v4441_v57 }
 0x42c   : > { %v1436_v59 = vadd.f32 1.0, %v4443_v48 }
 0x42e   : > { %v4445_v50 = vpop.eup %4444  ;;  %1454 = vperm.xlu1 %4327, %v1436_v59  }
 0x42f   : > { %v4447_v51 = vpop.eup %4446  ;;  %1459 = vperm.xlu0 %4328, %v1437_v15   ;;  %v1439_v53 = vadd.f32 1.0, %v4445_v50 }
 0x430   : > { %v1438_v49 = vadd.f32 1.0, %v4447_v51 }
 0x432   : > { %v4449_v39 = vpop.eup %4448  ;;  %1464 = vperm.xlu1 %4327, %v1438_v49  }
 0x433   : > { %v4451_v54 = vpop.eup %4450  ;;  %1469 = vperm.xlu0 %4328, %v1439_v53   ;;  %v1441_v55 = vadd.f32 1.0, %v4449_v39 }
 0x434   : > { %v1440_v56 = vadd.f32 1.0, %v4451_v54 }
 0x436   : > { %1474 = vperm.xlu1 %4327, %v1440_v56  }
 0x437   : > { %1479 = vperm.xlu0 %4328, %v1441_v55  }
 0x43a   : > { %1508 = vperm.xlu1 %4327, %v743_v52  }
 0x43b   : > { %1513 = vperm.xlu0 %4328, %v744_v43  }
 0x43e   : > { %1518 = vperm.xlu1 %4327, %v745_v58  }
 0x43f   : > { %1523 = vperm.xlu0 %4328, %v746_v31  }
 0x4a9   : > { %v1450_v14 = vpop.permute.xlu1 %1449 }
 0x4aa   : > { %v1445_v60 = vpop.permute.xlu0 %1444  ;;  %v1485_v61 = vmul.f32 %v1450_v14, %v872_v12  ;;  %v1484_v62 = vmul.f32 %v1450_v14, %v871_v11 }
 0x4ab   : > { %v1483_v33 = vmul.f32 %v1445_v60, %v870_v6  ;;  %v1482_v21 = vmul.f32 %v1445_v60, %v869_v5 }
 0x4ad   : > { %v1455_v20 = vpop.permute.xlu1 %1454  ;;  %v1499_v26 = vpack.c.bf16 %v1485_v61, %v1483_v33  ;;  %v1498_v30 = vpack.c.bf16 %v1484_v62, %v1482_v21 }
 0x4ae   : > { %v1486_v34 = vmul.f32 %v1455_v20, %v873_v3  ;;  %v1487_v36 = vmul.f32 %v1455_v20, %v874_v4  ;;  %v1460_v37 = vpop.permute.xlu0 %1459 }
 0x4af   : > { %v1488_v7 = vmul.f32 %v1460_v37, %v875_v9  ;;  %v1489_v11 = vmul.f32 %v1460_v37, %v876_v10  ;;  %1542 = vmatprep.subr.bf16.mxu0 %v1499_v26  ;;  %v755_v26 = vld [vmem:[%s6397_s11] sm:$0xff] }
 0x4b0   : > { %1543 = vmatpush1.bf16.msra.mxu0 %v1498_v30  ;;  %4064 = vmatprep.mubr.msk.f32.mxu1 %vm1631_vm2, %v755_v26 }
 0x4b1   : > { %v1465_v1 = vpop.permute.xlu1 %1464  ;;  %v1501_v5 = vpack.c.bf16 %v1489_v11, %v1487_v36  ;;  %v1500_v6 = vpack.c.bf16 %v1488_v7, %v1486_v34 }
 0x4b2   : > { %v1490_v12 = vmul.f32 %v1465_v1, %v877_v22  ;;  %v1491_v3 = vmul.f32 %v1465_v1, %v878_v23  ;;  %v1470_v0 = vpop.permute.xlu0 %1469 }
 0x4b3   : > { %v1492_v4 = vmul.f32 %v1470_v0, %v879_v17  ;;  %v1493_v9 = vmul.f32 %v1470_v0, %v880_v18  ;;  %1544 = vmatprep.subr.bf16.mxu0 %v1501_v5 }
 0x4b4   : > { %1545 = vmatpush1.bf16.msra.mxu0 %v1500_v6 }
 0x4b5   : > { %v1475_v2 = vpop.permute.xlu1 %1474  ;;  %v1503_v10 = vpack.c.bf16 %v1493_v9, %v1491_v3  ;;  %v1502_v38 = vpack.c.bf16 %v1492_v4, %v1490_v12 }
 0x4b6   : > { %v1494_v41 = vmul.f32 %v1475_v2, %v881_v28  ;;  %v1495_v22 = vmul.f32 %v1475_v2, %v882_v29  ;;  %v1480_v13 = vpop.permute.xlu0 %1479  ;;  %v5249_v2 = vld [vmem:[%s6397_s11 + $0x8] sm:$0xff] }
 0x4b7   : > { %v1496_v23 = vmul.f32 %v1480_v13, %v883_v25  ;;  %v1497_v17 = vmul.f32 %v1480_v13, %v884_v27  ;;  %1546 = vmatprep.subr.bf16.mxu0 %v1503_v10  ;;  %v5254_v10 = vld [vmem:[%s6397_s11 + $0x10] sm:$0xff] }
 0x4b8   : > { %1547 = vmatpush1.bf16.msra.mxu0 %v1502_v38  ;;  %v5263_v38 = vld [vmem:[%s6397_s11 + $0x18] sm:$0xff] }
 0x4b9   : > { %v1505_v8 = vpack.c.bf16 %v1497_v17, %v1495_v22  ;;  %v1504_v18 = vpack.c.bf16 %v1496_v23, %v1494_v41  ;;  %v1509_v16 = vpop.permute.xlu1 %1508 }
 0x4ba   : > { %v1514_v29 = vpop.permute.xlu0 %1513 }
 0x4bb   : > { %1548 = vmatprep.subr.bf16.mxu0 %v1505_v8 }
 0x4bc   : > { %1549 = vmatpush1.bf16.msra.mxu0 %v1504_v18 }
 0x4bd   : > { %v1519_v48 = vpop.permute.xlu1 %1518 }
 0x4be   : > { %v1524_v58 = vpop.permute.xlu0 %1523 }
 0x4bf   : > { %3839 = vmatmul.mubr.msk.bf16.vlgmr.msra.gmra.mrb[0].mxu0 %vm918_vm0, %v4337_v40 }
 0x4c0   : > { %1584 = vmatprep.mubr.bf16.mxu0 %v6425_v24 }
 0x4c7   : > { %3840 = vmatmul.mubr.msk.bf16.gmra.mrb[4].mxu0 %vm918_vm0, %v4338_v19 }
 0x4c8   : > { %4078 = vmatprep.mubr.msk.f32.mxu0 %vm1631_vm2, %v755_v26 }
 0x592   : > { %v1576_v25 = vpop.f32.mrb[0].mxu0 }
 0x593   : > { %v5197_v27 = vadd.f32 %v1576_v25, %v1509_v16  ;;  %v1578_v28 = vpop.f32.mrb[1].mxu0 }
 0x594   : > { %v5199_v32 = vadd.f32 %v1578_v28, %v1509_v16  ;;  %v1580_v44 = vpop.f32.mrb[2].mxu0  ;;  %v747_v28 = vld [vmem:[%s6395_s9] sm:$0xff] }
 0x595   : > { %v5201_v45 = vadd.f32 %v1580_v44, %v1514_v29  ;;  %v1582_v46 = vpop.f32.mrb[3].mxu0  ;;  %v1607_v63 = vmul.f32 %v5197_v27, %v5197_v27  ;;  %v749_v44 = vld [vmem:[%s6395_s9 + $0x10] sm:$0xff] }
 0x596   : > { %v5203_v42 = vadd.f32 %v1582_v46, %v1514_v29  ;;  %v1595_v35 = vadd.f32 %v5199_v32, %v5197_v27  ;;  %v1608_v57 = vmul.f32 %v5199_v32, %v5199_v32  ;;  %v4639_v46 = vmov 1  }
 0x597   : > { %v1609_v39 = vmul.f32 %v5201_v45, %v5201_v45 }
 0x598   : > { %1596 = vadd.xlane.f32.xlu1 %v1595_v35  ;;  %v1598_v47 = vadd.f32 %v5203_v42, %v5201_v45  ;;  %v1615_v49 = vadd.f32 %v1608_v57, %v1607_v63  ;;  %v1610_v54 = vmul.f32 %v5203_v42, %v5203_v42  ;;  %v748_v35 = vld [vmem:[%s6395_s9 + $0x8] sm:$0xff]  ;;  %v750_v57 = vld [vmem:[%s6395_s9 + $0x18] sm:$0xff] }
 0x599   : > { %v752_v63 = vld [vmem:[%s6396_s10 + $0x8] sm:$0xff] }
 0x59a   : > { %v1586_v15 = vpop.f32.mrb[4].mxu0  ;;  %1599 = vadd.xlane.f32.xlu0 %v1598_v47  ;;  %v1618_v60 = vadd.f32 %v1610_v54, %v1609_v39  ;;  %v751_v47 = vld [vmem:[%s6396_s10] sm:$0xff] }
 0x59b   : > { %v5213_v59 = vadd.f32 %v1586_v15, %v1519_v48  ;;  %v1588_v50 = vpop.f32.mrb[5].mxu0  ;;  %v4341_v15 = vld [vmem:[%s5295_s7 + $0x4] ss:$8 sps:$4 sm:$0xff]  }
 0x59c   : > { %v5215_v51 = vadd.f32 %v1588_v50, %v1519_v48  ;;  %v1590_v53 = vpop.f32.mrb[6].mxu0  ;;  %v4339_v48 = vld [vmem:[%s5295_s7] ss:$8 sps:$4 sm:$0xff]  }
 0x59d   : > { %v1592_v55 = vpop.f32.mrb[7].mxu0  ;;  %v1611_v52 = vmul.f32 %v5213_v59, %v5213_v59  ;;  %v5227_v31 = vadd.f32 %v1590_v53, %v1524_v58 }
 0x59e   : > { %1616 = vadd.xlane.f32.xlu0 %v1615_v49  ;;  %v1601_v56 = vadd.f32 %v5215_v51, %v5213_v59  ;;  %v1612_v43 = vmul.f32 %v5215_v51, %v5215_v51  ;;  %v5229_v14 = vadd.f32 %v1592_v55, %v1524_v58 }
 0x59f   : > { %v1613_v33 = vmul.f32 %v5227_v31, %v5227_v31 }
 0x5a0   : > { %1602 = vadd.xlane.f32.xlu1 %v1601_v56  ;;  %v1621_v61 = vadd.f32 %v1612_v43, %v1611_v52  ;;  %v1604_v62 = vadd.f32 %v5229_v14, %v5227_v31  ;;  %v1614_v21 = vmul.f32 %v5229_v14, %v5229_v14 }
 0x5a2   : > { %1619 = vadd.xlane.f32.xlu0 %v1618_v60  ;;  %v1624_v20 = vadd.f32 %v1614_v21, %v1613_v33 }
 0x5a4   : > { %1622 = vadd.xlane.f32.xlu1 %v1621_v61 }
 0x5a6   : > { %1605 = vadd.xlane.f32.xlu0 %v1604_v62 }
 0x5aa   : > { %1625 = vadd.xlane.f32.xlu0 %v1624_v20 }
 0x625   : > { %v1597_v34 = vpop.xlane.xlu1 %1596 }
 0x627   : > { %v1600_v30 = vpop.xlane.xlu0 %1599 }
 0x62b   : > { %v1617_v36 = vpop.xlane.xlu0 %1616 }
 0x62c   : > { %v1627_v11 = vsel %vm1104_vm1, %v1597_v34, %v1617_v36  ;;  %v4344_v34 = vld [vmem:[%s5295_s7 + $0x14] ss:$8 sps:$4 sm:$0xff]   ;;  %v4342_v36 = vld [vmem:[%s5295_s7 + $0x10] ss:$8 sps:$4 sm:$0xff]   ;;  %s5337_s7 = sand.u32 1, %s4626_s25  }
 0x62d   : > { %v1603_v37 = vpop.xlane.xlu1 %1602  ;;  %s3808_s26 = sshll.u32 %s5337_s7, 5  ;;  %s4248_s22 = smul.u32 432, %s5337_s7 }
 0x62e   : > { %s5344_s29 = scalar_lea.vmem [#allocation2], %s3808_s26 }
 0x62f   : > { %v1620_v7 = vpop.xlane.xlu0 %1619  ;;  %s6226_s2 = scalar_lea.vmem [#allocation4], %s4248_s22 }
 0x630   : > { %v1628_v1 = vsel %vm1104_vm1, %v1600_v30, %v1620_v7  ;;  %v4345_v7 = vld [vmem:[%s6399_s13] sm:$0xff]  }
 0x631   : > { %v4116_v5 = vpack.c.bf16 %v1628_v1, %v1627_v11  ;;  %v1623_v12 = vpop.xlane.xlu1 %1622  ;;  %v753_v11 = vld [vmem:[%s6396_s10 + $0x10] sm:$0xff] }
 0x632   : > { %v1629_v0 = vsel %vm1104_vm1, %v1603_v37, %v1623_v12  ;;  %v4346_v12 = vld [vmem:[%s6399_s13 + $0x8] sm:$0xff]  }
 0x633   : > { %4117 = vmatprep.subr.bf16.mxu1 %v4116_v5  ;;  %v1606_v6 = vpop.xlane.xlu0 %1605 }
 0x634   : > { %4119 = vmatpush3.bf16.msra.mxu1 %v4116_v5  ;;  %v767_v5 = vld [vmem:[%s6400_s14] sm:$0xff] }
 0x637   : > { %v1626_v3 = vpop.xlane.xlu0 %1625 }
 0x638   : > { %v1630_v4 = vsel %vm1104_vm1, %v1606_v6, %v1626_v3  ;;  %v754_v6 = vld [vmem:[%s6396_s10 + $0x18] sm:$0xff]  ;;  %v769_v3 = vld [vmem:[%s6400_s14 + $0x10] sm:$0xff] }
 0x639   : > { %v4120_v9 = vpack.c.bf16 %v1630_v4, %v1629_v0  ;;  %v768_v0 = vld [vmem:[%s6400_s14 + $0x8] sm:$0xff]  ;;  %v770_v4 = vld [vmem:[%s6400_s14 + $0x18] sm:$0xff] }
 0x63b   : > { %4121 = vmatprep.subr.bf16.mxu1 %v4120_v9 }
 0x63c   : > { %4123 = vmatpush3.bf16.msra.mxu1 %v4120_v9 }
 0x63d   : > { %1921 = vmatprep.subr.bf16.mxu1 %v4341_v15 }
 0x63f   : > { %4065 = vmatmul.mubr.msk.f32.vlgmr.msra.gmra.mrb[16].mxu1 %vm1631_vm2, %v5249_v2 }
 0x640   : > { %4067 = vmatprep.mubr.msk.f32.mxu1 %vm1631_vm2, %v5254_v10  ;;  %1922 = vmatpush1.bf16.msra.mxu1 %v4339_v48 }
 0x641   : > { %1923 = vmatprep.subr.bf16.mxu1 %v4344_v34 }
 0x643   : > { %4068 = vmatmul.mubr.msk.f32.gmra.mrb[18].mxu1 %vm1631_vm2, %v5263_v38 }
 0x644   : > { %1953 = vmatprep.mubr.bf16.mxu1 %v6425_v24  ;;  %1924 = vmatpush1.bf16.msra.mxu1 %v4342_v36 }
 0x647   : > { %3851 = vmatmul.mubr.msk.bf16.vlgmr.msra.gmra.mrb[20].mxu1 %vm1631_vm2, %v4345_v7 }
 0x648   : > { %1963 = vmatprep.mubr.bf16.mxu1 %v6425_v24 }
 0x64f   : > { %3852 = vmatmul.mubr.msk.bf16.gmra.mrb[24].mxu1 %vm1631_vm2, %v4346_v12 }
 0x650   : > { %2022 = vmatprep.mubr.bf16.mxu1 %v6425_v24 }
 0x712   : > { %v4066_v41 = vpop.f32.mrb[16].mxu1 }
 0x713   : > { %v1730_v22 = vmul.f32 0.00390625, %v4066_v41  ;;  %v1710_v13 = vpop.f32.mrb[17].mxu1 }
 0x714   : > { %v1729_v23 = vmul.f32 0.00390625, %v1710_v13 }
 0x715   : > { %v1734_v17 = vmul.f32 %v1730_v22, %v1730_v22 }
 0x716   : > { %v4069_v8 = vpop.f32.mrb[18].mxu1  ;;  %v1733_v18 = vmul.f32 %v1729_v23, %v1729_v23 }
 0x717   : > { %1743 = vrot.lane.b32.xlu0 %v1734_v17, %s6456_s30  ;;  %v1720_v40 = vpop.f32.mrb[19].mxu1  ;;  %v1732_v16 = vmul.f32 0.00390625, %v4069_v8 }
 0x718   : > { %v1731_v19 = vmul.f32 0.00390625, %v1720_v40  ;;  %1741 = vrot.lane.b32.xlu1 %v1733_v18, %s6456_s30 }
 0x719   : > { %v1736_v29 = vmul.f32 %v1732_v16, %v1732_v16 }
 0x71a   : > { %v1735_v25 = vmul.f32 %v1731_v19, %v1731_v19 }
 0x71b   : > { %1768 = vperm.xlu0 %4328, %v1730_v22  }
 0x71c   : > { %1745 = vrot.lane.b32.xlu1 %v1735_v25, %s6456_s30 }
 0x71f   : > { %1827 = vperm.xlu0 %4328, %v747_v28  }
 0x720   : > { %1747 = vrot.lane.b32.xlu1 %v1736_v29, %s6456_s30 }
 0x723   : > { %1837 = vperm.xlu0 %4328, %v749_v44  }
 0x724   : > { %1763 = vperm.xlu1 %4327, %v1729_v23  }
 0x727   : > { %4329 = vset.pattern.permute.xlu0 %v4639_v46 }
 0x728   : > { %1773 = vperm.xlu1 %4327, %v1731_v19  }
 0x72c   : > { %1778 = vperm.xlu1 %4327, %v1732_v16  }
 0x730   : > { %1832 = vperm.xlu1 %4327, %v748_v35  }
 0x734   : > { %1855 = vperm.xlu1 %4327, %v751_v47  }
 0x738   : > { %1860 = vperm.xlu1 %4327, %v752_v63  }
 0x73c   : > { %1842 = vperm.xlu1 %4327, %v750_v57  }
 0x740   : > { %4330 = vset.pattern.permute.xlu1 %v4639_v46 }
 0x789   : > { %v1744_v50 = vpop.permute.xlu0 %1743 }
 0x78a   : > { %v1754_v53 = vsub.f32 %v1730_v22, %v1744_v50  ;;  %v1742_v49 = vpop.permute.xlu1 %1741 }
 0x78b   : > { %v1753_v39 = vsub.f32 %v1729_v23, %v1742_v49 }
 0x78c   : > { %v1758_v54 = vmax.f32 %v1754_v53, 0.0 }
 0x78d   : > { %v1757_v55 = vmax.f32 %v1753_v39, 0.0 }
 0x78e   : > { %v1790_v56 = vadd.f32 1e-05, %v1758_v54  ;;  %v1746_v52 = vpop.permute.xlu1 %1745 }
 0x78f   : > { %v1789_v43 = vadd.f32 1e-05, %v1757_v55  ;;  %v1755_v58 = vsub.f32 %v1731_v19, %v1746_v52 }
 0x790   : > { %4452 = vrsqrt.f32 %v1790_v56 }
 0x791   : > { %4454 = vrsqrt.f32 %v1789_v43  ;;  %v1759_v60 = vmax.f32 %v1755_v58, 0.0 }
 0x792   : > { %v1748_v61 = vpop.permute.xlu1 %1747 }
 0x793   : > { %v1791_v62 = vadd.f32 1e-05, %v1759_v60  ;;  %v1756_v33 = vsub.f32 %v1732_v16, %v1748_v61 }
 0x795   : > { %4456 = vrsqrt.f32 %v1791_v62  ;;  %v1760_v21 = vmax.f32 %v1756_v33, 0.0 }
 0x797   : > { %v1792_v20 = vadd.f32 1e-05, %v1760_v21 }
 0x799   : > { %4458 = vrsqrt.f32 %v1792_v20 }
 0x79a   : > { %v4453_v26 = vpop.eup %4452  ;;  %v1769_v23 = vpop.permute.xlu0 %1768 }
 0x79b   : > { %v4455_v30 = vpop.eup %4454  ;;  %1804 = vperm.xlu0 %4329, %v4453_v26   ;;  %v1783_v16 = vsub.f32 %v5201_v45, %v1769_v23  ;;  %v1784_v25 = vsub.f32 %v5203_v42, %v1769_v23 }
 0x79c   : > { %1799 = vperm.xlu1 %4330, %v4455_v30  }
 0x79e   : > { %v1828_v8 = vpop.permute.xlu0 %1827 }
 0x79f   : > { %v4457_v37 = vpop.eup %4456 }
 0x7a0   : > { %1809 = vperm.xlu1 %4330, %v4457_v37  }
 0x7a2   : > { %v1838_v40 = vpop.permute.xlu0 %1837 }
 0x7a3   : > { %v4459_v1 = vpop.eup %4458  ;;  %v1764_v9 = vpop.permute.xlu1 %1763 }
 0x7a4   : > { %4331 = vset.pattern.permute.xlu1 %v6425_v24  ;;  %1814 = vperm.xlu0 %4329, %v4459_v1   ;;  %v1781_v28 = vsub.f32 %v5197_v27, %v1764_v9  ;;  %v1782_v29 = vsub.f32 %v5199_v32, %v1764_v9 }
 0x7a5   : > { %1865 = vperm.xlu1 %4331, %v753_v11  }
 0x7a7   : > { %v1774_v41 = vpop.permute.xlu1 %1773 }
 0x7a8   : > { %4332 = vset.pattern.permute.xlu0 %v6425_v24  ;;  %v1785_v45 = vsub.f32 %v5213_v59, %v1774_v41  ;;  %v1786_v42 = vsub.f32 %v5215_v51, %v1774_v41 }
 0x7a9   : > { %2045 = vperm.xlu1 %4331, %v767_v5   ;;  %1870 = vperm.xlu0 %4332, %v754_v6  }
 0x7ab   : > { %v1779_v22 = vpop.permute.xlu1 %1778 }
 0x7ac   : > { %v1787_v43 = vsub.f32 %v5227_v31, %v1779_v22  ;;  %v1788_v58 = vsub.f32 %v5229_v14, %v1779_v22 }
 0x7ad   : > { %2055 = vperm.xlu1 %4331, %v769_v3   ;;  %2050 = vperm.xlu0 %4332, %v768_v0   ;;  %v4347_v3 = vld [vmem:[%s6398_s12] sm:$0xff]   ;;  %v4348_v0 = vld [vmem:[%s6398_s12 + $0x8] sm:$0xff]  }
 0x7af   : > { %v1833_v13 = vpop.permute.xlu1 %1832 }
 0x7b1   : > { %2060 = vperm.xlu0 %4332, %v770_v4  }
 0x7b3   : > { %v1856_v17 = vpop.permute.xlu1 %1855 }
 0x7b7   : > { %v1861_v18 = vpop.permute.xlu1 %1860 }
 0x7bb   : > { %v1843_v19 = vpop.permute.xlu1 %1842 }
 0x81a   : > { %v1805_v44 = vpop.permute.xlu0 %1804 }
 0x81b   : > { %v1819_v35 = vmul.f32 %v1805_v44, %v1783_v16  ;;  %v1820_v47 = vmul.f32 %v1805_v44, %v1784_v25  ;;  %v1800_v63 = vpop.permute.xlu1 %1799 }
 0x81c   : > { %v1817_v57 = vmul.f32 %v1800_v63, %v1781_v28  ;;  %v1818_v48 = vmul.f32 %v1800_v63, %v1782_v29 }
 0x81d   : > { %v1847_v15 = vmul.f32 %v1833_v13, %v1819_v35  ;;  %v1848_v50 = vmul.f32 %v1833_v13, %v1820_v47 }
 0x81e   : > { %v1845_v53 = vmul.f32 %v1828_v8, %v1817_v57  ;;  %v1846_v27 = vmul.f32 %v1828_v8, %v1818_v48 }
 0x81f   : > { %v1875_v49 = vadd.f32 %v1861_v18, %v1847_v15  ;;  %v1810_v32 = vpop.permute.xlu1 %1809  ;;  %v1876_v39 = vadd.f32 %v1861_v18, %v1848_v50 }
 0x820   : > { %v1873_v54 = vadd.f32 %v1856_v17, %v1845_v53  ;;  %v1821_v55 = vmul.f32 %v1810_v32, %v1785_v45  ;;  %v1822_v56 = vmul.f32 %v1810_v32, %v1786_v42  ;;  %v1874_v52 = vadd.f32 %v1856_v17, %v1846_v27 }
 0x821   : > { %v3948_v60 = vpack.c.bf16 %v1876_v39, %v1875_v49 }
 0x822   : > { %v1882_v61 = vpack.c.bf16 %v1876_v39, %v1874_v52  ;;  %v3947_v62 = vpack.c.bf16 %v1874_v52, %v1873_v54  ;;  %v1849_v33 = vmul.f32 %v1838_v40, %v1821_v55  ;;  %v1850_v59 = vmul.f32 %v1838_v40, %v1822_v56 }
 0x823   : > { %v1815_v21 = vpop.permute.xlu0 %1814  ;;  %3606 = vst [vmem:[%s5344_s29 + $0x8] sm:$0xff] %v3948_v60  ;;  %v1881_v51 = vpack.c.bf16 %v1875_v49, %v1873_v54 }
 0x824   : > { %v1823_v20 = vmul.f32 %v1815_v21, %v1787_v43  ;;  %v1824_v26 = vmul.f32 %v1815_v21, %v1788_v58  ;;  %1990 = vmatprep.subr.bf16.mxu1 %v1882_v61  ;;  %3605 = vst [vmem:[%s5344_s29] sm:$0xff] %v3947_v62  ;;  %v1866_v31 = vpop.permute.xlu1 %1865 }
 0x825   : > { %v1877_v14 = vadd.f32 %v1866_v31, %v1849_v33  ;;  %v1878_v30 = vadd.f32 %v1866_v31, %v1850_v59  ;;  %1991 = vmatpush1.bf16.msra.mxu1 %v1881_v51 }
 0x826   : > { %v1851_v34 = vmul.f32 %v1843_v19, %v1823_v20  ;;  %v1852_v36 = vmul.f32 %v1843_v19, %v1824_v26 }
 0x827   : > { %v3949_v37 = vpack.c.bf16 %v1878_v30, %v1877_v14 }
 0x828   : > { %v1871_v7 = vpop.permute.xlu0 %1870  ;;  %v2046_v4 = vpop.permute.xlu1 %2045 }
 0x829   : > { %3607 = vst [vmem:[%s5344_s29 + $0x10] sm:$0xff] %v3949_v37  ;;  %v1879_v11 = vadd.f32 %v1871_v7, %v1851_v34  ;;  %v1880_v1 = vadd.f32 %v1871_v7, %v1852_v36 }
 0x82b   : > { %v1883_v5 = vpack.c.bf16 %v1879_v11, %v1877_v14  ;;  %v3950_v6 = vpack.c.bf16 %v1880_v1, %v1879_v11  ;;  %v1884_v12 = vpack.c.bf16 %v1880_v1, %v1878_v30 }
 0x82c   : > { %v2051_v13 = vpop.permute.xlu0 %2050  ;;  %v2056_v29 = vpop.permute.xlu1 %2055 }
 0x82d   : > { %3608 = vst [vmem:[%s5344_s29 + $0x18] sm:$0xff] %v3950_v6  ;;  %1992 = vmatprep.subr.bf16.mxu1 %v1884_v12 }
 0x82e   : > { %1993 = vmatpush1.bf16.msra.mxu1 %v1883_v5 }
 0x830   : > { %v2061_v49 = vpop.permute.xlu0 %2060 }
 0x831   : > { %3855 = vmatmul.mubr.msk.bf16.vlgmr.msra.gmra.mrb[20].mxu1 %vm1631_vm2, %v4347_v3 }
 0x832   : > { %2032 = vmatprep.mubr.bf16.mxu1 %v6425_v24 }
 0x839   : > { %3856 = vmatmul.mubr.msk.bf16.gmra.mrb[24].mxu1 %vm1631_vm2, %v4348_v0 }
 0x83a   : > { %3338 = vmatprep.mubr.bf16.mxu1 %v6425_v24 }
 0x904   : > { %v2024_v9 = vpop.f32.mrb[20].mxu1 }
 0x905   : > { %v5360_v41 = vadd.f32 %v2046_v4, %v2024_v9  ;;  %v2026_v22 = vpop.f32.mrb[21].mxu1  ;;  %v773_v9 = vld [vmem:[%s6401_s15 + $0x10] sm:$0xff] }
 0x906   : > { %v5362_v23 = vadd.f32 %v2046_v4, %v2026_v22  ;;  %v2028_v17 = vpop.f32.mrb[22].mxu1  ;;  %v772_v22 = vld [vmem:[%s6401_s15 + $0x8] sm:$0xff] }
 0x907   : > { %v5364_v8 = vadd.f32 %v2051_v13, %v2028_v17  ;;  %v2030_v18 = vpop.f32.mrb[23].mxu1  ;;  %v2083_v25 = vmul.f32 %v5360_v41, %v5360_v41  ;;  %v776_v17 = vld [vmem:[%s6402_s16 + $0x8] sm:$0xff] }
 0x908   : > { %v5366_v40 = vadd.f32 %v2051_v13, %v2030_v18  ;;  %v2071_v19 = vadd.f32 %v5362_v23, %v5360_v41  ;;  %v2084_v28 = vmul.f32 %v5362_v23, %v5362_v23  ;;  %v775_v13 = vld [vmem:[%s6402_s16] sm:$0xff]  ;;  %v774_v18 = vld [vmem:[%s6401_s15 + $0x18] sm:$0xff] }
 0x909   : > { %v2085_v15 = vmul.f32 %v5364_v8, %v5364_v8 }
 0x90a   : > { %2072 = vadd.xlane.f32.xlu1 %v2071_v19  ;;  %v2074_v16 = vadd.f32 %v5366_v40, %v5364_v8  ;;  %v2091_v48 = vadd.f32 %v2084_v28, %v2083_v25  ;;  %v2086_v50 = vmul.f32 %v5366_v40, %v5366_v40 }
 0x90c   : > { %2075 = vadd.xlane.f32.xlu0 %v2074_v16  ;;  %v2034_v44 = vpop.f32.mrb[24].mxu1  ;;  %v2094_v54 = vadd.f32 %v2086_v50, %v2085_v15 }
 0x90d   : > { %v5376_v35 = vadd.f32 %v2056_v29, %v2034_v44  ;;  %v2036_v47 = vpop.f32.mrb[25].mxu1 }
 0x90e   : > { %v5378_v63 = vadd.f32 %v2056_v29, %v2036_v47  ;;  %v2038_v57 = vpop.f32.mrb[26].mxu1 }
 0x90f   : > { %v2040_v45 = vpop.f32.mrb[27].mxu1  ;;  %v2087_v53 = vmul.f32 %v5376_v35, %v5376_v35  ;;  %v5390_v32 = vadd.f32 %v2061_v49, %v2038_v57 }
 0x910   : > { %2092 = vadd.xlane.f32.xlu0 %v2091_v48  ;;  %v2077_v42 = vadd.f32 %v5378_v63, %v5376_v35  ;;  %v2088_v27 = vmul.f32 %v5378_v63, %v5378_v63  ;;  %v5392_v39 = vadd.f32 %v2061_v49, %v2040_v45 }
 0x911   : > { %v2089_v52 = vmul.f32 %v5390_v32, %v5390_v32 }
 0x912   : > { %2078 = vadd.xlane.f32.xlu1 %v2077_v42  ;;  %v2097_v55 = vadd.f32 %v2088_v27, %v2087_v53  ;;  %v2080_v56 = vadd.f32 %v5392_v39, %v5390_v32  ;;  %v2090_v43 = vmul.f32 %v5392_v39, %v5392_v39 }
 0x914   : > { %2095 = vadd.xlane.f32.xlu0 %v2094_v54  ;;  %v2100_v58 = vadd.f32 %v2090_v43, %v2089_v52  ;;  %v778_v43 = vld [vmem:[%s6402_s16 + $0x18] sm:$0xff] }
 0x916   : > { %2098 = vadd.xlane.f32.xlu1 %v2097_v55 }
 0x918   : > { %2081 = vadd.xlane.f32.xlu0 %v2080_v56  ;;  %v777_v56 = vld [vmem:[%s6402_s16 + $0x10] sm:$0xff] }
 0x91c   : > { %2101 = vadd.xlane.f32.xlu0 %v2100_v58 }
 0x997   : > { %v2073_v61 = vpop.xlane.xlu1 %2072 }
 0x999   : > { %v2076_v60 = vpop.xlane.xlu0 %2075 }
 0x99d   : > { %v2093_v62 = vpop.xlane.xlu0 %2092 }
 0x99e   : > { %v2103_v21 = vsel %vm1104_vm1, %v2073_v61, %v2093_v62 }
 0x99f   : > { %v2079_v33 = vpop.xlane.xlu1 %2078 }
 0x9a1   : > { %v2096_v59 = vpop.xlane.xlu0 %2095 }
 0x9a2   : > { %v2104_v51 = vsel %vm1104_vm1, %v2076_v60, %v2096_v59 }
 0x9a3   : > { %v4124_v20 = vpack.c.bf16 %v2104_v51, %v2103_v21  ;;  %v2099_v31 = vpop.xlane.xlu1 %2098 }
 0x9a4   : > { %v2105_v30 = vsel %vm1104_vm1, %v2079_v33, %v2099_v31 }
 0x9a5   : > { %v2082_v26 = vpop.xlane.xlu0 %2081  ;;  %4125 = vmatprep.subr.bf16.mxu0 %v4124_v20 }
 0x9a6   : > { %4127 = vmatpush3.bf16.msra.mxu0 %v4124_v20  ;;  %v2360_v20 = vlaneseq }
 0x9a9   : > { %v2102_v14 = vpop.xlane.xlu0 %2101 }
 0x9aa   : > { %v2106_v34 = vsel %vm1104_vm1, %v2082_v26, %v2102_v14  ;;  %v5447_v26 = vshrl.u32 %v2360_v20, 7 }
 0x9ab   : > { %v4128_v36 = vpack.c.bf16 %v2106_v34, %v2105_v30 }
 0x9ad   : > { %4129 = vmatprep.subr.bf16.mxu0 %v4128_v36 }
 0x9ae   : > { %4131 = vmatpush3.bf16.msra.mxu0 %v4128_v36  ;;  %v5456_v36 = vsub.s32 0, %v5447_v26 }
 0x9b1   : > { %4079 = vmatmul.mubr.msk.f32.vlgmr.msra.gmra.mrb[8].mxu0 %vm1631_vm2, %v5249_v2 }
 0x9b2   : > { %4081 = vmatprep.mubr.msk.f32.mxu0 %vm1631_vm2, %v5254_v10  ;;  %v771_v10 = vld [vmem:[%s6401_s15] sm:$0xff] }
 0x9b5   : > { %4082 = vmatmul.mubr.msk.f32.gmra.mrb[10].mxu0 %vm1631_vm2, %v5263_v38 }
 0xa84   : > { %v4080_v37 = vpop.f32.mrb[8].mxu0 }
 0xa85   : > { %v2193_v7 = vmul.f32 0.00390625, %v4080_v37  ;;  %v2173_v11 = vpop.f32.mrb[9].mxu0 }
 0xa86   : > { %v2192_v1 = vmul.f32 0.00390625, %v2173_v11 }
 0xa87   : > { %v2197_v5 = vmul.f32 %v2193_v7, %v2193_v7 }
 0xa88   : > { %v4083_v6 = vpop.f32.mrb[10].mxu0  ;;  %v2196_v12 = vmul.f32 %v2192_v1, %v2192_v1 }
 0xa89   : > { %2206 = vrot.lane.b32.xlu0 %v2197_v5, %s6456_s30  ;;  %v2183_v3 = vpop.f32.mrb[11].mxu0  ;;  %v2195_v0 = vmul.f32 0.00390625, %v4083_v6 }
 0xa8a   : > { %v2194_v4 = vmul.f32 0.00390625, %v2183_v3  ;;  %2204 = vrot.lane.b32.xlu1 %v2196_v12, %s6456_s30 }
 0xa8b   : > { %v2199_v38 = vmul.f32 %v2195_v0, %v2195_v0 }
 0xa8c   : > { %v2198_v2 = vmul.f32 %v2194_v4, %v2194_v4 }
 0xa8d   : > { %2231 = vperm.xlu0 %4332, %v2193_v7  }
 0xa8e   : > { %2208 = vrot.lane.b32.xlu1 %v2198_v2, %s6456_s30 }
 0xa91   : > { %2290 = vperm.xlu0 %4332, %v771_v10  }
 0xa92   : > { %2210 = vrot.lane.b32.xlu1 %v2199_v38, %s6456_s30 }
 0xa95   : > { %2300 = vperm.xlu0 %4332, %v773_v9  }
 0xa96   : > { %2226 = vperm.xlu1 %4331, %v2192_v1  }
 0xa99   : > { %4333 = vset.pattern.permute.xlu0 %v4639_v46 }
 0xa9a   : > { %2236 = vperm.xlu1 %4331, %v2194_v4  }
 0xa9e   : > { %2241 = vperm.xlu1 %4331, %v2195_v0  }
 0xaa2   : > { %2295 = vperm.xlu1 %4331, %v772_v22  }
 0xaa6   : > { %2318 = vperm.xlu1 %4331, %v775_v13  }
 0xaaa   : > { %2323 = vperm.xlu1 %4331, %v776_v17  }
 0xaae   : > { %2305 = vperm.xlu1 %4331, %v774_v18  }
 0xab2   : > { %4334 = vset.pattern.permute.xlu1 %v4639_v46 }
 0xafb   : > { %v2207_v19 = vpop.permute.xlu0 %2206 }
 0xafc   : > { %v2217_v16 = vsub.f32 %v2193_v7, %v2207_v19  ;;  %v2205_v25 = vpop.permute.xlu1 %2204 }
 0xafd   : > { %v2216_v28 = vsub.f32 %v2192_v1, %v2205_v25  ;;  %v5463_v1 = vld [vmem:[%s6405_s19 + $0x8] sm:$0x3] }
 0xafe   : > { %v2221_v29 = vmax.f32 %v2217_v16, 0.0 }
 0xaff   : > { %v2220_v44 = vmax.f32 %v2216_v28, 0.0 }
 0xb00   : > { %v2253_v47 = vadd.f32 1e-05, %v2221_v29  ;;  %v2209_v57 = vpop.permute.xlu1 %2208 }
 0xb01   : > { %v2252_v48 = vadd.f32 1e-05, %v2220_v44  ;;  %v2218_v15 = vsub.f32 %v2194_v4, %v2209_v57 }
 0xb02   : > { %4460 = vrsqrt.f32 %v2253_v47 }
 0xb03   : > { %4462 = vrsqrt.f32 %v2252_v48  ;;  %v2222_v50 = vmax.f32 %v2218_v15, 0.0 }
 0xb04   : > { %v2211_v45 = vpop.permute.xlu1 %2210 }
 0xb05   : > { %v2254_v42 = vadd.f32 1e-05, %v2222_v50  ;;  %v2219_v53 = vsub.f32 %v2195_v0, %v2211_v45 }
 0xb07   : > { %4464 = vrsqrt.f32 %v2254_v42  ;;  %v2223_v27 = vmax.f32 %v2219_v53, 0.0 }
 0xb09   : > { %v2255_v49 = vadd.f32 1e-05, %v2223_v27 }
 0xb0b   : > { %4466 = vrsqrt.f32 %v2255_v49  ;;  %v5600_v49 = vand.u32 127, %v2360_v20 }
 0xb0c   : > { %v4461_v46 = vpop.eup %4460  ;;  %v2232_v33 = vpop.permute.xlu0 %2231 }
 0xb0d   : > { %v4463_v54 = vpop.eup %4462  ;;  %2267 = vperm.xlu0 %4333, %v4461_v46   ;;  %v2246_v30 = vsub.f32 %v5364_v8, %v2232_v33  ;;  %v2247_v34 = vsub.f32 %v5366_v40, %v2232_v33  ;;  %v5467_v40 = vrot.slane %v5463_v1, %v5456_v36  ;;  %v860_v46 = vld [vmem:[%s6405_s19] sm:$0x3]  ;;  %vm2362_vm3 = vcmp.lt.s32.totalorder %v5600_v49, 17 }
 0xb0e   : > { %2262 = vperm.xlu1 %4334, %v4463_v54   ;;  %vm2577_vm4 = vcmp.lt.s32.totalorder %v5600_v49, 127  ;;  %vm2625_vm5 = vcmp.lt.s32.totalorder %v5600_v49, 113  ;;  %vm2673_vm6 = vcmp.lt.s32.totalorder %v5600_v49, 112  ;;  %vm2410_vm7 = vcmp.lt.s32.totalorder %v5600_v49, 16 }
 0xb0f   : > { %vm2458_vm8 = vcmp.lt.s32.totalorder %v5600_v49, 15  ;;  %vm2506_vm9 = vcmp.lt.s32.totalorder %v5600_v49, 1  ;;  %vm2721_vm10 = vcmp.lt.s32.totalorder %v5600_v49, 111  ;;  %v4352_v49 = vld [vmem:[%s6403_s17 + $0x8] ss:$12 sps:$4 sm:$0xff]  }
 0xb10   : > { %v2291_v21 = vpop.permute.xlu0 %2290 }
 0xb11   : > { %v4465_v55 = vpop.eup %4464 }
 0xb12   : > { %2272 = vperm.xlu1 %4334, %v4465_v55   ;;  %v5608_v55 = vsub.s32 1, %v5447_v26 }
 0xb14   : > { %v5449_v31 = vpop.permute.xlu0 %2300 }
 0xb15   : > { %v4467_v52 = vpop.eup %4466  ;;  %v2227_v58 = vpop.permute.xlu1 %2226 }
 0xb16   : > { %4335 = vset.pattern.permute.xlu1 %v6425_v24  ;;  %2277 = vperm.xlu0 %4333, %v4467_v52   ;;  %v2244_v37 = vsub.f32 %v5360_v41, %v2227_v58  ;;  %v2245_v7 = vsub.f32 %v5362_v23, %v2227_v58  ;;  %v4351_v52 = vld [vmem:[%s6403_s17 + $0x4] ss:$12 sps:$4 sm:$0xff]   ;;  %v5620_v58 = vrot.slane %v860_v46, %v5608_v55 }
 0xb17   : > { %2328 = vperm.xlu1 %4335, %v777_v56   ;;  %3167 = vmatprep.mubr.bf16.mxu0 %v4351_v52 }
 0xb19   : > { %v5442_v60 = vpop.permute.xlu1 %2236 }
 0xb1a   : > { %4336 = vset.pattern.permute.xlu0 %v6425_v24  ;;  %v2248_v25 = vsub.f32 %v5376_v35, %v5442_v60 }
 0xb1b   : > { %2333 = vperm.xlu0 %4336, %v778_v43   ;;  %v5617_v43 = vrot.slane %v860_v46, %v5456_v36  ;;  %v836_v46 = vld [vmem:[%s6404_s18 + $0x18] sm:$0xff] }
 0xb1d   : > { %v5444_v61 = vpop.permute.xlu1 %2241 }
 0xb1e   : > { %v2250_v19 = vsub.f32 %v5390_v32, %v5444_v61  ;;  %v2251_v44 = vsub.f32 %v5392_v39, %v5444_v61  ;;  %v2249_v32 = vsub.f32 %v5378_v63, %v5442_v60 }
 0xb21   : > { %v2296_v62 = vpop.permute.xlu1 %2295 }
 0xb25   : > { %v2319_v59 = vpop.permute.xlu1 %2318 }
 0xb29   : > { %v2324_v51 = vpop.permute.xlu1 %2323 }
 0xb2d   : > { %v5451_v14 = vpop.permute.xlu1 %2305 }
 0xb8c   : > { %v2268_v11 = vpop.permute.xlu0 %2267 }
 0xb8d   : > { %v2282_v5 = vmul.f32 %v2268_v11, %v2246_v30  ;;  %v2283_v6 = vmul.f32 %v2268_v11, %v2247_v34  ;;  %v2263_v12 = vpop.permute.xlu1 %2262 }
 0xb8e   : > { %v2280_v3 = vmul.f32 %v2263_v12, %v2244_v37  ;;  %v2281_v8 = vmul.f32 %v2263_v12, %v2245_v7  ;;  %v834_v7 = vld [vmem:[%s6404_s18 + $0x8] sm:$0xff]  ;;  %v851_v12 = vld [vmem:[%s6404_s18 + $0x90] sm:$0xff] }
 0xb8f   : > { %v2310_v0 = vmul.f32 %v2296_v62, %v2282_v5  ;;  %v2311_v41 = vmul.f32 %v2296_v62, %v2283_v6  ;;  %v833_v5 = vld [vmem:[%s6404_s18] sm:$0xff] }
 0xb90   : > { %v2308_v4 = vmul.f32 %v2291_v21, %v2280_v3  ;;  %v2309_v23 = vmul.f32 %v2291_v21, %v2281_v8  ;;  %v835_v8 = vld [vmem:[%s6404_s18 + $0x10] sm:$0xff] }
 0xb91   : > { %v2338_v2 = vadd.f32 %v2324_v51, %v2310_v0  ;;  %v5477_v22 = vadd.f32 %v2324_v51, %v2311_v41  ;;  %v2273_v16 = vpop.permute.xlu1 %2272 }
 0xb92   : > { %v2336_v10 = vadd.f32 %v2319_v59, %v2308_v4  ;;  %v5479_v13 = vadd.f32 %v2319_v59, %v2309_v23  ;;  %v2284_v29 = vmul.f32 %v2273_v16, %v2248_v25  ;;  %v2285_v35 = vmul.f32 %v2273_v16, %v2249_v32  ;;  %v853_v4 = vld [vmem:[%s6404_s18 + $0xa0] sm:$0xff]  ;;  %v859_v32 = vld [vmem:[%s6404_s18 + $0xd0] sm:$0xff] }
 0xb93   : > { %2346 = vrot.lane.b32.xlu0 %v2338_v2, %s4640_s1  ;;  %v5471_v38 = vmul.f32 %v5467_v40, %v2338_v2  ;;  %v857_v25 = vld [vmem:[%s6404_s18 + $0xc0] sm:$0xff] }
 0xb94   : > { %2344 = vrot.lane.b32.xlu1 %v2336_v10, %s4640_s1  ;;  %v5475_v9 = vmul.f32 %v5467_v40, %v2336_v10  ;;  %v2312_v48 = vmul.f32 %v5449_v31, %v2284_v29  ;;  %v2313_v63 = vmul.f32 %v5449_v31, %v2285_v35  ;;  %v856_v29 = vld [vmem:[%s6404_s18 + $0xb8] sm:$0xff]  ;;  %v858_v35 = vld [vmem:[%s6404_s18 + $0xc8] sm:$0xff] }
 0xb95   : > { %v2278_v18 = vpop.permute.xlu0 %2277 }
 0xb96   : > { %v2286_v28 = vmul.f32 %v2278_v18, %v2250_v19  ;;  %v2287_v47 = vmul.f32 %v2278_v18, %v2251_v44  ;;  %v2329_v50 = vpop.permute.xlu1 %2328  ;;  %v854_v19 = vld [vmem:[%s6404_s18 + $0xa8] sm:$0xff] }
 0xb97   : > { %2354 = vrot.lane.b32.xlu0 %v5477_v22, %s4640_s1  ;;  %v5539_v42 = vadd.f32 %v2329_v50, %v2312_v48  ;;  %v5547_v27 = vadd.f32 %v2329_v50, %v2313_v63 }
 0xb98   : > { %2352 = vrot.lane.b32.xlu1 %v5479_v13, %s4640_s1  ;;  %v2314_v57 = vmul.f32 %v5451_v14, %v2286_v28  ;;  %v2315_v39 = vmul.f32 %v5451_v14, %v2287_v47  ;;  %v865_v47 = vld [vmem:[%s6405_s19 + $0xa] sm:$0x3] }
 0xb99   : > { %v5712_v50 = vrot.slane %v865_v47, %v5608_v55 }
 0xb9a   : > { %v2334_v15 = vpop.permute.xlu0 %2333 }
 0xb9b   : > { %2396 = vrot.lane.b32.xlu0 %v2338_v2, %s6430_s6  ;;  %v5536_v45 = vadd.f32 %v2334_v15, %v2314_v57  ;;  %v5545_v53 = vadd.f32 %v2334_v15, %v2315_v39  ;;  %v5709_v15 = vrot.slane %v865_v47, %v5456_v36  ;;  %v837_v39 = vld [vmem:[%s6404_s18 + $0x20] sm:$0xff] }
 0xb9c   : > { %2394 = vrot.lane.b32.xlu1 %v2336_v10, %s6430_s6 }
 0xb9f   : > { %2404 = vrot.lane.b32.xlu0 %v5477_v22, %s6430_s6 }
 0xba0   : > { %2402 = vrot.lane.b32.xlu1 %v5479_v13, %s6430_s6 }
 0xba3   : > { %2444 = vrot.lane.b32.xlu0 %v2338_v2, %s4642_s21 }
 0xba4   : > { %2442 = vrot.lane.b32.xlu1 %v2336_v10, %s4642_s21 }
 0xba7   : > { %2452 = vrot.lane.b32.xlu0 %v5477_v22, %s4642_s21 }
 0xba8   : > { %2450 = vrot.lane.b32.xlu1 %v5479_v13, %s4642_s21 }
 0xbab   : > { %2492 = vrot.lane.b32.xlu0 %v2338_v2, %s6456_s30 }
 0xbac   : > { %2490 = vrot.lane.b32.xlu1 %v2336_v10, %s6456_s30 }
 0xbaf   : > { %2500 = vrot.lane.b32.xlu0 %v5477_v22, %s6456_s30 }
 0xbb0   : > { %2498 = vrot.lane.b32.xlu1 %v5479_v13, %s6456_s30 }
 0xbb3   : > { %2563 = vrot.lane.b32.xlu0 %v2338_v2, %s6458_s23 }
 0xbb4   : > { %2561 = vrot.lane.b32.xlu1 %v2336_v10, %s6458_s23 }
 0xbb7   : > { %2571 = vrot.lane.b32.xlu0 %v5477_v22, %s6458_s23 }
 0xbb8   : > { %2569 = vrot.lane.b32.xlu1 %v5479_v13, %s6458_s23 }
 0xbbb   : > { %2611 = vrot.lane.b32.xlu0 %v2338_v2, %s4643_s4 }
 0xbbc   : > { %2609 = vrot.lane.b32.xlu1 %v2336_v10, %s4643_s4 }
 0xbbf   : > { %2619 = vrot.lane.b32.xlu0 %v5477_v22, %s4643_s4 }
 0xbc0   : > { %2617 = vrot.lane.b32.xlu1 %v5479_v13, %s4643_s4 }
 0xbc3   : > { %2659 = vrot.lane.b32.xlu0 %v2338_v2, %s4644_s0 }
 0xbc4   : > { %2657 = vrot.lane.b32.xlu1 %v2336_v10, %s4644_s0 }
 0xbc7   : > { %2667 = vrot.lane.b32.xlu0 %v5477_v22, %s4644_s0 }
 0xbc8   : > { %2665 = vrot.lane.b32.xlu1 %v5479_v13, %s4644_s0 }
 0xbcb   : > { %2707 = vrot.lane.b32.xlu0 %v2338_v2, %s4645_s24  ;;  %v852_v2 = vld [vmem:[%s6404_s18 + $0x98] sm:$0xff] }
 0xbcc   : > { %2705 = vrot.lane.b32.xlu1 %v2336_v10, %s4645_s24  ;;  %v855_v10 = vld [vmem:[%s6404_s18 + $0xb0] sm:$0xff] }
 0xbcf   : > { %2350 = vrot.lane.b32.xlu0 %v5536_v45, %s4640_s1 }
 0xbd0   : > { %2348 = vrot.lane.b32.xlu1 %v5539_v42, %s4640_s1 }
 0xbd3   : > { %2358 = vrot.lane.b32.xlu0 %v5545_v53, %s4640_s1 }
 0xbd4   : > { %2356 = vrot.lane.b32.xlu1 %v5547_v27, %s4640_s1  ;;  %s3951_s1 = sshll.u32 %s4782_s3, 9 }
 0xbd7   : > { %2400 = vrot.lane.b32.xlu0 %v5536_v45, %s6430_s6 }
 0xbd8   : > { %2398 = vrot.lane.b32.xlu1 %v5539_v42, %s6430_s6 }
 0xbdb   : > { %2408 = vrot.lane.b32.xlu0 %v5545_v53, %s6430_s6 }
 0xbdc   : > { %2406 = vrot.lane.b32.xlu1 %v5547_v27, %s6430_s6 }
 0xbdf   : > { %2448 = vrot.lane.b32.xlu0 %v5536_v45, %s4642_s21 }
 0xbe0   : > { %2446 = vrot.lane.b32.xlu1 %v5539_v42, %s4642_s21 }
 0xbe3   : > { %2456 = vrot.lane.b32.xlu0 %v5545_v53, %s4642_s21 }
 0xbe4   : > { %2454 = vrot.lane.b32.xlu1 %v5547_v27, %s4642_s21  ;;  %s3682_s21 = sshll.u32 %s5344_s29, 4  ;;  %s3664_s29 = scalar_lea.sflag [#allocation3], %s5337_s7  ;;  %s6241_s21 = int_to_ptr.vmem [resolvable:$true] %s3682_s21 }
 0xbe7   : > { %2496 = vrot.lane.b32.xlu0 %v5536_v45, %s6456_s30 }
 0xbe8   : > { %2494 = vrot.lane.b32.xlu1 %v5539_v42, %s6456_s30 }
 0xbeb   : > { %2504 = vrot.lane.b32.xlu0 %v5545_v53, %s6456_s30 }
 0xbec   : > { %2502 = vrot.lane.b32.xlu1 %v5547_v27, %s6456_s30  ;;  %s4540_s30 = scalar_lea.vmem %s6241_s21, 512 }
 0xbed   : > { %p4541_p11 = scmp.ne.s32.totalorder %s6241_s21, %s4540_s30 }
 0xbef   : > { %2567 = vrot.lane.b32.xlu0 %v5536_v45, %s6458_s23  ;;  %p4542_p12 = pnand %p4541_p11, %p4799_p5 }
 0xbf0   : > { %2713 = vrot.lane.b32.xlu1 %v5479_v13, %s4645_s24 }
 0xbf1   : > { %p4543_p13 = pneg %p4542_p12 }
 0xbf3   : > { %2575 = vrot.lane.b32.xlu0 %v5545_v53, %s6458_s23 }
 0xbf4   : > { %2565 = vrot.lane.b32.xlu1 %v5539_v42, %s6458_s23 }
 0xbf7   : > { %2615 = vrot.lane.b32.xlu0 %v5536_v45, %s4643_s4 }
 0xbf8   : > { %2573 = vrot.lane.b32.xlu1 %v5547_v27, %s6458_s23 }
 0xbfb   : > { %2623 = vrot.lane.b32.xlu0 %v5545_v53, %s4643_s4 }
 0xbfc   : > { %2613 = vrot.lane.b32.xlu1 %v5539_v42, %s4643_s4 }
 0xbff   : > { %2715 = vrot.lane.b32.xlu0 %v5477_v22, %s4645_s24 }
 0xc00   : > { %2621 = vrot.lane.b32.xlu1 %v5547_v27, %s4643_s4 }
 0xc03   : > { %2663 = vrot.lane.b32.xlu0 %v5536_v45, %s4644_s0 }
 0xc04   : > { %2661 = vrot.lane.b32.xlu1 %v5539_v42, %s4644_s0 }
 0xc05   : > { %v2347_v54 = vpop.permute.xlu0 %2346 }
 0xc06   : > { %v2345_v56 = vpop.permute.xlu1 %2344 }
 0xc07   : > { %2671 = vrot.lane.b32.xlu0 %v5545_v53, %s4644_s0 }
 0xc08   : > { %2669 = vrot.lane.b32.xlu1 %v5547_v27, %s4644_s0  ;;  %s6239_s0 = scalar_lea.hbm %s6406_s20, %s3951_s1 }
 0xc09   : > { %v2355_v60 = vpop.permute.xlu0 %2354 }
 0xc0a   : > { %v2364_v61 = vsel %vm2362_vm3, %v2347_v54, %v2355_v60  ;;  %v2368_v62 = vsel %vm2362_vm3, %v2355_v60, %v2347_v54  ;;  %v2353_v33 = vpop.permute.xlu1 %2352 }
 0xc0b   : > { %v2384_v59 = vmul.f32 %v5617_v43, %v2368_v62  ;;  %v2385_v21 = vmul.f32 %v5620_v58, %v2364_v61  ;;  %v2363_v51 = vsel %vm2362_vm3, %v2345_v56, %v2353_v33  ;;  %v2367_v20 = vsel %vm2362_vm3, %v2353_v33, %v2345_v56  ;;  %2711 = vrot.lane.b32.xlu0 %v5536_v45, %s4645_s24 }
 0xc0c   : > { %v2382_v26 = vmul.f32 %v5617_v43, %v2367_v20  ;;  %v2383_v31 = vmul.f32 %v5620_v58, %v2363_v51  ;;  %2709 = vrot.lane.b32.xlu1 %v5539_v42, %s4645_s24  ;;  %v839_v51 = vld [vmem:[%s6404_s18 + $0x30] sm:$0xff]  ;;  %v866_v20 = vld [vmem:[%s6405_s19 + $0xc] sm:$0x3] }
 0xc0d   : > { %v5640_v14 = vpop.permute.xlu0 %2396 }
 0xc0e   : > { %v2390_v30 = vpack.c.bf16 %v2384_v59, %v2382_v26  ;;  %v5642_v34 = vpop.permute.xlu1 %2394  ;;  %v2391_v37 = vpack.c.bf16 %v2385_v21, %v2383_v31  ;;  %v838_v31 = vld [vmem:[%s6404_s18 + $0x28] sm:$0xff] }
 0xc0f   : > { %2719 = vrot.lane.b32.xlu0 %v5545_v53, %s4645_s24 }
 0xc10   : > { %2717 = vrot.lane.b32.xlu1 %v5547_v27, %s4645_s24  ;;  %3135 = vmatprep.subr.bf16.mxu0 %v2391_v37  ;;  %s4646_s24 = smov [#allocation2]  }
 0xc11   : > { %v5651_v11 = vpop.permute.xlu0 %2404  ;;  %3136 = vmatpush1.bf16.msra.mxu0 %v2390_v30  ;;  %s4544_s26 = sshll.u32 %s4646_s24, 4  ;;  %s4545_s26 = int_to_ptr.vmem [resolvable:$false] %s4544_s26 }
 0xc12   : > { %v5656_v6 = vpop.permute.xlu1 %2402  ;;  %s4546_s22 = scalar_lea.vmem %s4545_s26, 1024  ;;  %p4547_p0 = scmp.lt.s32.totalorder %s6241_s21, %s4545_s26 }
 0xc13   : > { %2760 = vperm.xlu0 %4336, %v834_v7   ;;  %p4548_p1 = scmp.lt.s32.totalorder %s4546_s22, %s4540_s30 }
 0xc14   : > { %2755 = vperm.xlu1 %4335, %v833_v5   ;;  %v5755_v5 = vrot.slane %v866_v20, %v5456_v36 }
 0xc15   : > { %v5661_v3 = vpop.permute.xlu0 %2444  ;;  %p4549_p2 = por %p4548_p1, %p4547_p0 }
 0xc16   : > { %v5666_v0 = vpop.permute.xlu1 %2442 }
 0xc17   : > { %2845 = vperm.xlu0 %4336, %v851_v12   ;;  %v5758_v12 = vrot.slane %v866_v20, %v5608_v55  ;;  %v845_v20 = vld [vmem:[%s6404_s18 + $0x60] sm:$0xff]  ;;  %p4550_p3 = pnand %p4549_p2, %p4543_p13 }
 0xc18   : > { %2765 = vperm.xlu1 %4335, %v835_v8   ;;  %v841_v8 = vld [vmem:[%s6404_s18 + $0x40] sm:$0xff] }
 0xc19   : > { %v5671_v41 = vpop.permute.xlu0 %2452 }
 0xc1a   : > { %v5676_v23 = vpop.permute.xlu1 %2450 }
 0xc1b   : > { %2855 = vperm.xlu0 %4336, %v853_v4  }
 0xc1c   : > { %2850 = vperm.xlu1 %4335, %v852_v2   ;;  %v840_v2 = vld [vmem:[%s6404_s18 + $0x38] sm:$0xff] }
 0xc1d   : > { %v5681_v18 = vpop.permute.xlu0 %2492 }
 0xc1e   : > { %v5686_v16 = vpop.permute.xlu1 %2490 }
 0xc1f   : > { %2865 = vperm.xlu0 %4336, %v855_v10  }
 0xc20   : > { %2860 = vperm.xlu1 %4335, %v854_v19  }
 0xc21   : > { %v5691_v28 = vpop.permute.xlu0 %2500 }
 0xc22   : > { %v5696_v44 = vpop.permute.xlu1 %2498 }
 0xc23   : > { %2875 = vperm.xlu0 %4336, %v857_v25  }
 0xc24   : > { %2870 = vperm.xlu1 %4335, %v856_v29  }
 0xc25   : > { %v2564_v57 = vpop.permute.xlu0 %2563 }
 0xc26   : > { %v2562_v48 = vpop.permute.xlu1 %2561 }
 0xc27   : > { %2885 = vperm.xlu0 %4336, %v859_v32  }
 0xc28   : > { %2880 = vperm.xlu1 %4335, %v858_v35  }
 0xc29   : > { %v2572_v63 = vpop.permute.xlu0 %2571 }
 0xc2a   : > { %v2579_v54 = vsel %vm2577_vm4, %v2564_v57, %v2572_v63  ;;  %v2583_v56 = vsel %vm2577_vm4, %v2572_v63, %v2564_v57  ;;  %v2570_v52 = vpop.permute.xlu1 %2569  ;;  %v867_v63 = vld [vmem:[%s6405_s19 + $0xe] sm:$0x3] }
 0xc2b   : > { %v5725_v60 = vmul.f32 %v5709_v15, %v2579_v54  ;;  %v5728_v61 = vmul.f32 %v5712_v50, %v2583_v56  ;;  %v2578_v62 = vsel %vm2577_vm4, %v2562_v48, %v2570_v52  ;;  %v2582_v33 = vsel %vm2577_vm4, %v2570_v52, %v2562_v48  ;;  %2775 = vperm.xlu0 %4336, %v837_v39   ;;  %v843_v39 = vld [vmem:[%s6404_s18 + $0x50] sm:$0xff]  ;;  %v842_v54 = vld [vmem:[%s6404_s18 + $0x48] sm:$0xff] }
 0xc2c   : > { %v5735_v59 = vmul.f32 %v5709_v15, %v2578_v62  ;;  %v5738_v21 = vmul.f32 %v5712_v50, %v2582_v33  ;;  %2770 = vperm.xlu1 %4335, %v836_v46   ;;  %v5801_v33 = vrot.slane %v867_v63, %v5456_v36 }
 0xc2d   : > { %v2612_v26 = vpop.permute.xlu0 %2611 }
 0xc2e   : > { %v2610_v37 = vpop.permute.xlu1 %2609 }
 0xc2f   : > { %2785 = vperm.xlu0 %4336, %v839_v51   ;;  %v5804_v51 = vrot.slane %v867_v63, %v5608_v55 }
 0xc30   : > { %2780 = vperm.xlu1 %4335, %v838_v31   ;;  %v844_v31 = vld [vmem:[%s6404_s18 + $0x58] sm:$0xff] }
 0xc31   : > { %v2620_v4 = vpop.permute.xlu0 %2619 }
 0xc32   : > { %v2627_v10 = vsel %vm2625_vm5, %v2612_v26, %v2620_v4  ;;  %v2631_v19 = vsel %vm2625_vm5, %v2620_v4, %v2612_v26  ;;  %v2618_v25 = vpop.permute.xlu1 %2617 }
 0xc33   : > { %v5771_v29 = vmul.f32 %v5755_v5, %v2627_v10  ;;  %v5774_v32 = vmul.f32 %v5758_v12, %v2631_v19  ;;  %v2626_v47 = vsel %vm2625_vm5, %v2610_v37, %v2618_v25  ;;  %v2630_v57 = vsel %vm2625_vm5, %v2618_v25, %v2610_v37  ;;  %2795 = vperm.xlu0 %4336, %v841_v8  }
 0xc34   : > { %v5781_v35 = vmul.f32 %v5755_v5, %v2626_v47  ;;  %v5784_v48 = vmul.f32 %v5758_v12, %v2630_v57  ;;  %2790 = vperm.xlu1 %4335, %v840_v2  }
 0xc35   : > { %v2660_v46 = vpop.permute.xlu0 %2659 }
 0xc36   : > { %v2658_v52 = vpop.permute.xlu1 %2657 }
 0xc37   : > { %2805 = vperm.xlu0 %4336, %v843_v39   ;;  %v847_v39 = vld [vmem:[%s6404_s18 + $0x70] sm:$0xff] }
 0xc38   : > { %2800 = vperm.xlu1 %4335, %v842_v54  }
 0xc39   : > { %v2668_v26 = vpop.permute.xlu0 %2667 }
 0xc3a   : > { %v2675_v37 = vsel %vm2673_vm6, %v2660_v46, %v2668_v26  ;;  %v2679_v8 = vsel %vm2673_vm6, %v2668_v26, %v2660_v46  ;;  %v2666_v4 = vpop.permute.xlu1 %2665  ;;  %v846_v46 = vld [vmem:[%s6404_s18 + $0x68] sm:$0xff]  ;;  %v849_v26 = vld [vmem:[%s6404_s18 + $0x80] sm:$0xff] }
 0xc3b   : > { %v5817_v2 = vmul.f32 %v5801_v33, %v2675_v37  ;;  %v5820_v10 = vmul.f32 %v5804_v51, %v2679_v8  ;;  %v2674_v19 = vsel %vm2673_vm6, %v2658_v52, %v2666_v4  ;;  %v2678_v25 = vsel %vm2673_vm6, %v2666_v4, %v2658_v52  ;;  %2815 = vperm.xlu0 %4336, %v845_v20   ;;  %v848_v8 = vld [vmem:[%s6404_s18 + $0x78] sm:$0xff] }
 0xc3c   : > { %v5827_v47 = vmul.f32 %v5801_v33, %v2674_v19  ;;  %v5830_v57 = vmul.f32 %v5804_v51, %v2678_v25  ;;  %2810 = vperm.xlu1 %4335, %v844_v31   ;;  %v861_v31 = vld [vmem:[%s6405_s19 + $0x2] sm:$0x3] }
 0xc3d   : > { %6459 = vst [vmem:[#allocation13_spill] sm:$0xff] %v5817_v2  ;;  %v5835_v63 = vpop.permute.xlu0 %2707  ;;  %v2427_v19 = vrot.slane %v861_v31, %v5608_v55  ;;  %v2423_v25 = vrot.slane %v861_v31, %v5456_v36  ;;  %v2416_v31 = vsel %vm2410_vm7, %v5651_v11, %v5640_v14 }
 0xc3e   : > { %6460 = vst [vmem:[#allocation14_spill] sm:$0xff] %v5827_v47  ;;  %6461 = vst [vmem:[#allocation15_spill] sm:$0xff] %v5830_v57  ;;  %v5842_v52 = vpop.permute.xlu1 %2705 }
 0xc3f   : > { %2825 = vperm.xlu0 %4336, %v847_v39   ;;  %v2412_v39 = vsel %vm2410_vm7, %v5640_v14, %v5651_v11  ;;  %v2432_v47 = vmul.f32 %v2423_v25, %v2416_v31 }
 0xc40   : > { %2820 = vperm.xlu1 %4335, %v846_v46   ;;  %v2411_v46 = vsel %vm2410_vm7, %v5642_v34, %v5656_v6  ;;  %v2433_v11 = vmul.f32 %v2427_v19, %v2412_v39  ;;  %v2459_v39 = vsel %vm2458_vm8, %v5666_v0, %v5676_v23 }
 0xc41   : > { %v2351_v37 = vpop.permute.xlu0 %2350  ;;  %v2431_v17 = vmul.f32 %v2427_v19, %v2411_v46 }
 0xc42   : > { %v2349_v4 = vpop.permute.xlu1 %2348 }
 0xc43   : > { %2835 = vperm.xlu0 %4336, %v849_v26   ;;  %v850_v26 = vld [vmem:[%s6404_s18 + $0x88] sm:$0xff] }
 0xc44   : > { %2830 = vperm.xlu1 %4335, %v848_v8   ;;  %v2415_v8 = vsel %vm2410_vm7, %v5656_v6, %v5642_v34 }
 0xc45   : > { %v2359_v24 = vpop.permute.xlu0 %2358 }
 0xc46   : > { %v2366_v54 = vsel %vm2362_vm3, %v2351_v37, %v2359_v24  ;;  %v2370_v20 = vsel %vm2362_vm3, %v2359_v24, %v2351_v37  ;;  %v2357_v56 = vpop.permute.xlu1 %2356  ;;  %v2430_v24 = vmul.f32 %v2423_v25, %v2415_v8 }
 0xc47   : > { %v2388_v62 = vmul.f32 %v5617_v43, %v2370_v20  ;;  %v2389_v30 = vmul.f32 %v5620_v58, %v2366_v54  ;;  %v2365_v7 = vsel %vm2362_vm3, %v2349_v4, %v2357_v56  ;;  %v2369_v14 = vsel %vm2362_vm3, %v2357_v56, %v2349_v4  ;;  %v862_v20 = vld [vmem:[%s6405_s19 + $0x4] sm:$0x3] }
 0xc48   : > { %v2386_v34 = vmul.f32 %v5617_v43, %v2369_v14  ;;  %v2387_v6 = vmul.f32 %v5620_v58, %v2365_v7  ;;  %2840 = vperm.xlu1 %4335, %v850_v26   ;;  %v2475_v56 = vrot.slane %v862_v20, %v5608_v55  ;;  %v2439_v4 = vpack.c.bf16 %v2433_v11, %v2431_v17 }
 0xc49   : > { %v2401_v54 = vpop.permute.xlu0 %2400  ;;  %v2438_v43 = vpack.c.bf16 %v2432_v47, %v2430_v24  ;;  %v2471_v58 = vrot.slane %v862_v20, %v5456_v36  ;;  %v2460_v7 = vsel %vm2458_vm8, %v5661_v3, %v5671_v41  ;;  %v2464_v17 = vsel %vm2458_vm8, %v5671_v41, %v5661_v3 }
 0xc4a   : > { %v2392_v37 = vpack.c.bf16 %v2388_v62, %v2386_v34  ;;  %v2399_v2 = vpop.permute.xlu1 %2398  ;;  %v2393_v57 = vpack.c.bf16 %v2389_v30, %v2387_v6  ;;  %v2463_v30 = vsel %vm2458_vm8, %v5676_v23, %v5666_v0  ;;  %v2481_v41 = vmul.f32 %v2475_v56, %v2460_v7  ;;  %v863_v6 = vld [vmem:[%s6405_s19 + $0x6] sm:$0x3] }
 0xc4b   : > { %v2479_v14 = vmul.f32 %v2475_v56, %v2459_v39  ;;  %v2480_v23 = vmul.f32 %v2471_v58, %v2464_v17  ;;  %v2478_v34 = vmul.f32 %v2471_v58, %v2463_v30  ;;  %v2511_v17 = vsel %vm2506_vm9, %v5696_v44, %v5686_v16 }
 0xc4c   : > { %3137 = vmatprep.subr.bf16.mxu0 %v2393_v57 }
 0xc4d   : > { %v2409_v62 = vpop.permute.xlu0 %2408  ;;  %3138 = vmatpush1.bf16.msra.mxu0 %v2392_v37  ;;  %v2486_v7 = vpack.c.bf16 %v2480_v23, %v2478_v34 }
 0xc4e   : > { %v2414_v47 = vsel %vm2410_vm7, %v2401_v54, %v2409_v62  ;;  %v2418_v57 = vsel %vm2410_vm7, %v2409_v62, %v2401_v54  ;;  %3139 = vmatprep.subr.bf16.mxu0 %v2439_v4  ;;  %v2407_v46 = vpop.permute.xlu1 %2406  ;;  %v2523_v4 = vrot.slane %v863_v6, %v5608_v55  ;;  %v2512_v62 = vsel %vm2506_vm9, %v5691_v28, %v5681_v18 }
 0xc4f   : > { %v2436_v26 = vmul.f32 %v2423_v25, %v2418_v57  ;;  %v2437_v31 = vmul.f32 %v2427_v19, %v2414_v47  ;;  %v2413_v8 = vsel %vm2410_vm7, %v2399_v2, %v2407_v46  ;;  %v2417_v3 = vsel %vm2410_vm7, %v2407_v46, %v2399_v2 }
 0xc50   : > { %v2434_v11 = vmul.f32 %v2423_v25, %v2417_v3  ;;  %v2435_v0 = vmul.f32 %v2427_v19, %v2413_v8  ;;  %v2487_v2 = vpack.c.bf16 %v2481_v41, %v2479_v14  ;;  %v2519_v19 = vrot.slane %v863_v6, %v5456_v36 }
 0xc51   : > { %v2449_v24 = vpop.permute.xlu0 %2448  ;;  %3140 = vmatpush1.bf16.msra.mxu0 %v2438_v43  ;;  %v2508_v25 = vsel %vm2506_vm9, %v5681_v18, %v5691_v28  ;;  %v2507_v43 = vsel %vm2506_vm9, %v5686_v16, %v5696_v44  ;;  %v2546_v6 = vrot.slane %v5463_v1, %v5608_v55 }
 0xc52   : > { %v2440_v20 = vpack.c.bf16 %v2436_v26, %v2434_v11  ;;  %v2447_v54 = vpop.permute.xlu1 %2446  ;;  %v2441_v37 = vpack.c.bf16 %v2437_v31, %v2435_v0  ;;  %v2529_v28 = vmul.f32 %v2523_v4, %v2508_v25  ;;  %v2527_v8 = vmul.f32 %v2523_v4, %v2507_v43 }
 0xc53   : > { %v2528_v41 = vmul.f32 %v2519_v19, %v2512_v62  ;;  %v2526_v14 = vmul.f32 %v2519_v19, %v2511_v17  ;;  %v2552_v62 = vmul.f32 %v2546_v6, %v5477_v22  ;;  %v2553_v22 = vmul.f32 %v5467_v40, %v5539_v42 }
 0xc54   : > { %3141 = vmatprep.subr.bf16.mxu0 %v2441_v37  ;;  %v2535_v34 = vpack.c.bf16 %v2529_v28, %v2527_v8  ;;  %v6462_v8 = vpack.c.bf16 %v5471_v38, %v5475_v9 }
 0xc55   : > { %v2457_v39 = vpop.permute.xlu0 %2456  ;;  %3142 = vmatpush1.bf16.msra.mxu0 %v2440_v20  ;;  %v2534_v20 = vpack.c.bf16 %v2528_v41, %v2526_v14 }
 0xc56   : > { %v2462_v30 = vsel %vm2458_vm8, %v2449_v24, %v2457_v39  ;;  %v2466_v47 = vsel %vm2458_vm8, %v2457_v39, %v2449_v24  ;;  %3143 = vmatprep.subr.bf16.mxu0 %v2487_v2  ;;  %v2455_v57 = vpop.permute.xlu1 %2454  ;;  %v2550_v39 = vmul.f32 %v2546_v6, %v5479_v13  ;;  %v2555_v13 = vmul.f32 %v5467_v40, %v5536_v45 }
 0xc57   : > { %v2484_v46 = vmul.f32 %v2471_v58, %v2466_v47  ;;  %v2485_v26 = vmul.f32 %v2475_v56, %v2462_v30  ;;  %v2461_v31 = vsel %vm2458_vm8, %v2447_v54, %v2455_v57  ;;  %v2465_v18 = vsel %vm2458_vm8, %v2455_v57, %v2447_v54 }
 0xc58   : > { %v2482_v3 = vmul.f32 %v2471_v58, %v2465_v18  ;;  %v2483_v16 = vmul.f32 %v2475_v56, %v2461_v31 }
 0xc59   : > { %v2497_v44 = vpop.permute.xlu0 %2496  ;;  %3144 = vmatpush1.bf16.msra.mxu0 %v2486_v7 }
 0xc5a   : > { %v2488_v11 = vpack.c.bf16 %v2484_v46, %v2482_v3  ;;  %v2495_v0 = vpop.permute.xlu1 %2494  ;;  %v2489_v23 = vpack.c.bf16 %v2485_v26, %v2483_v16  ;;  %v2558_v46 = vpack.c.bf16 %v2552_v62, %v2550_v39  ;;  %v2556_v26 = vmul.f32 %v2546_v6, %v5545_v53  ;;  %v868_v53 = vld [vmem:[%s6405_s19 + $0x10] sm:$0x3] }
 0xc5b   : > { %v2559_v16 = vpack.c.bf16 %v2555_v13, %v2553_v22  ;;  %v5982_v9 = vrot.slane %v868_v53, %v5456_v36  ;;  %v5987_v41 = vrot.slane %v868_v53, %v5608_v55  ;;  %v6463_v36 = vpack.c.bf16 %v5728_v61, %v5738_v21 }
 0xc5c   : > { %3145 = vmatprep.subr.bf16.mxu0 %v2489_v23  ;;  %v6465_v39 = vpack.c.bf16 %v5774_v32, %v5784_v48 }
 0xc5d   : > { %v2505_v24 = vpop.permute.xlu0 %2504  ;;  %3146 = vmatpush1.bf16.msra.mxu0 %v2488_v11 }
 0xc5e   : > { %v2510_v54 = vsel %vm2506_vm9, %v2497_v44, %v2505_v24  ;;  %v2514_v56 = vsel %vm2506_vm9, %v2505_v24, %v2497_v44  ;;  %3147 = vmatprep.subr.bf16.mxu0 %v2535_v34  ;;  %v2503_v58 = vpop.permute.xlu1 %2502 }
 0xc5f   : > { %v2532_v37 = vmul.f32 %v2519_v19, %v2514_v56  ;;  %v2533_v2 = vmul.f32 %v2523_v4, %v2510_v54  ;;  %v2509_v7 = vsel %vm2506_vm9, %v2495_v0, %v2503_v58  ;;  %v2513_v25 = vsel %vm2506_vm9, %v2503_v58, %v2495_v0 }
 0xc60   : > { %v2530_v1 = vmul.f32 %v2519_v19, %v2513_v25  ;;  %v2531_v43 = vmul.f32 %v2523_v4, %v2509_v7  ;;  %v2554_v19 = vmul.f32 %v2546_v6, %v5547_v27 }
 0xc61   : > { %v2568_v17 = vpop.permute.xlu0 %2567  ;;  %3148 = vmatpush1.bf16.msra.mxu0 %v2534_v20 }
 0xc62   : > { %v2536_v30 = vpack.c.bf16 %v2532_v37, %v2530_v1  ;;  %v2714_v47 = vpop.permute.xlu1 %2713  ;;  %v2537_v57 = vpack.c.bf16 %v2533_v2, %v2531_v43  ;;  %v2560_v4 = vpack.c.bf16 %v2556_v26, %v2554_v19 }
 0xc63   : > { %v2722_v14 = vsel %vm2721_vm10, %v5842_v52, %v2714_v47  ;;  %v2726_v34 = vsel %vm2721_vm10, %v2714_v47, %v5842_v52 }
 0xc64   : > { %3149 = vmatprep.subr.bf16.mxu0 %v2537_v57  ;;  %v2741_v24 = vmul.f32 %v5982_v9, %v2722_v14  ;;  %v2742_v54 = vmul.f32 %v5987_v41, %v2726_v34 }
 0xc65   : > { %v2576_v31 = vpop.permute.xlu0 %2575  ;;  %3150 = vmatpush1.bf16.msra.mxu0 %v2536_v30 }
 0xc66   : > { %3151 = vmatprep.subr.bf16.mxu0 %v2558_v46  ;;  %v2566_v18 = vpop.permute.xlu1 %2565  ;;  %v2585_v45 = vsel %vm2577_vm4, %v2576_v31, %v2568_v17  ;;  %v2581_v27 = vsel %vm2577_vm4, %v2568_v17, %v2576_v31  ;;  %v6466_v46 = vpack.c.bf16 %v5771_v29, %v5781_v35 }
 0xc67   : > { %v2604_v11 = vmul.f32 %v5712_v50, %v2585_v45  ;;  %v2603_v55 = vmul.f32 %v5709_v15, %v2581_v27 }
 0xc69   : > { %v2616_v28 = vpop.permute.xlu0 %2615  ;;  %3152 = vmatpush1.bf16.msra.mxu0 %v6462_v8 }
 0xc6a   : > { %3153 = vmatprep.subr.bf16.mxu0 %v2560_v4  ;;  %v2574_v3 = vpop.permute.xlu1 %2573  ;;  %v6467_v4 = vld [vmem:[#allocation15_spill] sm:$0xff] }
 0xc6b   : > { %v2580_v40 = vsel %vm2577_vm4, %v2566_v18, %v2574_v3  ;;  %v2584_v42 = vsel %vm2577_vm4, %v2574_v3, %v2566_v18  ;;  %v6468_v22 = vpack.c.bf16 %v5820_v10, %v6467_v4  ;;  %v6469_v3 = vld [vmem:[#allocation13_spill] sm:$0xff] }
 0xc6c   : > { %v2602_v38 = vmul.f32 %v5712_v50, %v2584_v42  ;;  %v2601_v0 = vmul.f32 %v5709_v15, %v2580_v40  ;;  %v6464_v50 = vpack.c.bf16 %v5725_v60, %v5735_v59 }
 0xc6d   : > { %v2624_v44 = vpop.permute.xlu0 %2623  ;;  %3154 = vmatpush1.bf16.msra.mxu0 %v2559_v16  ;;  %v6470_v16 = vld [vmem:[#allocation14_spill] sm:$0xff] }
 0xc6e   : > { %3155 = vmatprep.subr.bf16.mxu0 %v6463_v36  ;;  %v2614_v23 = vpop.permute.xlu1 %2613  ;;  %v2608_v6 = vpack.c.bf16 %v2604_v11, %v2602_v38  ;;  %v2607_v56 = vpack.c.bf16 %v2603_v55, %v2601_v0  ;;  %v2633_v52 = vsel %vm2625_vm5, %v2624_v44, %v2616_v28  ;;  %v2629_v1 = vsel %vm2625_vm5, %v2616_v28, %v2624_v44  ;;  %v4349_v0 = vld [vmem:[%s6403_s17] ss:$12 sps:$4 sm:$0xff]   ;;  %v4353_v36 = vld [vmem:[%s6403_s17 + $0x1c] ss:$12 sps:$4 sm:$0xff]  }
 0xc6f   : > { %v2652_v43 = vmul.f32 %v5758_v12, %v2633_v52  ;;  %v2651_v47 = vmul.f32 %v5755_v5, %v2629_v1  ;;  %v6471_v45 = vpack.c.bf16 %v6469_v3, %v6470_v16  ;;  %v4357_v55 = vld [vmem:[%s6403_s17 + $0x34] ss:$12 sps:$4 sm:$0xff]   ;;  %v4380_v1 = vld [vmem:[%s6403_s17 + $0xb0] ss:$12 sps:$4 sm:$0xff]  }
 0xc70   : > { %v4368_v52 = vld [vmem:[%s6403_s17 + $0x68] ss:$12 sps:$4 sm:$0xff]  }
 0xc71   : > { %v2716_v20 = vpop.permute.xlu0 %2715  ;;  %3156 = vmatpush1.bf16.msra.mxu0 %v6464_v50  ;;  %v4360_v50 = vld [vmem:[%s6403_s17 + $0x38] ss:$12 sps:$4 sm:$0xff]  }
 0xc72   : > { %v2723_v61 = vsel %vm2721_vm10, %v5835_v63, %v2716_v20  ;;  %v2727_v21 = vsel %vm2721_vm10, %v2716_v20, %v5835_v63  ;;  %3157 = vmatprep.subr.bf16.mxu0 %v2608_v6  ;;  %v2622_v15 = vpop.permute.xlu1 %2621  ;;  %v4356_v6 = vld [vmem:[%s6403_s17 + $0x20] ss:$12 sps:$4 sm:$0xff]  }
 0xc73   : > { %v2743_v58 = vmul.f32 %v5982_v9, %v2723_v61  ;;  %v2744_v60 = vmul.f32 %v5987_v41, %v2727_v21  ;;  %v2632_v59 = vsel %vm2625_vm5, %v2622_v15, %v2614_v23  ;;  %v2628_v37 = vsel %vm2625_vm5, %v2614_v23, %v2622_v15  ;;  %v4361_v20 = vld [vmem:[%s6403_s17 + $0x4c] ss:$12 sps:$4 sm:$0xff]   ;;  %v4364_v61 = vld [vmem:[%s6403_s17 + $0x50] ss:$12 sps:$4 sm:$0xff]  }
 0xc74   : > { %v2650_v2 = vmul.f32 %v5758_v12, %v2632_v59  ;;  %v2649_v17 = vmul.f32 %v5755_v5, %v2628_v37  ;;  %v4367_v21 = vld [vmem:[%s6403_s17 + $0x60] ss:$12 sps:$4 sm:$0xff]   ;;  %v4369_v15 = vld [vmem:[%s6403_s17 + $0x7c] ss:$12 sps:$4 sm:$0xff]  }
 0xc75   : > { %v2749_v7 = vpack.c.bf16 %v2743_v58, %v2741_v24  ;;  %v2664_v25 = vpop.permute.xlu0 %2663  ;;  %3158 = vmatpush1.bf16.msra.mxu0 %v2607_v56  ;;  %v2750_v63 = vpack.c.bf16 %v2744_v60, %v2742_v54  ;;  %v4359_v24 = vld [vmem:[%s6403_s17 + $0x30] ss:$12 sps:$4 sm:$0xff]   ;;  %v4363_v54 = vld [vmem:[%s6403_s17 + $0x48] ss:$12 sps:$4 sm:$0xff]   ;;  %v4371_v58 = vld [vmem:[%s6403_s17 + $0x78] ss:$12 sps:$4 sm:$0xff]  }
 0xc76   : > { %3159 = vmatprep.subr.bf16.mxu0 %v6465_v39  ;;  %v2662_v62 = vpop.permute.xlu1 %2661  ;;  %v2656_v30 = vpack.c.bf16 %v2652_v43, %v2650_v2  ;;  %v2655_v32 = vpack.c.bf16 %v2651_v47, %v2649_v17  ;;  %v4365_v56 = vld [vmem:[%s6403_s17 + $0x64] ss:$12 sps:$4 sm:$0xff]   ;;  %v4373_v60 = vld [vmem:[%s6403_s17 + $0x94] ss:$12 sps:$4 sm:$0xff]   ;;  %v4377_v2 = vld [vmem:[%s6403_s17 + $0xac] ss:$12 sps:$4 sm:$0xff]  }
 0xc77   : > { %3306 = vmatprep.subr.bf16.mxu1 %v2750_v63  ;;  %v4372_v59 = vld [vmem:[%s6403_s17 + $0x80] ss:$12 sps:$4 sm:$0xff]   ;;  %v4375_v37 = vld [vmem:[%s6403_s17 + $0x90] ss:$12 sps:$4 sm:$0xff]   ;;  %v4387_v17 = vld [vmem:[%s6403_s17 + $0xd8] ss:$12 sps:$4 sm:$0xff]  }
 0xc78   : > { %3307 = vmatpush1.bf16.msra.mxu1 %v2749_v7  ;;  %v4376_v7 = vld [vmem:[%s6403_s17 + $0x98] ss:$12 sps:$4 sm:$0xff]   ;;  %v4383_v43 = vld [vmem:[%s6403_s17 + $0xc0] ss:$12 sps:$4 sm:$0xff]   ;;  %v4385_v39 = vld [vmem:[%s6403_s17 + $0xdc] ss:$12 sps:$4 sm:$0xff]  }
 0xc79   : > { %v2672_v57 = vpop.permute.xlu0 %2671  ;;  %3160 = vmatpush1.bf16.msra.mxu0 %v6466_v46  ;;  %v4381_v63 = vld [vmem:[%s6403_s17 + $0xc4] ss:$12 sps:$4 sm:$0xff]   ;;  %v4388_v47 = vld [vmem:[%s6403_s17 + $0xe0] ss:$12 sps:$4 sm:$0xff]  }
 0xc7a   : > { %v2681_v12 = vsel %vm2673_vm6, %v2672_v57, %v2664_v25  ;;  %3161 = vmatprep.subr.bf16.mxu0 %v2656_v30  ;;  %v2670_v26 = vpop.permute.xlu1 %2669  ;;  %v2677_v48 = vsel %vm2673_vm6, %v2664_v25, %v2672_v57  ;;  %v4379_v25 = vld [vmem:[%s6403_s17 + $0xa8] ss:$12 sps:$4 sm:$0xff]   ;;  %v4391_v57 = vld [vmem:[%s6403_s17 + $0xf0] ss:$12 sps:$4 sm:$0xff]   ;;  %v4393_v46 = vld [vmem:[%s6403_s17 + $0x10c] ss:$12 sps:$4 sm:$0xff]  }
 0xc7b   : > { %v2676_v31 = vsel %vm2673_vm6, %v2662_v62, %v2670_v26  ;;  %v2680_v5 = vsel %vm2673_vm6, %v2670_v26, %v2662_v62  ;;  %v2700_v18 = vmul.f32 %v5804_v51, %v2681_v12  ;;  %v2699_v19 = vmul.f32 %v5801_v33, %v2677_v48  ;;  %v4384_v62 = vld [vmem:[%s6403_s17 + $0xc8] ss:$12 sps:$4 sm:$0xff]   ;;  %v4392_v12 = vld [vmem:[%s6403_s17 + $0xf8] ss:$12 sps:$4 sm:$0xff]   ;;  %v4396_v48 = vld [vmem:[%s6403_s17 + $0x110] ss:$12 sps:$4 sm:$0xff]  }
 0xc7c   : > { %v2698_v29 = vmul.f32 %v5804_v51, %v2680_v5  ;;  %v2697_v13 = vmul.f32 %v5801_v33, %v2676_v31  ;;  %v4389_v30 = vld [vmem:[%s6403_s17 + $0xf4] ss:$12 sps:$4 sm:$0xff]   ;;  %v831_v31 = vld [vmem:[%s6403_s17 + $0x138] sm:$0xff] }
 0xc7d   : > { %v2712_v35 = vpop.permute.xlu0 %2711  ;;  %3162 = vmatpush1.bf16.msra.mxu0 %v2655_v32  ;;  %v4395_v26 = vld [vmem:[%s6403_s17 + $0x108] ss:$12 sps:$4 sm:$0xff]   ;;  %v4397_v32 = vld [vmem:[%s6403_s17 + $0x124] ss:$12 sps:$4 sm:$0xff]   ;;  %v4399_v5 = vld [vmem:[%s6403_s17 + $0x120] ss:$12 sps:$4 sm:$0xff]  }
 0xc7e   : > { %3163 = vmatprep.subr.bf16.mxu0 %v6468_v22  ;;  %v2710_v28 = vpop.permute.xlu1 %2709  ;;  %v2704_v8 = vpack.c.bf16 %v2700_v18, %v2698_v29  ;;  %v2703_v40 = vpack.c.bf16 %v2699_v19, %v2697_v13  ;;  %v3901_v18 = vcombine.high %v831_v31, %v831_v31  ;;  %v4400_v29 = vld [vmem:[%s6403_s17 + $0x128] ss:$12 sps:$4 sm:$0xff]   ;;  %v4403_v19 = vld [vmem:[%s6403_s17 + $0x140] ss:$0 sps:$4 sm:$0xff]  }
 0xc81   : > { %v2720_v53 = vpop.permute.xlu0 %2719  ;;  %3164 = vmatpush1.bf16.msra.mxu0 %v6471_v45 }
 0xc82   : > { %v2725_v51 = vsel %vm2721_vm10, %v2712_v35, %v2720_v53  ;;  %v2729_v42 = vsel %vm2721_vm10, %v2720_v53, %v2712_v35  ;;  %3165 = vmatprep.subr.bf16.mxu0 %v2704_v8  ;;  %v2718_v33 = vpop.permute.xlu1 %2717  ;;  %v3900_v35 = vcombine.low %v831_v31, %v831_v31 }
 0xc83   : > { %v2747_v38 = vmul.f32 %v5982_v9, %v2725_v51  ;;  %v2748_v10 = vmul.f32 %v5987_v41, %v2729_v42  ;;  %v2724_v27 = vsel %vm2721_vm10, %v2710_v28, %v2718_v33  ;;  %v2728_v44 = vsel %vm2721_vm10, %v2718_v33, %v2710_v28 }
 0xc84   : > { %v2745_v14 = vmul.f32 %v5982_v9, %v2724_v27  ;;  %v2746_v11 = vmul.f32 %v5987_v41, %v2728_v44  ;;  %v4355_v9 = vld [vmem:[%s6403_s17 + $0x18] ss:$12 sps:$4 sm:$0xff]   ;;  %v6472_v41 = vmov 0  }
 0xc85   : > { %3166 = vmatpush1.bf16.msra.mxu0 %v2703_v40 }
 0xc86   : > { %v2751_v23 = vpack.c.bf16 %v2747_v38, %v2745_v14  ;;  %v2752_v34 = vpack.c.bf16 %v2748_v10, %v2746_v11 }
 0xc88   : > { %3168 = vmatmul.mubr.bf16.vlgmr.msra.gmra.mrb[12].mxu0 %v4349_v0  ;;  %3308 = vmatprep.subr.bf16.mxu1 %v2752_v34 }
 0xc89   : > { %3309 = vmatpush1.bf16.msra.mxu1 %v2751_v23  ;;  %3177 = vmatprep.mubr.bf16.mxu0 %v4353_v36 }
 0xc8c   : > { %3903 = vmatmul.mubr.msk.bf16.vlgmr.msra.gmra.mrb[28].mxu1 %vm1631_vm2, %v4352_v49 }
 0xc8d   : > { %3348 = vmatprep.mubr.bf16.mxu1 %v6472_v41 }
 0xc90   : > { %3178 = vmatmul.mubr.bf16.gmra.mrb[16].mxu0 %v4355_v9 }
 0xc91   : > { %3187 = vmatprep.mubr.bf16.mxu0 %v4357_v55 }
 0xc92   : > { %v2761_v4 = vpop.permute.xlu0 %2760 }
 0xc93   : > { %v2756_v13 = vpop.permute.xlu1 %2755 }
 0xc94   : > { %3904 = vmatmul.mubr.msk.bf16.gmra.mrb[32].mxu1 %vm1631_vm2, %v4356_v6 }
 0xc95   : > { %3358 = vmatprep.mubr.bf16.mxu1 %v6472_v41 }
 0xc96   : > { %v6209_v28 = vpop.permute.xlu0 %2845 }
 0xc97   : > { %v2766_v22 = vpop.permute.xlu1 %2765 }
 0xc98   : > { %3188 = vmatmul.mubr.bf16.gmra.mrb[20].mxu0 %v4359_v24 }
 0xc99   : > { %3197 = vmatprep.mubr.bf16.mxu0 %v4361_v20 }
 0xc9a   : > { %v6213_v53 = vpop.permute.xlu0 %2855 }
 0xc9b   : > { %v6211_v8 = vpop.permute.xlu1 %2850 }
 0xc9c   : > { %3905 = vmatmul.mubr.msk.bf16.gmra.mrb[36].mxu1 %vm1631_vm2, %v4360_v50 }
 0xc9d   : > { %3368 = vmatprep.mubr.bf16.mxu1 %v6472_v41 }
 0xc9e   : > { %v6217_v16 = vpop.permute.xlu0 %2865 }
 0xc9f   : > { %v6215_v3 = vpop.permute.xlu1 %2860 }
 0xca0   : > { %3198 = vmatmul.mubr.bf16.gmra.mrb[24].mxu0 %v4363_v54 }
 0xca1   : > { %3207 = vmatprep.mubr.bf16.mxu0 %v4365_v56 }
 0xca2   : > { %v6222_v44 = vpop.permute.xlu0 %2875 }
 0xca3   : > { %v6220_v45 = vpop.permute.xlu1 %2870 }
 0xca4   : > { %3906 = vmatmul.mubr.msk.bf16.gmra.mrb[40].mxu1 %vm1631_vm2, %v4364_v61 }
 0xca5   : > { %3378 = vmatprep.mubr.bf16.mxu1 %v6472_v41 }
 0xca6   : > { %v6232_v50 = vpop.permute.xlu0 %2885 }
 0xca7   : > { %v6224_v36 = vpop.permute.xlu1 %2880 }
 0xca8   : > { %3208 = vmatmul.mubr.bf16.gmra.mrb[28].mxu0 %v4367_v21 }
 0xca9   : > { %3217 = vmatprep.mubr.bf16.mxu0 %v4369_v15 }
 0xcab   : > { %v2771_v61 = vpop.permute.xlu1 %2770 }
 0xcac   : > { %3907 = vmatmul.mubr.msk.bf16.gmra.mrb[44].mxu1 %vm1631_vm2, %v4368_v52 }
 0xcad   : > { %3388 = vmatprep.mubr.bf16.mxu1 %v6472_v41 }
 0xcb0   : > { %3218 = vmatmul.mubr.bf16.gmra.mrb[32].mxu0 %v4371_v58 }
 0xcb1   : > { %3227 = vmatprep.mubr.bf16.mxu0 %v4373_v60 }
 0xcb4   : > { %3908 = vmatmul.mubr.msk.bf16.gmra.mrb[48].mxu1 %vm1631_vm2, %v4372_v59 }
 0xcb5   : > { %3398 = vmatprep.mubr.bf16.mxu1 %v6472_v41 }
 0xcb8   : > { %3228 = vmatmul.mubr.bf16.gmra.mrb[36].mxu0 %v4375_v37 }
 0xcb9   : > { %3237 = vmatprep.mubr.bf16.mxu0 %v4377_v2 }
 0xcbc   : > { %3909 = vmatmul.mubr.msk.bf16.gmra.mrb[52].mxu1 %vm1631_vm2, %v4376_v7 }
 0xcbd   : > { %3408 = vmatprep.mubr.bf16.mxu1 %v6472_v41 }
 0xcc0   : > { %3238 = vmatmul.mubr.bf16.gmra.mrb[40].mxu0 %v4379_v25 }
 0xcc1   : > { %3247 = vmatprep.mubr.bf16.mxu0 %v4381_v63 }
 0xcc4   : > { %3910 = vmatmul.mubr.msk.bf16.gmra.mrb[56].mxu1 %vm1631_vm2, %v4380_v1 }
 0xcc5   : > { %3418 = vmatprep.mubr.bf16.mxu1 %v6472_v41 }
 0xcc8   : > { %3248 = vmatmul.mubr.bf16.gmra.mrb[44].mxu0 %v4383_v43 }
 0xcc9   : > { %3257 = vmatprep.mubr.bf16.mxu0 %v4385_v39 }
 0xccc   : > { %3911 = vmatmul.mubr.msk.bf16.gmra.mrb[60].mxu1 %vm1631_vm2, %v4384_v62 }
 0xccd   : > { %3428 = vmatprep.mubr.bf16.mxu1 %v6472_v41 }
 0xcd0   : > { %3258 = vmatmul.mubr.bf16.gmra.mrb[48].mxu0 %v4387_v17 }
 0xcd1   : > { %3267 = vmatprep.mubr.bf16.mxu0 %v4389_v30 }
 0xcd4   : > { %3912 = vmatmul.mubr.msk.bf16.gmra.mrb[64].mxu1 %vm1631_vm2, %v4388_v47 }
 0xcd5   : > { %3438 = vmatprep.mubr.bf16.mxu1 %v6472_v41 }
 0xcd8   : > { %3268 = vmatmul.mubr.bf16.gmra.mrb[52].mxu0 %v4391_v57 }
 0xcd9   : > { %3277 = vmatprep.mubr.bf16.mxu0 %v4393_v46 }
 0xcdc   : > { %3913 = vmatmul.mubr.msk.bf16.gmra.mrb[68].mxu1 %vm1631_vm2, %v4392_v12 }
 0xcdd   : > { %3448 = vmatprep.mubr.bf16.mxu1 %v6472_v41 }
 0xce0   : > { %3278 = vmatmul.mubr.bf16.gmra.mrb[56].mxu0 %v4395_v26 }
 0xce1   : > { %3287 = vmatprep.mubr.bf16.mxu0 %v4397_v32 }
 0xce4   : > { %3914 = vmatmul.mubr.msk.bf16.gmra.mrb[72].mxu1 %vm1631_vm2, %v4396_v48 }
 0xce5   : > { %3458 = vmatprep.mubr.bf16.mxu1 %v6472_v41 }
 0xce8   : > { %3288 = vmatmul.mubr.bf16.gmra.mrb[60].mxu0 %v4399_v5 }
 0xce9   : > { %3297 = vmatprep.mubr.bf16.mxu0 %v3901_v18 }
 0xcec   : > { %3915 = vmatmul.mubr.msk.bf16.gmra.mrb[76].mxu1 %vm1631_vm2, %v4400_v29 }
 0xced   : > { %3468 = vmatprep.mubr.bf16.mxu1 %v6472_v41 }
 0xcf0   : > { %3298 = vmatmul.mubr.bf16.gmra.mrb[64].mxu0 %v3900_v35 }
 0xcf4   : > { %3916 = vmatmul.mubr.msk.bf16.gmra.mrb[80].mxu1 %vm1631_vm2, %v4403_v19 }
 0xd5b   : > { %v3169_v40 = vpop.f32.mrb[12].mxu0 }
 0xd5c   : > { %v3171_v51 = vpop.f32.mrb[13].mxu0  ;;  %v3170_v33 = vadd.f32 %v3169_v40, %v2756_v13 }
 0xd5d   : > { %v3173_v42 = vpop.f32.mrb[14].mxu0  ;;  %v3172_v10 = vadd.f32 %v3171_v51, %v2756_v13 }
 0xd5e   : > { %v3175_v38 = vpop.f32.mrb[15].mxu0  ;;  %v3174_v14 = vadd.f32 %v3173_v42, %v2761_v4 }
 0xd5f   : > { %v3340_v27 = vpop.f32.mrb[28].mxu1  ;;  %v3176_v23 = vadd.f32 %v3175_v38, %v2761_v4 }
 0xd60   : > { %v3341_v11 = vadd.f32 %v3340_v27, %v3170_v33  ;;  %v3342_v0 = vpop.f32.mrb[29].mxu1 }
 0xd61   : > { %v3343_v34 = vadd.f32 %v3342_v0, %v3172_v10  ;;  %v3344_v49 = vpop.f32.mrb[30].mxu1 }
 0xd62   : > { %3609 = vst [vmem:[%s6226_s2] sm:$0xff] %v3341_v11  ;;  %v3345_v9 = vadd.f32 %v3344_v49, %v3174_v14  ;;  %v3346_v41 = vpop.f32.mrb[31].mxu1 }
 0xd63   : > { %3610 = vst [vmem:[%s6226_s2 + $0x8] sm:$0xff] %v3343_v34  ;;  %v3347_v55 = vadd.f32 %v3346_v41, %v3176_v23  ;;  %v3179_v6 = vpop.f32.mrb[16].mxu0 }
 0xd64   : > { %3611 = vst [vmem:[%s6226_s2 + $0x10] sm:$0xff] %v3345_v9  ;;  %v3181_v24 = vpop.f32.mrb[17].mxu0  ;;  %v3180_v54 = vadd.f32 %v3179_v6, %v2766_v22 }
 0xd65   : > { %3612 = vst [vmem:[%s6226_s2 + $0x18] sm:$0xff] %v3347_v55  ;;  %v3183_v20 = vpop.f32.mrb[18].mxu0  ;;  %v3182_v21 = vadd.f32 %v3181_v24, %v2766_v22 }
 0xd66   : > { %v3185_v56 = vpop.f32.mrb[19].mxu0  ;;  %v3184_v52 = vadd.f32 %v3183_v20, %v2771_v61 }
 0xd67   : > { %v3350_v15 = vpop.f32.mrb[32].mxu1  ;;  %v3186_v59 = vadd.f32 %v3185_v56, %v2771_v61 }
 0xd68   : > { %v3351_v58 = vadd.f32 %v3350_v15, %v3180_v54  ;;  %v3352_v60 = vpop.f32.mrb[33].mxu1 }
 0xd69   : > { %v3353_v37 = vadd.f32 %v3352_v60, %v3182_v21  ;;  %v3354_v2 = vpop.f32.mrb[34].mxu1 }
 0xd6a   : > { %3613 = vst [vmem:[%s6226_s2 + $0x20] sm:$0xff] %v3351_v58  ;;  %v3355_v7 = vadd.f32 %v3354_v2, %v3184_v52  ;;  %v3356_v25 = vpop.f32.mrb[35].mxu1 }
 0xd6b   : > { %4553 = shalt.err (!%p4550_p3)
}
 0xd6c   : > { %s4554_s1 = scalar_lea.hbm %s6239_s0, 512  ;;  %s4558_s24 = scalar_lea.hbm %s6406_s20, 1024 }
 0xd6d   : > { %p4555_p4 = scmp.ne.s32.totalorder %s6239_s0, %s4554_s1  ;;  %p4559_p9 = scmp.lt.u32.totalorder %s6239_s0, %s6406_s20 }
 0xd6e   : > { %p4560_p10 = scmp.lt.u32.totalorder %s4558_s24, %s4554_s1  ;;  %p4562_p12 = scmp.lt.u32.totalorder %s4554_s1, %s6239_s0 }
 0xd6f   : > { %p4556_p7 = pnand %p4555_p4, %p4799_p5 }
 0xd70   : > { %p4561_p11 = por %p4560_p10, %p4559_p9 }
 0xd71   : > { %p4557_p8 = pneg %p4556_p7 }
 0xd72   : > { %p4563_p13 = por %p4562_p12, %p4561_p11 }
 0xd74   : > { %p4564_p0 = pnand %p4563_p13, %p4557_p8 }
 0xd76   : > { %4567 = shalt.err (!%p4564_p0)
}
 0xd77   : > { %s4647_s30 = smov 128   ;;  %s4648_s22 = smov 8   ;;  %3614 = vst [vmem:[%s6226_s2 + $0x28] sm:$0xff] %v3353_v37  ;;  %v3357_v63 = vadd.f32 %v3356_v25, %v3186_v59  ;;  %v3189_v1 = vpop.f32.mrb[20].mxu0  ;;  %3615 = vst [vmem:[%s6226_s2 + $0x30] sm:$0xff] %v3355_v7  ;;  %v2776_v39 = vpop.permute.xlu0 %2775 }
 0xd78   : > { %4250 = dma.vmem_to_hbm [thread:$0]  (%p4799_p5), %s6241_s21, 512, %s6239_s0, %s3664_s29, %s4647_s30, %s4647_s30, %s4648_s22   ;;  %v3191_v43 = vpop.f32.mrb[21].mxu0  ;;  %v3190_v17 = vadd.f32 %v3189_v1, %v2776_v39  ;;  %v2781_v47 = vpop.permute.xlu1 %2780 }
 0xd79   : > { %3616 = vst [vmem:[%s6226_s2 + $0x38] sm:$0xff] %v3357_v63  ;;  %v3193_v62 = vpop.f32.mrb[22].mxu0  ;;  %v3192_v57 = vadd.f32 %v3191_v43, %v2776_v39  ;;  %v3360_v46 = vpop.f32.mrb[36].mxu1  ;;  %s4249_s6 = smul.u32 6912, %s4782_s3  ;;  %s3698_s21 = sshll.u32 %s6226_s2, 4  ;;  %s6340_s21 = int_to_ptr.vmem [resolvable:$true] %s3698_s21 }
 0xd7a   : > { %v3195_v30 = vpop.f32.mrb[23].mxu0  ;;  %v3194_v12 = vadd.f32 %v3193_v62, %v2781_v47  ;;  %v3361_v26 = vadd.f32 %v3360_v46, %v3190_v17  ;;  %v3362_v32 = vpop.f32.mrb[37].mxu1  ;;  %s6473_s1 = sld [smem:[#allocation24_spill]]  ;;  %s3669_s4 = scalar_lea.sflag [#allocation5], %s5337_s7 }
 0xd7b   : > { %v3196_v48 = vadd.f32 %v3195_v30, %v2781_v47  ;;  %v3363_v31 = vadd.f32 %v3362_v32, %v3192_v57  ;;  %v3364_v5 = vpop.f32.mrb[38].mxu1  ;;  %v3199_v19 = vpop.f32.mrb[24].mxu0  ;;  %s4568_s24 = scalar_lea.vmem %s6340_s21, 6912  ;;  %s4649_s3 = smov [#allocation4]  }
 0xd7c   : > { %3617 = vst [vmem:[%s6226_s2 + $0x40] sm:$0xff] %v3361_v26  ;;  %v3365_v18 = vadd.f32 %v3364_v5, %v3194_v12  ;;  %v3366_v29 = vpop.f32.mrb[39].mxu1  ;;  %v3201_v13 = vpop.f32.mrb[25].mxu0  ;;  %p4569_p1 = scmp.ne.s32.totalorder %s6340_s21, %s4568_s24  ;;  %s4572_s26 = sshll.u32 %s4649_s3, 4  ;;  %s4573_s26 = int_to_ptr.vmem [resolvable:$false] %s4572_s26 }
 0xd7d   : > { %3618 = vst [vmem:[%s6226_s2 + $0x48] sm:$0xff] %v3363_v31  ;;  %v3367_v35 = vadd.f32 %v3366_v29, %v3196_v48  ;;  %v2786_v4 = vpop.permute.xlu0 %2785  ;;  %v3203_v22 = vpop.f32.mrb[26].mxu0  ;;  %s4574_s30 = scalar_lea.vmem %s4573_s26, 13824  ;;  %p4575_p4 = scmp.lt.s32.totalorder %s6340_s21, %s4573_s26 }
 0xd7e   : > { %3619 = vst [vmem:[%s6226_s2 + $0x50] sm:$0xff] %v3365_v18  ;;  %v3200_v40 = vadd.f32 %v3199_v19, %v2786_v4  ;;  %v3205_v51 = vpop.f32.mrb[27].mxu0  ;;  %v2791_v42 = vpop.permute.xlu1 %2790  ;;  %v3202_v33 = vadd.f32 %v3201_v13, %v2786_v4  ;;  %p4570_p2 = pnand %p4569_p1, %p4799_p5  ;;  %p4576_p7 = scmp.lt.s32.totalorder %s4574_s30, %s4568_s24 }
 0xd7f   : > { %3620 = vst [vmem:[%s6226_s2 + $0x58] sm:$0xff] %v3367_v35  ;;  %v3370_v38 = vpop.f32.mrb[40].mxu1  ;;  %v3204_v10 = vadd.f32 %v3203_v22, %v2791_v42  ;;  %v3206_v11 = vadd.f32 %v3205_v51, %v2791_v42  ;;  %v3209_v41 = vpop.f32.mrb[28].mxu0 }
 0xd80   : > { %v3371_v27 = vadd.f32 %v3370_v38, %v3200_v40  ;;  %v3372_v14 = vpop.f32.mrb[41].mxu1  ;;  %v3211_v55 = vpop.f32.mrb[29].mxu0  ;;  %s6338_s23 = scalar_lea.hbm %s6473_s1, %s4249_s6  ;;  %p4571_p3 = pneg %p4570_p2 }
 0xd81   : > { %v3373_v0 = vadd.f32 %v3372_v14, %v3202_v33  ;;  %v3374_v23 = vpop.f32.mrb[42].mxu1  ;;  %v2796_v6 = vpop.permute.xlu0 %2795  ;;  %p4577_p8 = por %p4576_p7, %p4575_p4 }
 0xd82   : > { %3621 = vst [vmem:[%s6226_s2 + $0x60] sm:$0xff] %v3371_v27  ;;  %v3375_v34 = vadd.f32 %v3374_v23, %v3204_v10  ;;  %v3376_v49 = vpop.f32.mrb[43].mxu1  ;;  %v3213_v24 = vpop.f32.mrb[30].mxu0  ;;  %v3210_v20 = vadd.f32 %v3209_v41, %v2796_v6  ;;  %v3212_v61 = vadd.f32 %v3211_v55, %v2796_v6 }
 0xd83   : > { %3622 = vst [vmem:[%s6226_s2 + $0x68] sm:$0xff] %v3373_v0  ;;  %v3377_v9 = vadd.f32 %v3376_v49, %v3206_v11  ;;  %v3215_v54 = vpop.f32.mrb[31].mxu0  ;;  %v2801_v56 = vpop.permute.xlu1 %2800  ;;  %p4578_p9 = pnand %p4577_p8, %p4571_p3 }
 0xd84   : > { %3623 = vst [vmem:[%s6226_s2 + $0x70] sm:$0xff] %v3375_v34  ;;  %v3380_v21 = vpop.f32.mrb[44].mxu1  ;;  %v3214_v15 = vadd.f32 %v3213_v24, %v2801_v56  ;;  %v3216_v60 = vadd.f32 %v3215_v54, %v2801_v56  ;;  %v3219_v63 = vpop.f32.mrb[32].mxu0 }
 0xd85   : > { %3624 = vst [vmem:[%s6226_s2 + $0x78] sm:$0xff] %v3377_v9  ;;  %v3381_v52 = vadd.f32 %v3380_v21, %v3210_v20  ;;  %v3382_v58 = vpop.f32.mrb[45].mxu1  ;;  %v3221_v1 = vpop.f32.mrb[33].mxu0 }
 0xd86   : > { %v3383_v59 = vadd.f32 %v3382_v58, %v3212_v61  ;;  %v3384_v37 = vpop.f32.mrb[46].mxu1  ;;  %v2806_v43 = vpop.permute.xlu0 %2805 }
 0xd87   : > { %3625 = vst [vmem:[%s6226_s2 + $0x80] sm:$0xff] %v3381_v52  ;;  %v3385_v2 = vadd.f32 %v3384_v37, %v3214_v15  ;;  %v3386_v7 = vpop.f32.mrb[47].mxu1  ;;  %v3223_v39 = vpop.f32.mrb[34].mxu0  ;;  %v3220_v62 = vadd.f32 %v3219_v63, %v2806_v43  ;;  %v3222_v47 = vadd.f32 %v3221_v1, %v2806_v43 }
 0xd88   : > { %3626 = vst [vmem:[%s6226_s2 + $0x88] sm:$0xff] %v3383_v59  ;;  %v3387_v25 = vadd.f32 %v3386_v7, %v3216_v60  ;;  %v3225_v17 = vpop.f32.mrb[35].mxu0  ;;  %v2811_v30 = vpop.permute.xlu1 %2810 }
 0xd89   : > { %3627 = vst [vmem:[%s6226_s2 + $0x90] sm:$0xff] %v3385_v2  ;;  %v3390_v57 = vpop.f32.mrb[48].mxu1  ;;  %v3224_v46 = vadd.f32 %v3223_v39, %v2811_v30  ;;  %v3226_v32 = vadd.f32 %v3225_v17, %v2811_v30 }
 0xd8a   : > { %3628 = vst [vmem:[%s6226_s2 + $0x98] sm:$0xff] %v3387_v25  ;;  %v3391_v12 = vadd.f32 %v3390_v57, %v3220_v62  ;;  %v3392_v26 = vpop.f32.mrb[49].mxu1  ;;  %v2816_v13 = vpop.permute.xlu0 %2815 }
 0xd8b   : > { %v3393_v48 = vadd.f32 %v3392_v26, %v3222_v47  ;;  %v3394_v31 = vpop.f32.mrb[50].mxu1  ;;  %v3229_v35 = vpop.f32.mrb[36].mxu0 }
 0xd8c   : > { %3629 = vst [vmem:[%s6226_s2 + $0xa0] sm:$0xff] %v3391_v12  ;;  %v3395_v5 = vadd.f32 %v3394_v31, %v3224_v46  ;;  %v3396_v18 = vpop.f32.mrb[51].mxu1  ;;  %v3231_v19 = vpop.f32.mrb[37].mxu0  ;;  %v3230_v22 = vadd.f32 %v3229_v35, %v2816_v13 }
 0xd8d   : > { %3630 = vst [vmem:[%s6226_s2 + $0xa8] sm:$0xff] %v3393_v48  ;;  %v3397_v29 = vadd.f32 %v3396_v18, %v3226_v32  ;;  %v3233_v4 = vpop.f32.mrb[38].mxu0  ;;  %v2821_v51 = vpop.permute.xlu1 %2820  ;;  %v3232_v42 = vadd.f32 %v3231_v19, %v2816_v13 }
 0xd8e   : > { %3631 = vst [vmem:[%s6226_s2 + $0xb0] sm:$0xff] %v3395_v5  ;;  %v3235_v40 = vpop.f32.mrb[39].mxu0  ;;  %v3234_v38 = vadd.f32 %v3233_v4, %v2821_v51  ;;  %v2826_v55 = vpop.permute.xlu0 %2825 }
 0xd8f   : > { %3632 = vst [vmem:[%s6226_s2 + $0xb8] sm:$0xff] %v3397_v29  ;;  %v3400_v33 = vpop.f32.mrb[52].mxu1  ;;  %v3236_v14 = vadd.f32 %v3235_v40, %v2821_v51 }
 0xd90   : > { %v3401_v10 = vadd.f32 %v3400_v33, %v3230_v22  ;;  %v3402_v27 = vpop.f32.mrb[53].mxu1 }
 0xd91   : > { %v3403_v11 = vadd.f32 %v3402_v27, %v3232_v42  ;;  %v3404_v0 = vpop.f32.mrb[54].mxu1  ;;  %v2831_v54 = vpop.permute.xlu1 %2830 }
 0xd92   : > { %3633 = vst [vmem:[%s6226_s2 + $0xc0] sm:$0xff] %v3401_v10  ;;  %v3405_v23 = vadd.f32 %v3404_v0, %v3234_v38  ;;  %v3406_v34 = vpop.f32.mrb[55].mxu1  ;;  %v2836_v1 = vpop.permute.xlu0 %2835 }
 0xd93   : > { %3634 = vst [vmem:[%s6226_s2 + $0xc8] sm:$0xff] %v3403_v11  ;;  %v3407_v49 = vadd.f32 %v3406_v34, %v3236_v14  ;;  %v3239_v9 = vpop.f32.mrb[40].mxu0 }
 0xd94   : > { %3635 = vst [vmem:[%s6226_s2 + $0xd0] sm:$0xff] %v3405_v23  ;;  %v3241_v41 = vpop.f32.mrb[41].mxu0  ;;  %v3240_v24 = vadd.f32 %v3239_v9, %v2826_v55 }
 0xd95   : > { %3636 = vst [vmem:[%s6226_s2 + $0xd8] sm:$0xff] %v3407_v49  ;;  %v3243_v6 = vpop.f32.mrb[42].mxu0  ;;  %v3242_v56 = vadd.f32 %v3241_v41, %v2826_v55  ;;  %v2841_v17 = vpop.permute.xlu1 %2840 }
 0xd96   : > { %v3245_v20 = vpop.f32.mrb[43].mxu0  ;;  %v3244_v21 = vadd.f32 %v3243_v6, %v2831_v54 }
 0xd97   : > { %v3410_v61 = vpop.f32.mrb[56].mxu1  ;;  %v3246_v58 = vadd.f32 %v3245_v20, %v2831_v54 }
 0xd98   : > { %v3411_v15 = vadd.f32 %v3410_v61, %v3240_v24  ;;  %v3412_v52 = vpop.f32.mrb[57].mxu1 }
 0xd99   : > { %v3413_v60 = vadd.f32 %v3412_v52, %v3242_v56  ;;  %v3414_v59 = vpop.f32.mrb[58].mxu1 }
 0xd9a   : > { %3637 = vst [vmem:[%s6226_s2 + $0xe0] sm:$0xff] %v3411_v15  ;;  %v3415_v37 = vadd.f32 %v3414_v59, %v3244_v21  ;;  %v3416_v2 = vpop.f32.mrb[59].mxu1 }
 0xd9b   : > { %3638 = vst [vmem:[%s6226_s2 + $0xe8] sm:$0xff] %v3413_v60  ;;  %v3417_v7 = vadd.f32 %v3416_v2, %v3246_v58  ;;  %v3249_v25 = vpop.f32.mrb[44].mxu0 }
 0xd9c   : > { %3639 = vst [vmem:[%s6226_s2 + $0xf0] sm:$0xff] %v3415_v37  ;;  %v3251_v63 = vpop.f32.mrb[45].mxu0  ;;  %v3250_v39 = vadd.f32 %v3249_v25, %v2836_v1 }
 0xd9d   : > { %3640 = vst [vmem:[%s6226_s2 + $0xf8] sm:$0xff] %v3417_v7  ;;  %v3253_v43 = vpop.f32.mrb[46].mxu0  ;;  %v3252_v30 = vadd.f32 %v3251_v63, %v2836_v1 }
 0xd9e   : > { %v3255_v62 = vpop.f32.mrb[47].mxu0  ;;  %v3254_v57 = vadd.f32 %v3253_v43, %v2841_v17 }
 0xd9f   : > { %v3420_v47 = vpop.f32.mrb[60].mxu1  ;;  %v3256_v26 = vadd.f32 %v3255_v62, %v2841_v17 }
 0xda0   : > { %v3421_v46 = vadd.f32 %v3420_v47, %v3250_v39  ;;  %v3422_v12 = vpop.f32.mrb[61].mxu1 }
 0xda1   : > { %v3423_v32 = vadd.f32 %v3422_v12, %v3252_v30  ;;  %v3424_v48 = vpop.f32.mrb[62].mxu1 }
 0xda2   : > { %3641 = vst [vmem:[%s6226_s2 + $0x100] sm:$0xff] %v3421_v46  ;;  %v3425_v31 = vadd.f32 %v3424_v48, %v3254_v57  ;;  %v3426_v5 = vpop.f32.mrb[63].mxu1 }
 0xda3   : > { %3642 = vst [vmem:[%s6226_s2 + $0x108] sm:$0xff] %v3423_v32  ;;  %v3427_v18 = vadd.f32 %v3426_v5, %v3256_v26  ;;  %v3259_v29 = vpop.f32.mrb[48].mxu0 }
 0xda4   : > { %3643 = vst [vmem:[%s6226_s2 + $0x110] sm:$0xff] %v3425_v31  ;;  %v3261_v35 = vpop.f32.mrb[49].mxu0  ;;  %v3260_v13 = vadd.f32 %v3259_v29, %v6209_v28 }
 0xda5   : > { %3644 = vst [vmem:[%s6226_s2 + $0x118] sm:$0xff] %v3427_v18  ;;  %v3263_v19 = vpop.f32.mrb[50].mxu0  ;;  %v3262_v22 = vadd.f32 %v3261_v35, %v6209_v28 }
 0xda6   : > { %v3265_v4 = vpop.f32.mrb[51].mxu0  ;;  %v3264_v51 = vadd.f32 %v3263_v19, %v6211_v8 }
 0xda7   : > { %v3430_v40 = vpop.f32.mrb[64].mxu1  ;;  %v3266_v38 = vadd.f32 %v3265_v4, %v6211_v8 }
 0xda8   : > { %v3431_v42 = vadd.f32 %v3430_v40, %v3260_v13  ;;  %v3432_v33 = vpop.f32.mrb[65].mxu1 }
 0xda9   : > { %v3433_v10 = vadd.f32 %v3432_v33, %v3262_v22  ;;  %v3434_v27 = vpop.f32.mrb[66].mxu1 }
 0xdaa   : > { %v3917_v14 = vmul.f32 -1.442695, %v3431_v42  ;;  %v3435_v11 = vadd.f32 %v3434_v27, %v3264_v51  ;;  %v3436_v0 = vpop.f32.mrb[67].mxu1 }
 0xdab   : > { %v3918_v23 = vmul.f32 -1.442695, %v3433_v10  ;;  %v3437_v34 = vadd.f32 %v3436_v0, %v3266_v38  ;;  %v3269_v49 = vpop.f32.mrb[52].mxu0 }
 0xdac   : > { %4468 = vpow2.f32 %v3917_v14  ;;  %v3919_v9 = vmul.f32 -1.442695, %v3435_v11  ;;  %v3271_v41 = vpop.f32.mrb[53].mxu0  ;;  %v3270_v6 = vadd.f32 %v3269_v49, %v6213_v53 }
 0xdad   : > { %4470 = vpow2.f32 %v3918_v23  ;;  %v3920_v28 = vmul.f32 -1.442695, %v3437_v34  ;;  %v3273_v55 = vpop.f32.mrb[54].mxu0  ;;  %v3272_v8 = vadd.f32 %v3271_v41, %v6213_v53 }
 0xdae   : > { %4472 = vpow2.f32 %v3919_v9  ;;  %v3275_v24 = vpop.f32.mrb[55].mxu0  ;;  %v3274_v54 = vadd.f32 %v3273_v55, %v6215_v3 }
 0xdaf   : > { %4474 = vpow2.f32 %v3920_v28  ;;  %v3440_v20 = vpop.f32.mrb[68].mxu1  ;;  %v3276_v21 = vadd.f32 %v3275_v24, %v6215_v3 }
 0xdb0   : > { %v3441_v56 = vadd.f32 %v3440_v20, %v3270_v6  ;;  %v3442_v61 = vpop.f32.mrb[69].mxu1 }
 0xdb1   : > { %v3443_v15 = vadd.f32 %v3442_v61, %v3272_v8  ;;  %v3444_v52 = vpop.f32.mrb[70].mxu1 }
 0xdb2   : > { %v3921_v58 = vmul.f32 -1.442695, %v3441_v56  ;;  %v3445_v60 = vadd.f32 %v3444_v52, %v3274_v54  ;;  %v3446_v59 = vpop.f32.mrb[71].mxu1 }
 0xdb3   : > { %v3922_v37 = vmul.f32 -1.442695, %v3443_v15  ;;  %v3447_v2 = vadd.f32 %v3446_v59, %v3276_v21  ;;  %v3279_v7 = vpop.f32.mrb[56].mxu0 }
 0xdb4   : > { %4476 = vpow2.f32 %v3921_v58  ;;  %v3923_v25 = vmul.f32 -1.442695, %v3445_v60  ;;  %v3281_v63 = vpop.f32.mrb[57].mxu0  ;;  %v3280_v39 = vadd.f32 %v3279_v7, %v6217_v16 }
 0xdb5   : > { %4478 = vpow2.f32 %v3922_v37  ;;  %v3924_v53 = vmul.f32 -1.442695, %v3447_v2  ;;  %v3283_v1 = vpop.f32.mrb[58].mxu0  ;;  %v3282_v30 = vadd.f32 %v3281_v63, %v6217_v16 }
 0xdb6   : > { %v4469_v43 = vpop.eup %4468  ;;  %4480 = vpow2.f32 %v3923_v25  ;;  %v3285_v62 = vpop.f32.mrb[59].mxu0  ;;  %v3284_v12 = vadd.f32 %v3283_v1, %v6220_v45 }
 0xdb7   : > { %v4471_v3 = vpop.eup %4470  ;;  %v3531_v17 = vadd.f32 1.0, %v4469_v43  ;;  %4482 = vpow2.f32 %v3924_v53  ;;  %v3450_v47 = vpop.f32.mrb[72].mxu1  ;;  %v3286_v5 = vadd.f32 %v3285_v62, %v6220_v45 }
 0xdb8   : > { %v4473_v57 = vpop.eup %4472  ;;  %v3532_v46 = vadd.f32 1.0, %v4471_v3  ;;  %v3451_v26 = vadd.f32 %v3450_v47, %v3280_v39  ;;  %v3452_v32 = vpop.f32.mrb[73].mxu1 }
 0xdb9   : > { %v4475_v48 = vpop.eup %4474  ;;  %4484 = vrcp.f32 %v3531_v17  ;;  %v3533_v31 = vadd.f32 1.0, %v4473_v57  ;;  %v3453_v18 = vadd.f32 %v3452_v32, %v3282_v30  ;;  %v3454_v29 = vpop.f32.mrb[74].mxu1 }
 0xdba   : > { %4486 = vrcp.f32 %v3532_v46  ;;  %v3534_v35 = vadd.f32 1.0, %v4475_v48  ;;  %v3925_v19 = vmul.f32 -1.442695, %v3451_v26  ;;  %v3455_v13 = vadd.f32 %v3454_v29, %v3284_v12  ;;  %v3456_v4 = vpop.f32.mrb[75].mxu1 }
 0xdbb   : > { %4488 = vrcp.f32 %v3533_v31  ;;  %v3926_v16 = vmul.f32 -1.442695, %v3453_v18  ;;  %v3457_v22 = vadd.f32 %v3456_v4, %v3286_v5  ;;  %v3289_v40 = vpop.f32.mrb[60].mxu0 }
 0xdbc   : > { %4490 = vrcp.f32 %v3534_v35  ;;  %v3927_v51 = vmul.f32 -1.442695, %v3455_v13  ;;  %v3291_v42 = vpop.f32.mrb[61].mxu0  ;;  %v3290_v45 = vadd.f32 %v3289_v40, %v6222_v44 }
 0xdbd   : > { %4492 = vpow2.f32 %v3925_v19  ;;  %v3928_v33 = vmul.f32 -1.442695, %v3457_v22  ;;  %v3293_v38 = vpop.f32.mrb[62].mxu0  ;;  %v3292_v0 = vadd.f32 %v3291_v42, %v6222_v44 }
 0xdbe   : > { %v4477_v10 = vpop.eup %4476  ;;  %4494 = vpow2.f32 %v3926_v16  ;;  %v3295_v27 = vpop.f32.mrb[63].mxu0  ;;  %v3294_v9 = vadd.f32 %v3293_v38, %v6224_v36 }
 0xdbf   : > { %v4479_v14 = vpop.eup %4478  ;;  %v3535_v11 = vadd.f32 1.0, %v4477_v10  ;;  %4496 = vpow2.f32 %v3927_v51  ;;  %v3460_v23 = vpop.f32.mrb[76].mxu1  ;;  %v3296_v24 = vadd.f32 %v3295_v27, %v6224_v36 }
 0xdc0   : > { %v4481_v34 = vpop.eup %4480  ;;  %v3536_v49 = vadd.f32 1.0, %v4479_v14  ;;  %4498 = vpow2.f32 %v3928_v33  ;;  %v3461_v41 = vadd.f32 %v3460_v23, %v3290_v45  ;;  %v3462_v28 = vpop.f32.mrb[77].mxu1 }
 0xdc1   : > { %v4483_v55 = vpop.eup %4482  ;;  %4500 = vrcp.f32 %v3535_v11  ;;  %v3537_v6 = vadd.f32 1.0, %v4481_v34  ;;  %v3463_v8 = vadd.f32 %v3462_v28, %v3292_v0  ;;  %v3464_v20 = vpop.f32.mrb[78].mxu1 }
 0xdc2   : > { %4502 = vrcp.f32 %v3536_v49  ;;  %v3538_v54 = vadd.f32 1.0, %v4483_v55  ;;  %v3929_v44 = vmul.f32 -1.442695, %v3461_v41  ;;  %v3465_v56 = vadd.f32 %v3464_v20, %v3294_v9  ;;  %v3466_v61 = vpop.f32.mrb[79].mxu1 }
 0xdc3   : > { %v4485_v21 = vpop.eup %4484  ;;  %4504 = vrcp.f32 %v3537_v6  ;;  %v3930_v15 = vmul.f32 -1.442695, %v3463_v8  ;;  %v3467_v52 = vadd.f32 %v3466_v61, %v3296_v24  ;;  %v3299_v58 = vpop.f32.mrb[64].mxu0 }
 0xdc4   : > { %v4487_v60 = vpop.eup %4486  ;;  %3645 = vst [vmem:[%s6226_s2 + $0x120] sm:$0xff] %v4485_v21  ;;  %4506 = vrcp.f32 %v3538_v54  ;;  %v3931_v59 = vmul.f32 -1.442695, %v3465_v56  ;;  %v3301_v36 = vpop.f32.mrb[65].mxu0  ;;  %v3300_v63 = vadd.f32 %v3299_v58, %v6232_v50 }
 0xdc5   : > { %v4489_v37 = vpop.eup %4488  ;;  %3646 = vst [vmem:[%s6226_s2 + $0x128] sm:$0xff] %v4487_v60  ;;  %4508 = vpow2.f32 %v3929_v44  ;;  %v3932_v2 = vmul.f32 -1.442695, %v3467_v52  ;;  %v3303_v7 = vpop.f32.mrb[66].mxu0  ;;  %v3302_v43 = vadd.f32 %v3301_v36, %v6232_v50 }
 0xdc6   : > { %v4491_v25 = vpop.eup %4490  ;;  %3647 = vst [vmem:[%s6226_s2 + $0x130] sm:$0xff] %v4489_v37  ;;  %4510 = vpow2.f32 %v3930_v15  ;;  %v3304_v53 = vpop.f32.mrb[67].mxu0 }
 0xdc7   : > { %v4493_v1 = vpop.eup %4492  ;;  %3648 = vst [vmem:[%s6226_s2 + $0x138] sm:$0xff] %v4491_v25  ;;  %4512 = vpow2.f32 %v3931_v59  ;;  %v3470_v39 = vpop.f32.mrb[80].mxu1 }
 0xdc8   : > { %v4495_v62 = vpop.eup %4494  ;;  %v3539_v3 = vadd.f32 1.0, %v4493_v1  ;;  %4514 = vpow2.f32 %v3932_v2  ;;  %v3471_v17 = vadd.f32 %v3470_v39, %v3300_v63  ;;  %v3472_v30 = vpop.f32.mrb[81].mxu1 }
 0xdc9   : > { %v4497_v47 = vpop.eup %4496  ;;  %v3540_v57 = vadd.f32 1.0, %v4495_v62  ;;  %v3473_v46 = vadd.f32 %v3472_v30, %v3302_v43  ;;  %v3474_v12 = vpop.f32.mrb[82].mxu1 }
 0xdca   : > { %v4499_v26 = vpop.eup %4498  ;;  %4516 = vrcp.f32 %v3539_v3  ;;  %v3541_v32 = vadd.f32 1.0, %v4497_v47  ;;  %v3933_v48 = vmul.f32 -1.442695, %v3471_v17  ;;  %v3475_v31 = vpop.f32.mrb[83].mxu1 }
 0xdcb   : > { %v4501_v50 = vpop.eup %4500  ;;  %4518 = vrcp.f32 %v3540_v57  ;;  %v3542_v5 = vadd.f32 1.0, %v4499_v26  ;;  %v3934_v18 = vmul.f32 -1.442695, %v3473_v46 }
 0xdcc   : > { %v4503_v29 = vpop.eup %4502  ;;  %3649 = vst [vmem:[%s6226_s2 + $0x140] sm:$0xff] %v4501_v50  ;;  %4520 = vrcp.f32 %v3541_v32 }
 0xdcd   : > { %v4505_v35 = vpop.eup %4504  ;;  %3650 = vst [vmem:[%s6226_s2 + $0x148] sm:$0xff] %v4503_v29  ;;  %4522 = vrcp.f32 %v3542_v5 }
 0xdce   : > { %v4507_v19 = vpop.eup %4506  ;;  %3651 = vst [vmem:[%s6226_s2 + $0x150] sm:$0xff] %v4505_v35  ;;  %4524 = vpow2.f32 %v3933_v48 }
 0xdcf   : > { %v4509_v13 = vpop.eup %4508  ;;  %3652 = vst [vmem:[%s6226_s2 + $0x158] sm:$0xff] %v4507_v19  ;;  %4526 = vpow2.f32 %v3934_v18 }
 0xdd0   : > { %v4511_v4 = vpop.eup %4510  ;;  %v3543_v16 = vadd.f32 1.0, %v4509_v13 }
 0xdd1   : > { %v4513_v22 = vpop.eup %4512  ;;  %v3544_v40 = vadd.f32 1.0, %v4511_v4 }
 0xdd2   : > { %v4515_v51 = vpop.eup %4514  ;;  %4528 = vrcp.f32 %v3543_v16  ;;  %v3545_v42 = vadd.f32 1.0, %v4513_v22 }
 0xdd3   : > { %4530 = vrcp.f32 %v3544_v40  ;;  %v3546_v33 = vadd.f32 1.0, %v4515_v51 }
 0xdd4   : > { %v4517_v38 = vpop.eup %4516  ;;  %4532 = vrcp.f32 %v3545_v42 }
 0xdd5   : > { %v4519_v10 = vpop.eup %4518  ;;  %3653 = vst [vmem:[%s6226_s2 + $0x160] sm:$0xff] %v4517_v38  ;;  %4534 = vrcp.f32 %v3546_v33 }
 0xdd6   : > { %v4521_v45 = vpop.eup %4520  ;;  %3654 = vst [vmem:[%s6226_s2 + $0x168] sm:$0xff] %v4519_v10 }
 0xdd7   : > { %v4523_v27 = vpop.eup %4522  ;;  %3655 = vst [vmem:[%s6226_s2 + $0x170] sm:$0xff] %v4521_v45 }
 0xdd8   : > { %v4525_v14 = vpop.eup %4524  ;;  %3656 = vst [vmem:[%s6226_s2 + $0x178] sm:$0xff] %v4523_v27 }
 0xdd9   : > { %v4527_v11 = vpop.eup %4526  ;;  %v3547_v0 = vadd.f32 1.0, %v4525_v14 }
 0xdda   : > { %v3548_v23 = vadd.f32 1.0, %v4527_v11 }
 0xddb   : > { %4536 = vrcp.f32 %v3547_v0 }
 0xddc   : > { %v4529_v34 = vpop.eup %4528  ;;  %4538 = vrcp.f32 %v3548_v23 }
 0xddd   : > { %v4531_v49 = vpop.eup %4530  ;;  %3657 = vst [vmem:[%s6226_s2 + $0x180] sm:$0xff] %v4529_v34 }
 0xdde   : > { %v4533_v9 = vpop.eup %4532  ;;  %3658 = vst [vmem:[%s6226_s2 + $0x188] sm:$0xff] %v4531_v49 }
 0xddf   : > { %v4535_v41 = vpop.eup %4534  ;;  %3659 = vst [vmem:[%s6226_s2 + $0x190] sm:$0xff] %v4533_v9 }
 0xde0   : > { %3660 = vst [vmem:[%s6226_s2 + $0x198] sm:$0xff] %v4535_v41 }
 0xde5   : > { %v4537_v28 = vpop.eup %4536 }
 0xde6   : > { %v4539_v55 = vpop.eup %4538  ;;  %3661 = vst [vmem:[%s6226_s2 + $0x1a0] sm:$0xff] %v4537_v28 }
 0xde7   : > { %3662 = vst [vmem:[%s6226_s2 + $0x1a8] sm:$0xff] %v4539_v55 }
 0xde8   : > { %4581 = shalt.err (!%p4578_p9)
}
 0xde9   : > { %s4582_s2 = scalar_lea.hbm %s6338_s23, 6912  ;;  %s4586_s0 = scalar_lea.hbm %s6473_s1, 13824 }
 0xdea   : > { %p4583_p10 = scmp.ne.s32.totalorder %s6338_s23, %s4582_s2  ;;  %p4587_p13 = scmp.lt.u32.totalorder %s6338_s23, %s6473_s1 }
 0xdeb   : > { %p4588_p0 = scmp.lt.u32.totalorder %s4586_s0, %s4582_s2  ;;  %p4590_p2 = scmp.lt.u32.totalorder %s4582_s2, %s6338_s23 }
 0xdec   : > { %p4584_p11 = pnand %p4583_p10, %p4799_p5 }
 0xded   : > { %p4589_p1 = por %p4588_p0, %p4587_p13 }
 0xdee   : > { %p4585_p12 = pneg %p4584_p11 }
 0xdef   : > { %p4591_p3 = por %p4590_p2, %p4589_p1 }
 0xdf1   : > { %p4592_p4 = pnand %p4591_p3, %p4585_p12 }
 0xdf3   : > { %4595 = shalt.err (!%p4592_p4)
}
 0xdf4   : > { %s4650_s24 = smov 256   ;;  %s6474_s26 = smov 16  }
 0xdf5   : > { %4251 = dma.vmem_to_hbm [thread:$0]  (%p4799_p5), %s6340_s21, 6912, %s6338_s23, %s3669_s4, %s4650_s24, %s4650_s24, %s6474_s26  }
 0xdf6 PF: > { %s6475_s30 = sld [smem:[#allocation8_spill]]  ;;  %p4261_p7 = scmp.ge.s32.totalorder %s4634_s27, 2 }
 0xdf8   : > { %p4255_p8 = pnand %p4261_p7, %p4803_p6 }
 0xdfc   : > { %s3713_s6 = sand.u32 1, %s6475_s30  }
 0xdfd   : > { %s3714_s2 = scalar_lea.sflag [#allocation3], %s3713_s6 }
 0xdfe   : > { %4613 = dma.done.wait (!%p4255_p8), %s3714_s2, 512  }
 0xdff   : > { %4615 = vsyncadd (!%p4255_p8), %s3714_s2, 4294966784  ;;  %s3723_s0 = scalar_lea.sflag [#allocation5], %s3713_s6 }
 0xe00   : > { %4617 = dma.done.wait (!%p4255_p8), %s3723_s0, 6912  }
 0xe01   : > { %4619 = vsyncadd (!%p4255_p8), %s3723_s0, 4294960384  ;;  %s6477_s27 = sld [smem:[#allocation10_spill]]  ;;  %s6478_s5 = sld [smem:[#allocation9_spill]] }
 0xe02   : > { %s6479_s26 = sld [smem:[#allocation11_spill]]  ;;  %s6480_s2 = smov %s4626_s25 }
 0xe07   : > { %p35_p5 = scmp.ge.s32.totalorder %s6477_s27, 4   ;;  %s6481_s25 = smov %s6478_s5 }
 0xe09   :  { %37 = sbr.rel (!%p35_p5) target bundleno = 15 (0xf), region = 155 }
 0xe10   :  { %3728 = vsyncpa [#allocation3], 1 }
 0xe11   :  { %3730 = vsyncpa [#allocation3 + $0x1], 1 }
 0xe12   :  { %3731 = vsyncpa [#allocation5], 1 }
 0xe13   :  { %3733 = vsyncpa [#allocation5 + $0x1], 1 }

</bundles_post_ra>
